<compile_context>
chip_gen: v5e
topology: v5e:2x2
jax: 0.10.0
libtpu: 0.0.40
codegen_flags: <defaults>
</compile_context>

<pallas_src>
import functools

import jax
import jax.numpy as jnp
from jax.experimental import pallas as pl
from jax.experimental.pallas import tpu as pltpu

# ---------------- model hyper-parameters (synthetic, deterministic) ----------------
INPUT_SIZE = 16
HIDDEN_SIZE = 32
NUM_LAYERS = 3            # number of (Linear, BatchNorm1d, ReLU) blocks
OUTPUT_SIZE = 4
SCALE = 2.0
FACTOR = 0.5
BN_EPS = 1e-5
BATCH = 8                 # rows per independent BatchNorm batch (one BN statistic group)
NUM_BATCHES = 32          # independent batches evaluated in one pallas_call
BATCHES_PER_BLOCK = 16    # batches fused per grid step -> (128,128) activation block
PAD = 128                 # lane-pad every feature dimension to a full vreg width


def _mlp_kernel(num_layers, n_batches, batch, scale, x_ref, w_ref, bgb_ref, out_ref):
    """Forward pass for `n_batches` independent batches stacked along rows.

    x_ref   : (n_batches*batch, 128)   f32  activations, features zero-padded to 128
    w_ref   : (L+1, 128, 128)          f32  stacked, pre-transposed, zero-padded weights
                                            (final layer pre-multiplied by `factor`)
    bgb_ref : (L+1, 8, 128)            f32  rows 0..2 = [bias, gamma, beta], rest zero
    out_ref : (n_batches*batch, 128)   f32  lane-dense output (first OUTPUT_SIZE cols real)
    """
    rows = n_batches * batch
    h = x_ref[...]                               # (rows, 128) f32

    for layer in range(num_layers):
        w = w_ref[layer]                         # (128, 128) per-layer slice (16 vregs)
        bgb = bgb_ref[layer]                     # (8, 128)   one vreg
        b = bgb[0:1, :]
        g = bgb[1:2, :]
        be = bgb[2:3, :]

        # Linear (MXU matmul, f32 accumulate), M = rows fills the systolic array.
        h = jnp.dot(h, w, preferred_element_type=jnp.float32) + b

        # BatchNorm1d (training mode): per-batch-of-`batch` mean + biased variance.
        h3 = h.reshape(n_batches, batch, PAD)
        mean = jnp.mean(h3, axis=1, keepdims=True)
        centered = h3 - mean
        var = jnp.mean(centered * centered, axis=1, keepdims=True)
        s = g * jax.lax.rsqrt(var + BN_EPS)      # gamma folded into rsqrt scale
        h = (centered * s + be).reshape(rows, PAD)

        # ReLU
        h = jnp.maximum(h, 0.0)

    # Final Linear (factor already folded into W/b at pack time).
    w = w_ref[num_layers]
    b = bgb_ref[num_layers][0:1, :]
    y = jnp.dot(h, w, preferred_element_type=jnp.float32) + b

    # scale * tanh(y)  (tanh goes to the EUP; padded cols stay exactly 0)
    out_ref[...] = scale * jnp.tanh(y)


def make_params(key, input_size, hidden_size, num_layers, output_size):
    """Deterministic parameter init mirroring torch defaults.

    nn.Linear:      W, b ~ U(-1/sqrt(fan_in), 1/sqrt(fan_in))
    nn.BatchNorm1d: gamma = 1, beta = 0
    Linear weights returned pre-transposed to (in, out).
    Returns the flat list [W0, b0, g0, be0, ..., W_out, b_out] (unpadded reference params).
    """
    params = []
    fan_ins = [input_size] + [hidden_size] * (num_layers - 1)
    for fan_in in fan_ins:
        key, kw, kb = jax.random.split(key, 3)
        bound = 1.0 / jnp.sqrt(float(fan_in))
        w = jax.random.uniform(kw, (hidden_size, fan_in), jnp.float32, -bound, bound)
        b = jax.random.uniform(kb, (1, hidden_size), jnp.float32, -bound, bound)
        gamma = jnp.ones((1, hidden_size), jnp.float32)
        beta = jnp.zeros((1, hidden_size), jnp.float32)
        params += [w.T, b, gamma, beta]

    key, kw, kb = jax.random.split(key, 3)
    bound = 1.0 / jnp.sqrt(float(hidden_size))
    w_out = jax.random.uniform(kw, (output_size, hidden_size), jnp.float32, -bound, bound)
    b_out = jax.random.uniform(kb, (1, output_size), jnp.float32, -bound, bound)
    params += [w_out.T, b_out]
    return params


def pack_params(params, num_layers, factor, pad=PAD):
    """Pack params into 2 lane-padded stacked arrays (built once, cached across calls).

    w_stack:   (L+1, pad, pad)  zero-padded, pre-transposed weights; final layer *= factor
    bgb_stack: (L+1, 8, pad)    tile-native; rows = [bias, gamma, beta, 0, 0, 0, 0, 0]
    """
    n_mats = num_layers + 1
    w_stack = jnp.zeros((n_mats, pad, pad), jnp.float32)
    bgb_stack = jnp.zeros((n_mats, 8, pad), jnp.float32)

    idx = 0
    for layer in range(num_layers):
        w, b, g, be = params[idx:idx + 4]
        idx += 4
        kin, kout = w.shape
        w_stack = w_stack.at[layer, :kin, :kout].set(w)
        bgb_stack = bgb_stack.at[layer, 0, :kout].set(b[0])
        bgb_stack = bgb_stack.at[layer, 1, :kout].set(g[0])
        bgb_stack = bgb_stack.at[layer, 2, :kout].set(be[0])

    w_out, b_out = params[idx:idx + 2]
    kin, kout = w_out.shape
    w_stack = w_stack.at[num_layers, :kin, :kout].set(factor * w_out)
    bgb_stack = bgb_stack.at[num_layers, 0, :kout].set(factor * b_out[0])
    return w_stack, bgb_stack


def mlp_scaled_tanh(x, packed_params, *, num_layers=NUM_LAYERS, output_size=OUTPUT_SIZE,
                    scale=SCALE, batches_per_block=BATCHES_PER_BLOCK):
    """x: (num_batches, batch, in_feat) or (batch, in_feat). BN stats are per batch."""
    w_stack, bgb_stack = packed_params
    pad = w_stack.shape[-1]

    squeeze = False
    if x.ndim == 2:
        x = x[None]
        squeeze = True
    num_batches, batch, in_feat = x.shape
    assert batch % 8 == 0, "batch (BN group) must be a multiple of 8 sublanes"

    bpb = max(1, min(batches_per_block, num_batches))
    while num_batches % bpb:                     # keep grid evenly divisible
        bpb -= 1
    rows_per_block = bpb * batch
    num_groups = num_batches // bpb
    total_rows = num_batches * batch

    # Lane-pad the input once (single cheap XLA pad outside the kernel).
    x2 = x.reshape(total_rows, in_feat).astype(jnp.float32)
    x_pad = jnp.pad(x2, ((0, 0), (0, pad - in_feat)))

    kernel = functools.partial(_mlp_kernel, num_layers, bpb, batch, scale)

    out_pad = pl.pallas_call(
        kernel,
        out_shape=jax.ShapeDtypeStruct((total_rows, pad), jnp.float32),
        grid=(num_groups,),
        in_specs=[
            pl.BlockSpec((rows_per_block, pad), lambda g: (g, 0)),
            # Constant block index: weights DMA'd once, VMEM-resident across grid steps.
            pl.BlockSpec(w_stack.shape, lambda g: (0, 0, 0)),
            pl.BlockSpec(bgb_stack.shape, lambda g: (0, 0, 0)),
        ],
        out_specs=pl.BlockSpec((rows_per_block, pad), lambda g: (g, 0)),
        compiler_params=pltpu.CompilerParams(
            dimension_semantics=("parallel",)),   # lets v7x's 2 TCs split the batches
    )(x_pad, w_stack, bgb_stack)

    out = out_pad[:, :output_size].reshape(num_batches, batch, output_size)
    return out[0] if squeeze else out


def reference_forward(x, params, *, num_layers=NUM_LAYERS, scale=SCALE, factor=FACTOR):
    """Pure-JAX reference for one batch (unpadded params, explicit factor)."""
    h = x.astype(jnp.float32)
    idx = 0
    for _ in range(num_layers):
        w, b, g, be = params[idx:idx + 4]
        idx += 4
        h = h @ w + b
        mean = jnp.mean(h, axis=0, keepdims=True)
        var = jnp.mean((h - mean) ** 2, axis=0, keepdims=True)
        h = (h - mean) / jnp.sqrt(var + BN_EPS)
        h = h * g + be
        h = jnp.maximum(h, 0.0)
    w, b = params[idx:idx + 2]
    y = h @ w + b
    return scale * jnp.tanh(factor * y)


if __name__ == "__main__":
    key = jax.random.PRNGKey(0)
    key, kx = jax.random.split(key)
    # NUM_BATCHES independent batches of BATCH rows each (BN statistics are per batch).
    x = jax.random.normal(kx, (NUM_BATCHES, BATCH, INPUT_SIZE), jnp.float32)

    params = make_params(key, INPUT_SIZE, HIDDEN_SIZE, NUM_LAYERS, OUTPUT_SIZE)
    packed = pack_params(params, NUM_LAYERS, FACTOR)     # built once, reused across calls

    out = mlp_scaled_tanh(x, packed)
    out = jax.block_until_ready(out)
    assert out.shape == (NUM_BATCHES, BATCH, OUTPUT_SIZE)

    ref = jnp.stack([reference_forward(x[i], params) for i in range(NUM_BATCHES)])
    max_err = jnp.max(jnp.abs(out - ref))
    assert jnp.allclose(out, ref, atol=1e-4, rtol=1e-4), f"max abs err {max_err}"

    print("KERNEL_OK")
</pallas_src>

<mosaic_0001>
module attributes {stable_mosaic.version = 11 : i64} {
  func.func @_mlp_kernel(%arg0: i32, %arg1: memref<128x128xf32, #tpu.memory_space<vmem>>, %arg2: memref<4x128x128xf32, #tpu.memory_space<vmem>>, %arg3: memref<4x8x128xf32, #tpu.memory_space<vmem>>, %arg4: memref<128x128xf32, #tpu.memory_space<vmem>>) attributes {dimension_semantics = [#tpu.dimension_semantics<parallel>], iteration_bounds = array<i64: 2>, scalar_prefetch = 0 : i64, scratch_operands = 0 : i64, tpu.core_type = #tpu.core_type<tc>, window_params = [{transform_indices = @transform_0, window_bounds = array<i64: 128, 128>}, {pipeline_mode = #tpu.pipeline_mode<synchronous>, transform_indices = @transform_1, window_bounds = array<i64: 4, 128, 128>}, {pipeline_mode = #tpu.pipeline_mode<synchronous>, transform_indices = @transform_2, window_bounds = array<i64: 4, 8, 128>}, {transform_indices = @transform_3, window_bounds = array<i64: 128, 128>}]} {
    %c0 = arith.constant 0 : index
    %c0_0 = arith.constant 0 : index
    %0 = vector.load %arg1[%c0, %c0_0] : memref<128x128xf32, #tpu.memory_space<vmem>>, vector<128x128xf32>
    %c0_1 = arith.constant 0 : index
    %c0_2 = arith.constant 0 : index
    %c0_3 = arith.constant 0 : index
    %1 = vector.load %arg2[%c0_1, %c0_2, %c0_3] : memref<4x128x128xf32, #tpu.memory_space<vmem>>, vector<1x128x128xf32>
    %2 = vector.shape_cast %1 : vector<1x128x128xf32> to vector<128x128xf32>
    %c0_4 = arith.constant 0 : index
    %c0_5 = arith.constant 0 : index
    %c0_6 = arith.constant 0 : index
    %3 = vector.load %arg3[%c0_4, %c0_5, %c0_6] : memref<4x8x128xf32, #tpu.memory_space<vmem>>, vector<1x8x128xf32>
    %4 = vector.shape_cast %3 : vector<1x8x128xf32> to vector<8x128xf32>
    %5 = vector.extract_strided_slice %4 {offsets = [0, 0], sizes = [1, 128], strides = [1, 1]} : vector<8x128xf32> to vector<1x128xf32>
    %6 = vector.extract_strided_slice %4 {offsets = [1, 0], sizes = [1, 128], strides = [1, 1]} : vector<8x128xf32> to vector<1x128xf32>
    %7 = vector.extract_strided_slice %4 {offsets = [2, 0], sizes = [1, 128], strides = [1, 1]} : vector<8x128xf32> to vector<1x128xf32>
    %cst = arith.constant dense<0.000000e+00> : vector<128x128xf32>
    %8 = tpu.matmul %0, %2, %cst {dimension_numbers = #tpu.dot_dimension_numbers<[1], [0], [0], [1], [0, 0, 1, 1], [], []>} : vector<128x128xf32>, vector<128x128xf32>, vector<128x128xf32> -> vector<128x128xf32>
    %9 = vector.broadcast %5 : vector<1x128xf32> to vector<128x128xf32>
    %10 = arith.addf %8, %9 : vector<128x128xf32>
    %11 = vector.shape_cast %10 : vector<128x128xf32> to vector<16x8x128xf32>
    %cst_7 = arith.constant dense<0.000000e+00> : vector<16x128xf32>
    %12 = vector.multi_reduction <add>, %11, %cst_7 [1] : vector<16x8x128xf32> to vector<16x128xf32>
    %13 = vector.shape_cast %12 : vector<16x128xf32> to vector<16x1x128xf32>
    %cst_8 = arith.constant 8.000000e+00 : f32
    %14 = vector.broadcast %cst_8 : f32 to vector<16x1x128xf32>
    %15 = arith.divf %13, %14 : vector<16x1x128xf32>
    %16 = vector.broadcast %15 : vector<16x1x128xf32> to vector<16x8x128xf32>
    %17 = arith.subf %11, %16 : vector<16x8x128xf32>
    %18 = arith.mulf %17, %17 : vector<16x8x128xf32>
    %cst_9 = arith.constant dense<0.000000e+00> : vector<16x128xf32>
    %19 = vector.multi_reduction <add>, %18, %cst_9 [1] : vector<16x8x128xf32> to vector<16x128xf32>
    %20 = vector.shape_cast %19 : vector<16x128xf32> to vector<16x1x128xf32>
    %cst_10 = arith.constant 8.000000e+00 : f32
    %21 = vector.broadcast %cst_10 : f32 to vector<16x1x128xf32>
    %22 = arith.divf %20, %21 : vector<16x1x128xf32>
    %cst_11 = arith.constant 9.99999974E-6 : f32
    %23 = vector.broadcast %cst_11 : f32 to vector<16x1x128xf32>
    %24 = arith.addf %22, %23 : vector<16x1x128xf32>
    %25 = math.rsqrt %24 : vector<16x1x128xf32>
    %26 = vector.shape_cast %6 : vector<1x128xf32> to vector<1x1x128xf32>
    %27 = vector.broadcast %26 : vector<1x1x128xf32> to vector<16x1x128xf32>
    %28 = arith.mulf %27, %25 : vector<16x1x128xf32>
    %29 = vector.broadcast %28 : vector<16x1x128xf32> to vector<16x8x128xf32>
    %30 = arith.mulf %17, %29 : vector<16x8x128xf32>
    %31 = vector.shape_cast %7 : vector<1x128xf32> to vector<1x1x128xf32>
    %32 = vector.broadcast %31 : vector<1x1x128xf32> to vector<16x8x128xf32>
    %33 = arith.addf %30, %32 : vector<16x8x128xf32>
    %34 = vector.shape_cast %33 : vector<16x8x128xf32> to vector<128x128xf32>
    %cst_12 = arith.constant 0.000000e+00 : f32
    %35 = vector.broadcast %cst_12 : f32 to vector<128x128xf32>
    %36 = arith.maximumf %34, %35 : vector<128x128xf32>
    %c1 = arith.constant 1 : index
    %c0_13 = arith.constant 0 : index
    %c0_14 = arith.constant 0 : index
    %37 = vector.load %arg2[%c1, %c0_13, %c0_14] : memref<4x128x128xf32, #tpu.memory_space<vmem>>, vector<1x128x128xf32>
    %38 = vector.shape_cast %37 : vector<1x128x128xf32> to vector<128x128xf32>
    %c1_15 = arith.constant 1 : index
    %c0_16 = arith.constant 0 : index
    %c0_17 = arith.constant 0 : index
    %39 = vector.load %arg3[%c1_15, %c0_16, %c0_17] : memref<4x8x128xf32, #tpu.memory_space<vmem>>, vector<1x8x128xf32>
    %40 = vector.shape_cast %39 : vector<1x8x128xf32> to vector<8x128xf32>
    %41 = vector.extract_strided_slice %40 {offsets = [0, 0], sizes = [1, 128], strides = [1, 1]} : vector<8x128xf32> to vector<1x128xf32>
    %42 = vector.extract_strided_slice %40 {offsets = [1, 0], sizes = [1, 128], strides = [1, 1]} : vector<8x128xf32> to vector<1x128xf32>
    %43 = vector.extract_strided_slice %40 {offsets = [2, 0], sizes = [1, 128], strides = [1, 1]} : vector<8x128xf32> to vector<1x128xf32>
    %cst_18 = arith.constant dense<0.000000e+00> : vector<128x128xf32>
    %44 = tpu.matmul %36, %38, %cst_18 {dimension_numbers = #tpu.dot_dimension_numbers<[1], [0], [0], [1], [0, 0, 1, 1], [], []>} : vector<128x128xf32>, vector<128x128xf32>, vector<128x128xf32> -> vector<128x128xf32>
    %45 = vector.broadcast %41 : vector<1x128xf32> to vector<128x128xf32>
    %46 = arith.addf %44, %45 : vector<128x128xf32>
    %47 = vector.shape_cast %46 : vector<128x128xf32> to vector<16x8x128xf32>
    %cst_19 = arith.constant dense<0.000000e+00> : vector<16x128xf32>
    %48 = vector.multi_reduction <add>, %47, %cst_19 [1] : vector<16x8x128xf32> to vector<16x128xf32>
    %49 = vector.shape_cast %48 : vector<16x128xf32> to vector<16x1x128xf32>
    %cst_20 = arith.constant 8.000000e+00 : f32
    %50 = vector.broadcast %cst_20 : f32 to vector<16x1x128xf32>
    %51 = arith.divf %49, %50 : vector<16x1x128xf32>
    %52 = vector.broadcast %51 : vector<16x1x128xf32> to vector<16x8x128xf32>
    %53 = arith.subf %47, %52 : vector<16x8x128xf32>
    %54 = arith.mulf %53, %53 : vector<16x8x128xf32>
    %cst_21 = arith.constant dense<0.000000e+00> : vector<16x128xf32>
    %55 = vector.multi_reduction <add>, %54, %cst_21 [1] : vector<16x8x128xf32> to vector<16x128xf32>
    %56 = vector.shape_cast %55 : vector<16x128xf32> to vector<16x1x128xf32>
    %cst_22 = arith.constant 8.000000e+00 : f32
    %57 = vector.broadcast %cst_22 : f32 to vector<16x1x128xf32>
    %58 = arith.divf %56, %57 : vector<16x1x128xf32>
    %cst_23 = arith.constant 9.99999974E-6 : f32
    %59 = vector.broadcast %cst_23 : f32 to vector<16x1x128xf32>
    %60 = arith.addf %58, %59 : vector<16x1x128xf32>
    %61 = math.rsqrt %60 : vector<16x1x128xf32>
    %62 = vector.shape_cast %42 : vector<1x128xf32> to vector<1x1x128xf32>
    %63 = vector.broadcast %62 : vector<1x1x128xf32> to vector<16x1x128xf32>
    %64 = arith.mulf %63, %61 : vector<16x1x128xf32>
    %65 = vector.broadcast %64 : vector<16x1x128xf32> to vector<16x8x128xf32>
    %66 = arith.mulf %53, %65 : vector<16x8x128xf32>
    %67 = vector.shape_cast %43 : vector<1x128xf32> to vector<1x1x128xf32>
    %68 = vector.broadcast %67 : vector<1x1x128xf32> to vector<16x8x128xf32>
    %69 = arith.addf %66, %68 : vector<16x8x128xf32>
    %70 = vector.shape_cast %69 : vector<16x8x128xf32> to vector<128x128xf32>
    %cst_24 = arith.constant 0.000000e+00 : f32
    %71 = vector.broadcast %cst_24 : f32 to vector<128x128xf32>
    %72 = arith.maximumf %70, %71 : vector<128x128xf32>
    %c2 = arith.constant 2 : index
    %c0_25 = arith.constant 0 : index
    %c0_26 = arith.constant 0 : index
    %73 = vector.load %arg2[%c2, %c0_25, %c0_26] : memref<4x128x128xf32, #tpu.memory_space<vmem>>, vector<1x128x128xf32>
    %74 = vector.shape_cast %73 : vector<1x128x128xf32> to vector<128x128xf32>
    %c2_27 = arith.constant 2 : index
    %c0_28 = arith.constant 0 : index
    %c0_29 = arith.constant 0 : index
    %75 = vector.load %arg3[%c2_27, %c0_28, %c0_29] : memref<4x8x128xf32, #tpu.memory_space<vmem>>, vector<1x8x128xf32>
    %76 = vector.shape_cast %75 : vector<1x8x128xf32> to vector<8x128xf32>
    %77 = vector.extract_strided_slice %76 {offsets = [0, 0], sizes = [1, 128], strides = [1, 1]} : vector<8x128xf32> to vector<1x128xf32>
    %78 = vector.extract_strided_slice %76 {offsets = [1, 0], sizes = [1, 128], strides = [1, 1]} : vector<8x128xf32> to vector<1x128xf32>
    %79 = vector.extract_strided_slice %76 {offsets = [2, 0], sizes = [1, 128], strides = [1, 1]} : vector<8x128xf32> to vector<1x128xf32>
    %cst_30 = arith.constant dense<0.000000e+00> : vector<128x128xf32>
    %80 = tpu.matmul %72, %74, %cst_30 {dimension_numbers = #tpu.dot_dimension_numbers<[1], [0], [0], [1], [0, 0, 1, 1], [], []>} : vector<128x128xf32>, vector<128x128xf32>, vector<128x128xf32> -> vector<128x128xf32>
    %81 = vector.broadcast %77 : vector<1x128xf32> to vector<128x128xf32>
    %82 = arith.addf %80, %81 : vector<128x128xf32>
    %83 = vector.shape_cast %82 : vector<128x128xf32> to vector<16x8x128xf32>
    %cst_31 = arith.constant dense<0.000000e+00> : vector<16x128xf32>
    %84 = vector.multi_reduction <add>, %83, %cst_31 [1] : vector<16x8x128xf32> to vector<16x128xf32>
    %85 = vector.shape_cast %84 : vector<16x128xf32> to vector<16x1x128xf32>
    %cst_32 = arith.constant 8.000000e+00 : f32
    %86 = vector.broadcast %cst_32 : f32 to vector<16x1x128xf32>
    %87 = arith.divf %85, %86 : vector<16x1x128xf32>
    %88 = vector.broadcast %87 : vector<16x1x128xf32> to vector<16x8x128xf32>
    %89 = arith.subf %83, %88 : vector<16x8x128xf32>
    %90 = arith.mulf %89, %89 : vector<16x8x128xf32>
    %cst_33 = arith.constant dense<0.000000e+00> : vector<16x128xf32>
    %91 = vector.multi_reduction <add>, %90, %cst_33 [1] : vector<16x8x128xf32> to vector<16x128xf32>
    %92 = vector.shape_cast %91 : vector<16x128xf32> to vector<16x1x128xf32>
    %cst_34 = arith.constant 8.000000e+00 : f32
    %93 = vector.broadcast %cst_34 : f32 to vector<16x1x128xf32>
    %94 = arith.divf %92, %93 : vector<16x1x128xf32>
    %cst_35 = arith.constant 9.99999974E-6 : f32
    %95 = vector.broadcast %cst_35 : f32 to vector<16x1x128xf32>
    %96 = arith.addf %94, %95 : vector<16x1x128xf32>
    %97 = math.rsqrt %96 : vector<16x1x128xf32>
    %98 = vector.shape_cast %78 : vector<1x128xf32> to vector<1x1x128xf32>
    %99 = vector.broadcast %98 : vector<1x1x128xf32> to vector<16x1x128xf32>
    %100 = arith.mulf %99, %97 : vector<16x1x128xf32>
    %101 = vector.broadcast %100 : vector<16x1x128xf32> to vector<16x8x128xf32>
    %102 = arith.mulf %89, %101 : vector<16x8x128xf32>
    %103 = vector.shape_cast %79 : vector<1x128xf32> to vector<1x1x128xf32>
    %104 = vector.broadcast %103 : vector<1x1x128xf32> to vector<16x8x128xf32>
    %105 = arith.addf %102, %104 : vector<16x8x128xf32>
    %106 = vector.shape_cast %105 : vector<16x8x128xf32> to vector<128x128xf32>
    %cst_36 = arith.constant 0.000000e+00 : f32
    %107 = vector.broadcast %cst_36 : f32 to vector<128x128xf32>
    %108 = arith.maximumf %106, %107 : vector<128x128xf32>
    %c3 = arith.constant 3 : index
    %c0_37 = arith.constant 0 : index
    %c0_38 = arith.constant 0 : index
    %109 = vector.load %arg2[%c3, %c0_37, %c0_38] : memref<4x128x128xf32, #tpu.memory_space<vmem>>, vector<1x128x128xf32>
    %110 = vector.shape_cast %109 : vector<1x128x128xf32> to vector<128x128xf32>
    %c3_39 = arith.constant 3 : index
    %c0_40 = arith.constant 0 : index
    %c0_41 = arith.constant 0 : index
    %111 = vector.load %arg3[%c3_39, %c0_40, %c0_41] : memref<4x8x128xf32, #tpu.memory_space<vmem>>, vector<1x8x128xf32>
    %112 = vector.shape_cast %111 : vector<1x8x128xf32> to vector<8x128xf32>
    %113 = vector.extract_strided_slice %112 {offsets = [0, 0], sizes = [1, 128], strides = [1, 1]} : vector<8x128xf32> to vector<1x128xf32>
    %cst_42 = arith.constant dense<0.000000e+00> : vector<128x128xf32>
    %114 = tpu.matmul %108, %110, %cst_42 {dimension_numbers = #tpu.dot_dimension_numbers<[1], [0], [0], [1], [0, 0, 1, 1], [], []>} : vector<128x128xf32>, vector<128x128xf32>, vector<128x128xf32> -> vector<128x128xf32>
    %115 = vector.broadcast %113 : vector<1x128xf32> to vector<128x128xf32>
    %116 = arith.addf %114, %115 : vector<128x128xf32>
    %117 = math.tanh %116 : vector<128x128xf32>
    %cst_43 = arith.constant 2.000000e+00 : f32
    %118 = vector.broadcast %cst_43 : f32 to vector<128x128xf32>
    %119 = arith.mulf %118, %117 : vector<128x128xf32>
    %c0_44 = arith.constant 0 : index
    %c0_45 = arith.constant 0 : index
    %120 = vector.load %arg4[%c0_44, %c0_45] : memref<128x128xf32, #tpu.memory_space<vmem>>, vector<128x128xf32>
    tpu.vector_store %arg4[%c0_44, %c0_45], %119 {strides = array<i32>} : memref<128x128xf32, #tpu.memory_space<vmem>>, vector<128x128xf32>,
    return
  }
  func.func @transform_0(%arg0: i32) -> (i32, i32) {
    %c0_i32 = arith.constant 0 : i32
    %c0_i32_0 = arith.constant 0 : i32
    return %arg0, %c0_i32 : i32, i32
  }
  func.func @transform_1(%arg0: i32) -> (i32, i32, i32) {
    %c0_i32 = arith.constant 0 : i32
    %c0_i32_0 = arith.constant 0 : i32
    %c0_i32_1 = arith.constant 0 : i32
    %c0_i32_2 = arith.constant 0 : i32
    return %c0_i32, %c0_i32_0, %c0_i32_1 : i32, i32, i32
  }
  func.func @transform_2(%arg0: i32) -> (i32, i32, i32) {
    %c0_i32 = arith.constant 0 : i32
    %c0_i32_0 = arith.constant 0 : i32
    %c0_i32_1 = arith.constant 0 : i32
    %c0_i32_2 = arith.constant 0 : i32
    return %c0_i32, %c0_i32_0, %c0_i32_1 : i32, i32, i32
  }
  func.func @transform_3(%arg0: i32) -> (i32, i32) {
    %c0_i32 = arith.constant 0 : i32
    %c0_i32_0 = arith.constant 0 : i32
    return %arg0, %c0_i32 : i32, i32
  }
}

</mosaic_0001>

<bundles_post_ra>
// kernel: tpu_custom_call.1
= control target key start
LH: loop header
LB: loop body
LE: loop exit
PB: predicated region body
PF: predicated region fallthrough
CT: control target
= control target key end

     0   :  { %8 = vsyncpa [#allocation3], 0  ;;  %s3868_s0 = inlined_call_operand.hbm [shape: f32[256,128], index: 0, kind: input, shape index: {}]   ;;  %s3869_s1 = inlined_call_operand.hbm [shape: f32[4,128,128], index: 1, kind: input, shape index: {}]   ;;  %s3870_s2 = inlined_call_operand.hbm [shape: f32[4,8,128], index: 2, kind: input, shape index: {}]   ;;  %s3871_s3 = inlined_call_operand.hbm [shape: f32[256,128], index: 3, kind: output, shape index: {}]  }
   0x1   :  { %10 = vsyncpa [#allocation3 + $0x1], 0 }
   0x2   :  { %11 = vsyncpa [#allocation6], 0 }
   0x3   :  { %12 = vsyncpa [#allocation4], 0 }
   0x4   :  { %14 = vsyncpa [#allocation4 + $0x1], 0  ;;  %s2696_s12 = smov 0   ;;  %s2698_s13 = smov 0  }
   0x5   :  { %s2700_s14 = smov 0   ;;  %s2702_s15 = smov 0  }
   0x6 LB: > { %s2717_s16 = sadd.s32 4294967295, %s2667_s15   ;;  %s2282_s17 = sadd.s32 4294967294, %s2667_s15   ;;  %s2667_s15 = sphi %s2702_s15, %s3881_s15   ;;  %s2663_s14 = sphi %s2700_s14, %s3880_s14   ;;  %s2659_s13 = sphi %s2698_s13, %s3879_s13   ;;  %s2655_s12 = sphi %s2696_s12, %s3878_s12  }
   0x7   : > { %p40_p0 = scmp.ne.s32.totalorder %s2659_s13, %s2655_s12  ;;  %p41_p1 = scmp.eq.s32.totalorder %s2717_s16, 0 }
   0x8   : > { %p106_p2 = scmp.eq.s32.totalorder %s2717_s16, 1  ;;  %p112_p3 = scmp.eq.s32.totalorder %s2282_s17, 1 }
   0x9   : > { %p2726_p4 = por %p41_p1, %p40_p0  ;;  %p2283_p5 = scmp.ge.s32.totalorder %s2667_s15, 1 }
   0xa   : > { %p2731_p6 = por %p112_p3, %p40_p0  ;;  %p119_p7 = scmp.lt.s32.totalorder %s2667_s15, 3 }
   0xb   : > { %s130_s22 = sshll.u32 %s3869_s1, 4  ;;  %s2669_s24 = smov [#allocation5]   ;;  %s131_s22 = int_to_ptr.hbm [resolvable:$true] %s130_s22 }
   0xc   : > { %p2739_p8 = pnand %p2283_p5, %p119_p7  ;;  %s132_s25 = sshll.u32 %s2669_s24, 4  ;;  %s133_s25 = int_to_ptr.vmem [resolvable:$true] %s132_s25 }
   0xd   : > { %s144_s28 = sshll.u32 %s3870_s2, 4  ;;  %s2670_s29 = smov 128   ;;  %s145_s28 = int_to_ptr.hbm [resolvable:$true] %s144_s28 }
   0xe   : > { %p2314_p9 = pneg %p2739_p8  ;;  %s2671_s30 = smov 8  }
   0xf   : > { %s2672_s4 = smov [#allocation7]   ;;  %s2758_s6 = sadd.s32 1, %s2667_s15  }
  0x10   : > { %p2315_p10 = pnand %p2314_p9, %p41_p1  ;;  %s146_s5 = sshll.u32 %s2672_s4, 4  ;;  %s147_s5 = int_to_ptr.vmem [resolvable:$true] %s146_s5 }
  0x11   : > { %s27_s7 = sadd.s32 1, %s2663_s14  ;;  %s24_s8 = ssub.s32 %s2667_s15, %s2758_s6 }
  0x12   : > { %2317 = dma.hbm_to_vmem [thread:$0]  (!%p2315_p10), %s131_s22, 8192, %s133_s25, [#allocation6], %s2670_s29, %s2670_s29, %s2671_s30  }
  0x13   : > { %2320 = dma.hbm_to_vmem [thread:$0]  (!%p2315_p10), %s145_s28, 512, %s147_s5, [#allocation6], %s2670_s29, %s2670_s29, %s2671_s30  }
  0x14   : > { %p34_p12 = scmp.ne.s32.totalorder %s2663_s14, %s2659_s13  ;;  %p25_p13 = scmp.eq.s32.totalorder %s24_s8, 0 }
  0x15   : > { %p35_p0 = scmp.eq.s32.totalorder %s2667_s15, 0  ;;  %p2331_p5 = scmp.lt.s32.totalorder %s2667_s15, 2 }
  0x16   : > { %p2768_p3 = por %p106_p2, %p34_p12  ;;  %s160_s11 = sand.u32 1, %s2663_s14  }
  0x17   : > { %s2774_s10 = scalar_select %p25_p13, %s2663_s14, %s27_s7  }
  0x18   : > { %p36_p7 = por %p35_p0, %p34_p12  ;;  %s2287_s17 = sshll.u32 %s160_s11, 7 }
  0x19   : > { %s2300_s20 = sshll.u32 %s2667_s15, 7  ;;  %s164_s25 = scalar_lea.vmem [#allocation2], %s2287_s17 }
  0x1a   : > { %s169_s24 = scalar_lea.hbm %s3868_s0, %s2300_s20  ;;  %s172_s26 = sshll.u32 %s164_s25, 4  ;;  %s173_s26 = int_to_ptr.vmem [resolvable:$true] %s172_s26 }
  0x1b   : > { %s170_s27 = sshll.u32 %s169_s24, 4  ;;  %p2781_p2 = pnand %p2331_p5, %p36_p7  ;;  %s171_s27 = int_to_ptr.hbm [resolvable:$true] %s170_s27 }
  0x1c   : > { %s161_s4 = scalar_lea.sflag [#allocation3], %s160_s11  ;;  %s2567_s5 = sshra.s32 %s171_s27, 4  ;;  %s2568_s5 = int_to_ptr.hbm [resolvable:$true] %s2567_s5 }
  0x1d   : > { %s2569_s7 = scalar_lea.hbm %s2568_s5, 128  ;;  %p2571_p10 = pneg %p2781_p2 }
  0x1e   : > { %p2570_p9 = scmp.ne.s32.totalorder %s2568_s5, %s2569_s7  ;;  %s2574_s20 = scalar_lea.hbm %s3868_s0, 256 }
  0x1f   : > { %p2575_p0 = scmp.lt.s32.totalorder %s2568_s5, %s3868_s0  ;;  %p2576_p5 = scmp.lt.s32.totalorder %s2574_s20, %s2569_s7 }
  0x20   : > { %p2572_p12 = pnand %p2571_p10, %p2570_p9 }
  0x21   : > { %p2577_p7 = por %p2576_p5, %p2575_p0 }
  0x22   : > { %p2573_p13 = pneg %p2572_p12 }
  0x24   : > { %p2578_p11 = pnand %p2577_p7, %p2573_p13 }
  0x26   : > { %2581 = shalt.err (!%p2578_p11)
}
  0x27   : > { %2324 = dma.hbm_to_vmem [thread:$0]  (!%p2781_p2), %s171_s27, 2048, %s173_s26, %s161_s4, %s2670_s29, %s2670_s29, %s2671_s30  }
  0x28   : > { %184 = sbr.rel (%p2739_p8) target bundleno = 932 (0x3a4), region = 32  ;;  %s2801_s11 = sand.u32 (!%p2739_p8), 1, %s2659_s13  }
  0x29   : > { %s2291_s24 = sshll.u32 (!%p2739_p8), %s2801_s11, 7  ;;  %s187_s25 = scalar_lea.sflag (!%p2739_p8), [#allocation3], %s2801_s11 }
  0x2a   : > { %s2807_s5 = scalar_lea.vmem (!%p2739_p8), [#allocation2], %s2291_s24 }
  0x2d   : > { %2642 = dma.done.wait (%p2726_p4), %s187_s25, 2048  }
  0x2e   : > { %2644 = vsyncadd (%p2726_p4), %s187_s25, 4294965248 }
  0x2f   : > { %2646 = dma.done.wait (%p41_p1), [#allocation6], 8704  }
  0x30   : > { %2648 = vsyncadd (%p41_p1), [#allocation6], 4294958592  ;;  %v257_v0 = vld [vmem:[#allocation5 + $0x78] sm:$0xff]  ;;  %v256_v1 = vld [vmem:[#allocation5 + $0x70] sm:$0xff]  ;;  %v2673_v31 = vmov 8.0   ;;  %s3802_s18 = scalar_lea.vmem [#allocation8], %s2291_s24 }
  0x31   : > { %260 = vmatpush.msra.mxu0 %v257_v0  ;;  %v255_v2 = vld [vmem:[#allocation5 + $0x68] sm:$0xff]  ;;  %v254_v3 = vld [vmem:[#allocation5 + $0x60] sm:$0xff]  ;;  %v253_v4 = vld [vmem:[#allocation5 + $0x58] sm:$0xff]  ;;  %2374 = vrcp.f32 %v2673_v31  ;;  %s2301_s23 = sshll.u32 %s2717_s16, 7  ;;  %s2187_s27 = sshll.u32 %s3802_s18, 4  ;;  %s2188_s27 = int_to_ptr.vmem [resolvable:$true] %s2187_s27 }
  0x32   : > { %v252_v5 = vld [vmem:[#allocation5 + $0x50] sm:$0xff]  ;;  %v251_v6 = vld [vmem:[#allocation5 + $0x48] sm:$0xff]  ;;  %v250_v7 = vld [vmem:[#allocation5 + $0x40] sm:$0xff]  ;;  %s2186_s26 = scalar_lea.hbm %s3871_s3, %s2301_s23  ;;  %s2175_s4 = scalar_lea.sflag [#allocation4], %s2801_s11 }
  0x33   : > { %261 = vmatpush.msra.mxu0 %v256_v1  ;;  %v249_v8 = vld [vmem:[#allocation5 + $0x38] sm:$0xff]  ;;  %v248_v9 = vld [vmem:[#allocation5 + $0x30] sm:$0xff]  ;;  %v247_v10 = vld [vmem:[#allocation5 + $0x28] sm:$0xff]  ;;  %s2189_s28 = sshll.u32 %s2186_s26, 4  ;;  %s2617_s20 = scalar_lea.hbm %s3871_s3, 256  ;;  %s2190_s28 = int_to_ptr.hbm [resolvable:$true] %s2189_s28 }
  0x34   : > { %v246_v11 = vld [vmem:[#allocation5 + $0x20] sm:$0xff]  ;;  %v245_v12 = vld [vmem:[#allocation5 + $0x18] sm:$0xff]  ;;  %v244_v13 = vld [vmem:[#allocation5 + $0x10] sm:$0xff]  ;;  %s2611_s16 = sshra.s32 %s2190_s28, 4  ;;  %s2612_s16 = int_to_ptr.hbm [resolvable:$true] %s2611_s16 }
  0x35   : > { %262 = vmatpush.msra.mxu0 %v255_v2  ;;  %v243_v14 = vld [vmem:[#allocation5 + $0x8] sm:$0xff]  ;;  %v242_v15 = vld [vmem:[#allocation5] sm:$0xff]  ;;  %v228_v18 = vld [vmem:[%s2807_s5 + $0x10] sm:$0xff]  ;;  %s2613_s7 = scalar_lea.hbm %s2612_s16, 128  ;;  %p2618_p11 = scmp.lt.s32.totalorder %s2612_s16, %s3871_s3 }
  0x36   : > { %v226_v16 = vld [vmem:[%s2807_s5] sm:$0xff]  ;;  %v227_v17 = vld [vmem:[%s2807_s5 + $0x8] sm:$0xff]  ;;  %v229_v19 = vld [vmem:[%s2807_s5 + $0x18] sm:$0xff]  ;;  %p2614_p1 = scmp.ne.s32.totalorder %s2612_s16, %s2613_s7  ;;  %p2619_p2 = scmp.lt.s32.totalorder %s2617_s20, %s2613_s7 }
  0x37   : > { %263 = vmatpush.msra.mxu0 %v254_v3  ;;  %v230_v20 = vld [vmem:[%s2807_s5 + $0x20] sm:$0xff]  ;;  %v231_v21 = vld [vmem:[%s2807_s5 + $0x28] sm:$0xff]  ;;  %v232_v22 = vld [vmem:[%s2807_s5 + $0x30] sm:$0xff]  ;;  %v2375_v33 = vpop.eup %2374 }
  0x38   : > { %v233_v23 = vld [vmem:[%s2807_s5 + $0x38] sm:$0xff]  ;;  %v234_v24 = vld [vmem:[%s2807_s5 + $0x40] sm:$0xff]  ;;  %v235_v25 = vld [vmem:[%s2807_s5 + $0x48] sm:$0xff]  ;;  %v422_v35 = vmul.f32 8.0, %v2375_v33  ;;  %vm426_vm0 = vweird.f32 %v2375_v33  ;;  %p2615_p4 = pnand %p2614_p1, %p2768_p3  ;;  %p2620_p9 = por %p2619_p2, %p2618_p11 }
  0x39   : > { %264 = vmatpush.msra.mxu0 %v253_v4  ;;  %v236_v26 = vld [vmem:[%s2807_s5 + $0x50] sm:$0xff]  ;;  %v237_v27 = vld [vmem:[%s2807_s5 + $0x58] sm:$0xff]  ;;  %v238_v28 = vld [vmem:[%s2807_s5 + $0x60] sm:$0xff] }
  0x3a   : > { %v239_v29 = vld [vmem:[%s2807_s5 + $0x68] sm:$0xff]  ;;  %v240_v30 = vld [vmem:[%s2807_s5 + $0x70] sm:$0xff]  ;;  %v241_v32 = vld [vmem:[%s2807_s5 + $0x78] sm:$0xff]  ;;  %v423_v38 = vsub.f32 1.0, %v422_v35  ;;  %p2616_p8 = pneg %p2615_p4 }
  0x3b   : > { %265 = vmatpush.msra.mxu0 %v252_v5  ;;  %v2833_v34 = vld [vmem:[#allocation7] sm:$0xff]  ;;  %v861_v40 = vld [vmem:[#allocation5 + $0xf8] sm:$0xff]  ;;  %v860_v43 = vld [vmem:[#allocation5 + $0xf0] sm:$0xff] }
  0x3c   : > { %v2836_v36 = vperm.slane %v2833_v34, 0  ;;  %865 = vmatpush.msra.mxu1 %v861_v40  ;;  %v424_v42 = vmul.f32 %v2375_v33, %v423_v38  ;;  %v859_v45 = vld [vmem:[#allocation5 + $0xe8] sm:$0xff]  ;;  %v858_v49 = vld [vmem:[#allocation5 + $0xe0] sm:$0xff]  ;;  %v857_v52 = vld [vmem:[#allocation5 + $0xd8] sm:$0xff]  ;;  %p2621_p10 = pnand %p2620_p9, %p2616_p8 }
  0x3d   : > { %266 = vmatpush.msra.mxu0 %v251_v6  ;;  %v856_v56 = vld [vmem:[#allocation5 + $0xd0] sm:$0xff]  ;;  %v855_v59 = vld [vmem:[#allocation5 + $0xc8] sm:$0xff]  ;;  %v854_v63 = vld [vmem:[#allocation5 + $0xc0] sm:$0xff] }
  0x3e   : > { %866 = vmatpush.msra.mxu1 %v860_v43  ;;  %v425_v47 = vadd.f32 %v2375_v33, %v424_v42  ;;  %v853_v3 = vld [vmem:[#allocation5 + $0xb8] sm:$0xff]  ;;  %v847_v31 = vld [vmem:[#allocation5 + $0x88] sm:$0xff] }
  0x3f   : > { %267 = vmatpush.msra.mxu0 %v250_v7  ;;  %v852_v7 = vld [vmem:[#allocation5 + $0xb0] sm:$0xff] }
  0x40   : > { %867 = vmatpush.msra.mxu1 %v859_v45  ;;  %v2840_v55 = vsel %vm426_vm0, %v2375_v33, %v425_v47 }
  0x41   : > { %268 = vmatpush.msra.mxu0 %v249_v8 }
  0x42   : > { %868 = vmatpush.msra.mxu1 %v858_v49 }
  0x43   : > { %269 = vmatpush.msra.mxu0 %v248_v9 }
  0x44   : > { %869 = vmatpush.msra.mxu1 %v857_v52 }
  0x45   : > { %270 = vmatpush.msra.mxu0 %v247_v10 }
  0x46   : > { %870 = vmatpush.msra.mxu1 %v856_v56 }
  0x47   : > { %271 = vmatpush.msra.mxu0 %v246_v11  ;;  %v851_v11 = vld [vmem:[#allocation5 + $0xa8] sm:$0xff] }
  0x48   : > { %871 = vmatpush.msra.mxu1 %v855_v59 }
  0x49   : > { %272 = vmatpush.msra.mxu0 %v245_v12 }
  0x4a   : > { %872 = vmatpush.msra.mxu1 %v854_v63 }
  0x4b   : > { %273 = vmatpush.msra.mxu0 %v244_v13 }
  0x4c   : > { %873 = vmatpush.msra.mxu1 %v853_v3 }
  0x4d   : > { %274 = vmatpush.msra.mxu0 %v243_v14 }
  0x4e   : > { %874 = vmatpush.msra.mxu1 %v852_v7 }
  0x4f   : > { %275 = vmatpush.msra.mxu0 %v242_v15 }
  0x50   : > { %276 = vmatmul.f32.vlgmr.msra.gmra.mxu0 %v226_v16  ;;  %875 = vmatpush.msra.mxu1 %v851_v11  ;;  %v850_v16 = vld [vmem:[#allocation5 + $0xa0] sm:$0xff] }
  0x52   : > { %876 = vmatpush.msra.mxu1 %v850_v16 }
  0x58   : > { %279 = vmatmul.f32.gmra.mxu0 %v227_v17 }
  0x60   : > { %282 = vmatmul.f32.gmra.mxu0 %v228_v18 }
  0x68   : > { %285 = vmatmul.f32.gmra.mxu0 %v229_v19 }
  0x70   : > { %288 = vmatmul.f32.gmra.mxu0 %v230_v20 }
  0x78   : > { %291 = vmatmul.f32.gmra.mxu0 %v231_v21  ;;  %v849_v21 = vld [vmem:[#allocation5 + $0x98] sm:$0xff] }
  0x79   : > { %877 = vmatpush.msra.mxu1 %v849_v21 }
  0x80   : > { %294 = vmatmul.f32.gmra.mxu0 %v232_v22 }
  0x88   : > { %297 = vmatmul.f32.gmra.mxu0 %v233_v23 }
  0x90   : > { %300 = vmatmul.f32.gmra.mxu0 %v234_v24 }
  0x98   : > { %303 = vmatmul.f32.gmra.mxu0 %v235_v25 }
  0xa0   : > { %306 = vmatmul.f32.gmra.mxu0 %v236_v26  ;;  %v848_v26 = vld [vmem:[#allocation5 + $0x90] sm:$0xff] }
  0xa1   : > { %878 = vmatpush.msra.mxu1 %v848_v26 }
  0xa3   : > { %879 = vmatpush.msra.mxu1 %v847_v31 }
  0xa8   : > { %309 = vmatmul.f32.gmra.mxu0 %v237_v27 }
  0xb0   : > { %312 = vmatmul.f32.gmra.mxu0 %v238_v28 }
  0xb8   : > { %315 = vmatmul.f32.gmra.mxu0 %v239_v29 }
  0xc0   : > { %318 = vmatmul.f32.gmra.mxu0 %v240_v30 }
  0xc8   : > { %321 = vmatmul.f32.gmra.mxu0 %v241_v32 }
  0xcd   : > { %v277_v37 = vpop.f32.mrf.mxu0 }
  0xce   : > { %v278_v39 = vadd.f32 %v277_v37, %v2836_v36 }
  0xd0   : > { %v325_v41 = vrot.slane %v278_v39, 4 }
  0xd2   : > { %v326_v44 = vadd.f32 %v325_v41, %v278_v39 }
  0xd4   : > { %v327_v46 = vrot.slane %v326_v44, 2 }
  0xd5   : > { %v280_v48 = vpop.f32.mrf.mxu0 }
  0xd6   : > { %v328_v50 = vadd.f32 %v327_v46, %v326_v44  ;;  %v281_v51 = vadd.f32 %v280_v48, %v2836_v36 }
  0xd8   : > { %v329_v53 = vrot.slane %v328_v50, 1  ;;  %v331_v54 = vrot.slane %v281_v51, 4 }
  0xda   : > { %v330_v57 = vadd.f32 %v329_v53, %v328_v50  ;;  %v332_v58 = vadd.f32 %v331_v54, %v281_v51 }
  0xdc   : > { %v428_v60 = vmul.f32 %v2840_v55, %v330_v57  ;;  %v333_v61 = vrot.slane %v332_v58, 2 }
  0xdd   : > { %v283_v62 = vpop.f32.mrf.mxu0 }
  0xde   : > { %v2843_v0 = vsub.f32 %v278_v39, %v428_v60  ;;  %v334_v1 = vadd.f32 %v333_v61, %v332_v58  ;;  %v284_v2 = vadd.f32 %v283_v62, %v2836_v36  ;;  %v846_v39 = vld [vmem:[#allocation5 + $0x80] sm:$0xff] }
  0xdf   : > { %880 = vmatpush.msra.mxu1 %v846_v39 }
  0xe0   : > { %v460_v4 = vmul.f32 %v2843_v0, %v2843_v0  ;;  %v335_v5 = vrot.slane %v334_v1, 1  ;;  %v337_v6 = vrot.slane %v284_v2, 4 }
  0xe2   : > { %v476_v8 = vrot.slane %v460_v4, 4  ;;  %v336_v9 = vadd.f32 %v335_v5, %v334_v1  ;;  %v338_v10 = vadd.f32 %v337_v6, %v284_v2 }
  0xe4   : > { %v477_v12 = vadd.f32 %v476_v8, %v460_v4  ;;  %v429_v13 = vmul.f32 %v2840_v55, %v336_v9  ;;  %v339_v14 = vrot.slane %v338_v10, 2 }
  0xe5   : > { %v286_v15 = vpop.f32.mrf.mxu0 }
  0xe6   : > { %v478_v17 = vrot.slane %v477_v12, 2  ;;  %v2849_v18 = vsub.f32 %v281_v51, %v429_v13  ;;  %v340_v19 = vadd.f32 %v339_v14, %v338_v10  ;;  %v287_v20 = vadd.f32 %v286_v15, %v2836_v36 }
  0xe8   : > { %v479_v22 = vadd.f32 %v478_v17, %v477_v12  ;;  %v461_v23 = vmul.f32 %v2849_v18, %v2849_v18  ;;  %v341_v24 = vrot.slane %v340_v19, 1  ;;  %v343_v25 = vrot.slane %v287_v20, 4 }
  0xea   : > { %v480_v27 = vrot.slane %v479_v22, 1  ;;  %v482_v28 = vrot.slane %v461_v23, 4  ;;  %v342_v29 = vadd.f32 %v341_v24, %v340_v19  ;;  %v344_v30 = vadd.f32 %v343_v25, %v287_v20 }
  0xec   : > { %v481_v32 = vadd.f32 %v480_v27, %v479_v22  ;;  %v483_v33 = vadd.f32 %v482_v28, %v461_v23  ;;  %v430_v35 = vmul.f32 %v2840_v55, %v342_v29  ;;  %v345_v37 = vrot.slane %v344_v30, 2 }
  0xed   : > { %v289_v38 = vpop.f32.mrf.mxu0 }
  0xee   : > { %v572_v40 = vmul.f32 %v481_v32, %v2840_v55  ;;  %v484_v41 = vrot.slane %v483_v33, 2  ;;  %v2856_v42 = vsub.f32 %v284_v2, %v430_v35  ;;  %v346_v43 = vadd.f32 %v345_v37, %v344_v30 }
  0xef   : > { %v290_v44 = vadd.f32 %v289_v38, %v2836_v36 }
  0xf0   : > { %v485_v45 = vadd.f32 %v484_v41, %v483_v33  ;;  %v462_v46 = vmul.f32 %v2856_v42, %v2856_v42  ;;  %v347_v47 = vrot.slane %v346_v43, 1  ;;  %v588_v48 = vadd.f32 1e-05, %v572_v40 }
  0xf1   : > { %v349_v49 = vrot.slane %v290_v44, 4 }
  0xf2   : > { %v486_v50 = vrot.slane %v485_v45, 1  ;;  %v488_v51 = vrot.slane %v462_v46, 4  ;;  %v348_v52 = vadd.f32 %v347_v47, %v346_v43  ;;  %2376 = vrsqrt.f32 %v588_v48 }
  0xf3   : > { %v350_v53 = vadd.f32 %v349_v49, %v290_v44  ;;  %vm610_vm2 = vweird.f32 %v588_v48 }
  0xf4   : > { %v487_v54 = vadd.f32 %v486_v50, %v485_v45  ;;  %v489_v56 = vadd.f32 %v488_v51, %v462_v46  ;;  %v431_v57 = vmul.f32 %v2840_v55, %v348_v52  ;;  %v2889_v50 = vperm.slane %v2833_v34, 2 }
  0xf5   : > { %v351_v58 = vrot.slane %v350_v53, 2  ;;  %v292_v59 = vpop.f32.mrf.mxu0 }
  0xf6   : > { %v573_v60 = vmul.f32 %v487_v54, %v2840_v55  ;;  %v490_v61 = vrot.slane %v489_v56, 2  ;;  %v2863_v62 = vsub.f32 %v287_v20, %v431_v57  ;;  %v293_v63 = vadd.f32 %v292_v59, %v2836_v36 }
  0xf7   : > { %v352_v1 = vadd.f32 %v351_v58, %v350_v53 }
  0xf8   : > { %v2377_v2 = vpop.eup %2376  ;;  %v491_v3 = vadd.f32 %v490_v61, %v489_v56  ;;  %v463_v4 = vmul.f32 %v2863_v62, %v2863_v62  ;;  %v355_v5 = vrot.slane %v293_v63, 4  ;;  %v2868_v6 = vadd.f32 1e-05, %v573_v60 }
  0xf9   : > { %v353_v7 = vrot.slane %v352_v1, 1  ;;  %v605_v8 = vmul.f32 %v2377_v2, %v588_v48  ;;  %vm611_vm1 = vweird.f32 %v2377_v2 }
  0xfa   : > { %v492_v9 = vrot.slane %v491_v3, 1  ;;  %v494_v10 = vrot.slane %v463_v4, 4  ;;  %v356_v11 = vadd.f32 %v355_v5, %v293_v63  ;;  %2378 = vrsqrt.f32 %v2868_v6  ;;  %vm612_vm3 = vmor %vm610_vm2, %vm611_vm1 }
  0xfb   : > { %v354_v12 = vadd.f32 %v353_v7, %v352_v1  ;;  %v606_v13 = vmul.f32 %v2377_v2, %v605_v8  ;;  %vm620_vm4 = vweird.f32 %v2868_v6 }
  0xfc   : > { %v493_v14 = vadd.f32 %v492_v9, %v491_v3  ;;  %v495_v15 = vadd.f32 %v494_v10, %v463_v4  ;;  %v357_v16 = vrot.slane %v356_v11, 2 }
  0xfd   : > { %v432_v17 = vmul.f32 %v2840_v55, %v354_v12  ;;  %v295_v19 = vpop.f32.mrf.mxu0  ;;  %v607_v20 = vmul.f32 0.5, %v606_v13 }
  0xfe   : > { %v574_v21 = vmul.f32 %v493_v14, %v2840_v55  ;;  %v496_v22 = vrot.slane %v495_v15, 2  ;;  %v358_v23 = vadd.f32 %v357_v16, %v356_v11  ;;  %v2874_v24 = vadd.f32 %v295_v19, %v2836_v36 }
  0xff   : > { %v2876_v25 = vsub.f32 %v290_v44, %v432_v17  ;;  %v608_v26 = vsub.f32 1.5, %v607_v20 }
 0x100   : > { %v2379_v27 = vpop.eup %2378  ;;  %v497_v28 = vadd.f32 %v496_v22, %v495_v15  ;;  %v359_v29 = vrot.slane %v358_v23, 1  ;;  %v361_v30 = vrot.slane %v2874_v24, 4  ;;  %v2879_v31 = vadd.f32 1e-05, %v574_v21 }
 0x101   : > { %v464_v32 = vmul.f32 %v2876_v25, %v2876_v25  ;;  %v609_v33 = vmul.f32 %v2377_v2, %v608_v26  ;;  %v615_v35 = vmul.f32 %v2379_v27, %v2868_v6  ;;  %vm621_vm5 = vweird.f32 %v2379_v27 }
 0x102   : > { %v498_v37 = vrot.slane %v497_v28, 1  ;;  %v360_v38 = vadd.f32 %v359_v29, %v358_v23  ;;  %v362_v39 = vadd.f32 %v361_v30, %v2874_v24  ;;  %2380 = vrsqrt.f32 %v2879_v31  ;;  %vm622_vm6 = vmor %vm620_vm4, %vm621_vm5 }
 0x103   : > { %v500_v40 = vrot.slane %v464_v32, 4  ;;  %v613_v41 = vsel %vm612_vm3, %v2377_v2, %v609_v33  ;;  %v616_v43 = vmul.f32 %v2379_v27, %v615_v35  ;;  %vm630_vm8 = vweird.f32 %v2879_v31 }
 0x104   : > { %v499_v44 = vadd.f32 %v498_v37, %v497_v28  ;;  %v433_v45 = vmul.f32 %v2840_v55, %v360_v38  ;;  %v363_v46 = vrot.slane %v362_v39, 2  ;;  %v764_v47 = vmul.f32 %v613_v41, %v2833_v34 }
 0x105   : > { %v501_v49 = vadd.f32 %v500_v40, %v464_v32  ;;  %v298_v48 = vpop.f32.mrf.mxu0  ;;  %v617_v51 = vmul.f32 0.5, %v616_v43 }
 0x106   : > { %v575_v52 = vmul.f32 %v499_v44, %v2840_v55  ;;  %v2893_v53 = vsub.f32 %v293_v63, %v433_v45  ;;  %v364_v54 = vadd.f32 %v363_v46, %v362_v39  ;;  %v2896_v56 = vadd.f32 %v298_v48, %v2836_v36 }
 0x107   : > { %v502_v57 = vrot.slane %v501_v49, 2  ;;  %v780_v58 = vperm.slane %v764_v47, 1  ;;  %v618_v59 = vsub.f32 1.5, %v617_v51 }
 0x108   : > { %v2381_v60 = vpop.eup %2380  ;;  %v465_v61 = vmul.f32 %v2893_v53, %v2893_v53  ;;  %v365_v1 = vrot.slane %v364_v54, 1  ;;  %v367_v2 = vrot.slane %v2896_v56, 4  ;;  %v2901_v3 = vadd.f32 1e-05, %v575_v52 }
 0x109   : > { %v503_v4 = vadd.f32 %v502_v57, %v501_v49  ;;  %v796_v63 = vmul.f32 %v780_v58, %v2843_v0  ;;  %v619_v5 = vmul.f32 %v2379_v27, %v618_v59  ;;  %v625_v7 = vmul.f32 %v2381_v60, %v2879_v31 }
 0x10a   : > { %v506_v8 = vrot.slane %v465_v61, 4  ;;  %v366_v9 = vadd.f32 %v365_v1, %v364_v54  ;;  %v368_v10 = vadd.f32 %v367_v2, %v2896_v56  ;;  %2382 = vrsqrt.f32 %v2901_v3 }
 0x10b   : > { %v504_v11 = vrot.slane %v503_v4, 1  ;;  %v813_v12 = vadd.f32 %v2889_v50, %v796_v63  ;;  %v623_v13 = vsel %vm622_vm6, %v2379_v27, %v619_v5  ;;  %v626_v14 = vmul.f32 %v2381_v60, %v625_v7 }
 0x10c   : > { %v507_v15 = vadd.f32 %v506_v8, %v465_v61  ;;  %v434_v16 = vmul.f32 %v2840_v55, %v366_v9  ;;  %v369_v17 = vrot.slane %v368_v10, 2  ;;  %v765_v0 = vmul.f32 %v623_v13, %v2833_v34 }
 0x10d   : > { %v505_v19 = vadd.f32 %v504_v11, %v503_v4  ;;  %v301_v20 = vpop.f32.mrf.mxu0  ;;  %v829_v21 = vmax.f32 %v813_v12, 0.0  ;;  %v627_v22 = vmul.f32 0.5, %v626_v14  ;;  %vm631_vm7 = vweird.f32 %v2381_v60 }
 0x10e   : > { %v508_v23 = vrot.slane %v507_v15, 2  ;;  %v2913_v6 = vsub.f32 %v2874_v24, %v434_v16  ;;  %v370_v26 = vadd.f32 %v369_v17, %v368_v10  ;;  %v2916_v27 = vadd.f32 %v301_v20, %v2836_v36  ;;  %vm632_vm9 = vmor %vm630_vm8, %vm631_vm7 }
 0x10f   : > { %v576_v28 = vmul.f32 %v505_v19, %v2840_v55  ;;  %881 = vmatmul.f32.vlgmr.msra.gmra.mxu1 %v829_v21  ;;  %v781_v29 = vperm.slane %v765_v0, 1  ;;  %v628_v30 = vsub.f32 1.5, %v627_v22  ;;  %vm640_vm10 = vweird.f32 %v2901_v3 }
 0x110   : > { %v509_v32 = vadd.f32 %v508_v23, %v507_v15  ;;  %v466_v33 = vmul.f32 %v2913_v6, %v2913_v6  ;;  %v371_v35 = vrot.slane %v370_v26, 1  ;;  %v373_v37 = vrot.slane %v2916_v27, 4  ;;  %v2383_v45 = vpop.eup %2382 }
 0x111   : > { %v797_v24 = vmul.f32 %v781_v29, %v2849_v18  ;;  %v629_v38 = vmul.f32 %v2381_v60, %v628_v30  ;;  %v2924_v39 = vadd.f32 1e-05, %v576_v28  ;;  %v635_v57 = vmul.f32 %v2383_v45, %v2901_v3 }
 0x112   : > { %v510_v40 = vrot.slane %v509_v32, 1  ;;  %v512_v41 = vrot.slane %v466_v33, 4  ;;  %v372_v43 = vadd.f32 %v371_v35, %v370_v26  ;;  %v374_v44 = vadd.f32 %v373_v37, %v2916_v27 }
 0x113   : > { %v814_v46 = vadd.f32 %v2889_v50, %v797_v24  ;;  %v633_v47 = vsel %vm632_vm9, %v2381_v60, %v629_v38  ;;  %2384 = vrsqrt.f32 %v2924_v39  ;;  %v636_v4 = vmul.f32 %v2383_v45, %v635_v57 }
 0x114   : > { %v511_v49 = vadd.f32 %v510_v40, %v509_v32  ;;  %v513_v48 = vadd.f32 %v512_v41, %v466_v33  ;;  %v435_v18 = vmul.f32 %v2840_v55, %v372_v43  ;;  %v375_v51 = vrot.slane %v374_v44, 2 }
 0x115   : > { %v304_v31 = vpop.f32.mrf.mxu0  ;;  %v830_v52 = vmax.f32 %v814_v46, 0.0  ;;  %v766_v54 = vmul.f32 %v633_v47, %v2833_v34  ;;  %v637_v10 = vmul.f32 0.5, %v636_v4  ;;  %vm641_vm11 = vweird.f32 %v2383_v45 }
 0x116   : > { %v577_v58 = vmul.f32 %v511_v49, %v2840_v55  ;;  %v514_v59 = vrot.slane %v513_v48, 2  ;;  %v2934_v61 = vsub.f32 %v2896_v56, %v435_v18  ;;  %v376_v60 = vadd.f32 %v375_v51, %v374_v44  ;;  %vm642_vm12 = vmor %vm640_vm10, %vm641_vm11 }
 0x117   : > { %v2937_v1 = vadd.f32 %v304_v31, %v2836_v36  ;;  %884 = vmatmul.f32.gmra.mxu1 %v830_v52  ;;  %v782_v2 = vperm.slane %v766_v54, 1  ;;  %v638_v0 = vsub.f32 1.5, %v637_v10  ;;  %vm650_vm14 = vweird.f32 %v2924_v39 }
 0x118   : > { %v515_v63 = vadd.f32 %v514_v59, %v513_v48  ;;  %v467_v5 = vmul.f32 %v2934_v61, %v2934_v61  ;;  %v377_v7 = vrot.slane %v376_v60, 1  ;;  %v2946_v11 = vadd.f32 1e-05, %v577_v58 }
 0x119   : > { %v2942_v8 = vpop.eup %2384  ;;  %v379_v9 = vrot.slane %v2937_v1, 4  ;;  %v798_v56 = vmul.f32 %v782_v2, %v2856_v42  ;;  %v639_v28 = vmul.f32 %v2383_v45, %v638_v0 }
 0x11a   : > { %v516_v12 = vrot.slane %v515_v63, 1  ;;  %v518_v13 = vrot.slane %v467_v5, 4  ;;  %v378_v14 = vadd.f32 %v377_v7, %v376_v60  ;;  %v645_v15 = vmul.f32 %v2942_v8, %v2924_v39 }
 0x11b   : > { %v380_v16 = vadd.f32 %v379_v9, %v2937_v1  ;;  %v815_v17 = vadd.f32 %v2889_v50, %v798_v56  ;;  %2386 = vrsqrt.f32 %v2946_v11  ;;  %v643_v37 = vsel %vm642_vm12, %v2383_v45, %v639_v28 }
 0x11c   : > { %v517_v19 = vadd.f32 %v516_v12, %v515_v63  ;;  %v519_v20 = vadd.f32 %v518_v13, %v467_v5  ;;  %v436_v21 = vmul.f32 %v2840_v55, %v378_v14  ;;  %v646_v42 = vmul.f32 %v2942_v8, %v645_v15 }
 0x11d   : > { %v381_v22 = vrot.slane %v380_v16, 2  ;;  %v307_v23 = vpop.f32.mrf.mxu0  ;;  %v831_v26 = vmax.f32 %v815_v17, 0.0  ;;  %v767_v43 = vmul.f32 %v643_v37, %v2833_v34  ;;  %vm651_vm13 = vweird.f32 %v2942_v8 }
 0x11e   : > { %v578_v29 = vmul.f32 %v517_v19, %v2840_v55  ;;  %v520_v30 = vrot.slane %v519_v20, 2  ;;  %v2957_v32 = vsub.f32 %v2916_v27, %v436_v21  ;;  %v2960_v33 = vadd.f32 %v307_v23, %v2836_v36  ;;  %vm652_vm15 = vmor %vm650_vm14, %vm651_vm13 }
 0x11f   : > { %v382_v35 = vadd.f32 %v381_v22, %v380_v16  ;;  %887 = vmatmul.f32.gmra.mxu1 %v831_v26  ;;  %v647_v24 = vmul.f32 0.5, %v646_v42  ;;  %v783_v45 = vperm.slane %v767_v43, 1  ;;  %vm660_vm0 = vweird.f32 %v2946_v11 }
 0x120   : > { %v521_v38 = vadd.f32 %v520_v30, %v519_v20  ;;  %v468_v40 = vmul.f32 %v2957_v32, %v2957_v32  ;;  %v385_v41 = vrot.slane %v2960_v33, 4  ;;  %v2969_v46 = vadd.f32 1e-05, %v578_v29 }
 0x121   : > { %v383_v27 = vrot.slane %v382_v35, 1  ;;  %v648_v44 = vsub.f32 1.5, %v647_v24  ;;  %v2972_v48 = vpop.eup %2386  ;;  %v799_v57 = vmul.f32 %v783_v45, %v2863_v62 }
 0x122   : > { %v522_v3 = vrot.slane %v521_v38, 1  ;;  %v524_v47 = vrot.slane %v468_v40, 4  ;;  %v386_v49 = vadd.f32 %v385_v41, %v2960_v33  ;;  %2388 = vrsqrt.f32 %v2969_v46 }
 0x123   : > { %v384_v18 = vadd.f32 %v383_v27, %v382_v35  ;;  %v649_v51 = vmul.f32 %v2942_v8, %v648_v44  ;;  %v655_v2 = vmul.f32 %v2972_v48, %v2946_v11  ;;  %v816_v7 = vadd.f32 %v2889_v50, %v799_v57 }
 0x124   : > { %v523_v31 = vadd.f32 %v522_v3, %v521_v38  ;;  %v525_v52 = vadd.f32 %v524_v47, %v468_v40  ;;  %v387_v54 = vrot.slane %v386_v49, 2  ;;  %vm661_vm1 = vweird.f32 %v2972_v48 }
 0x125   : > { %v437_v58 = vmul.f32 %v2840_v55, %v384_v18  ;;  %v310_v59 = vpop.f32.mrf.mxu0  ;;  %v653_v60 = vsel %vm652_vm15, %v2942_v8, %v649_v51  ;;  %v656_v8 = vmul.f32 %v2972_v48, %v655_v2  ;;  %v832_v16 = vmax.f32 %v816_v7, 0.0  ;;  %vm662_vm2 = vmor %vm660_vm0, %vm661_vm1 }
 0x126   : > { %v579_v39 = vmul.f32 %v523_v31, %v2840_v55  ;;  %v526_v4 = vrot.slane %v525_v52, 2  ;;  %v388_v63 = vadd.f32 %v387_v54, %v386_v49  ;;  %v2987_v5 = vadd.f32 %v310_v59, %v2836_v36 }
 0x127   : > { %v2990_v62 = vsub.f32 %v2937_v1, %v437_v58  ;;  %v768_v9 = vmul.f32 %v653_v60, %v2833_v34  ;;  %v657_v17 = vmul.f32 0.5, %v656_v8  ;;  %890 = vmatmul.f32.gmra.mxu1 %v832_v16  ;;  %vm670_vm4 = vweird.f32 %v2969_v46 }
 0x128   : > { %v527_v56 = vadd.f32 %v526_v4, %v525_v52  ;;  %v389_v10 = vrot.slane %v388_v63, 1  ;;  %v391_v12 = vrot.slane %v2987_v5, 4  ;;  %v2996_v13 = vadd.f32 1e-05, %v579_v39  ;;  %v2998_v14 = vpop.eup %2388 }
 0x129   : > { %v469_v15 = vmul.f32 %v2990_v62, %v2990_v62  ;;  %v784_v1 = vperm.slane %v768_v9, 1  ;;  %v665_v21 = vmul.f32 %v2998_v14, %v2969_v46  ;;  %v658_v23 = vsub.f32 1.5, %v657_v17 }
 0x12a   : > { %v528_v0 = vrot.slane %v527_v56, 1  ;;  %v390_v19 = vadd.f32 %v389_v10, %v388_v63  ;;  %v392_v20 = vadd.f32 %v391_v12, %v2987_v5  ;;  %2390 = vrsqrt.f32 %v2996_v13 }
 0x12b   : > { %v530_v42 = vrot.slane %v469_v15, 4  ;;  %v800_v22 = vmul.f32 %v784_v1, %v2876_v25  ;;  %v666_v30 = vmul.f32 %v2998_v14, %v665_v21  ;;  %v659_v38 = vmul.f32 %v2972_v48, %v658_v23 }
 0x12c   : > { %v529_v26 = vadd.f32 %v528_v0, %v527_v56  ;;  %v438_v28 = vmul.f32 %v2840_v55, %v390_v19  ;;  %v393_v29 = vrot.slane %v392_v20, 2  ;;  %vm671_vm3 = vweird.f32 %v2998_v14 }
 0x12d   : > { %v531_v35 = vadd.f32 %v530_v42, %v469_v15  ;;  %v313_v37 = vpop.f32.mrf.mxu0  ;;  %v817_v24 = vadd.f32 %v2889_v50, %v800_v22  ;;  %v663_v3 = vsel %vm662_vm2, %v2972_v48, %v659_v38  ;;  %v667_v47 = vmul.f32 0.5, %v666_v30  ;;  %vm672_vm5 = vmor %vm670_vm4, %vm671_vm3 }
 0x12e   : > { %v580_v40 = vmul.f32 %v529_v26, %v2840_v55  ;;  %v3014_v25 = vsub.f32 %v2960_v33, %v438_v28  ;;  %v394_v41 = vadd.f32 %v393_v29, %v392_v20  ;;  %v3017_v43 = vadd.f32 %v313_v37, %v2836_v36 }
 0x12f   : > { %v532_v27 = vrot.slane %v531_v35, 2  ;;  %v833_v44 = vmax.f32 %v817_v24, 0.0  ;;  %v769_v33 = vmul.f32 %v663_v3, %v2833_v34  ;;  %v668_v31 = vsub.f32 1.5, %v667_v47 }
 0x130   : > { %v470_v49 = vmul.f32 %v3014_v25, %v3014_v25  ;;  %v395_v45 = vrot.slane %v394_v41, 1  ;;  %v397_v18 = vrot.slane %v3017_v43, 4  ;;  %v3027_v52 = vadd.f32 1e-05, %v580_v40  ;;  %v3030_v58 = vpop.eup %2390 }
 0x131   : > { %v533_v51 = vadd.f32 %v532_v27, %v531_v35  ;;  %v785_v48 = vperm.slane %v769_v33, 1  ;;  %893 = vmatmul.f32.gmra.mxu1 %v833_v44  ;;  %v669_v60 = vmul.f32 %v2998_v14, %v668_v31  ;;  %v675_v56 = vmul.f32 %v3030_v58, %v2996_v13 }
 0x132   : > { %v536_v11 = vrot.slane %v470_v49, 4  ;;  %v396_v54 = vadd.f32 %v395_v45, %v394_v41  ;;  %v398_v57 = vadd.f32 %v397_v18, %v3017_v43  ;;  %2392 = vrsqrt.f32 %v3027_v52 }
 0x133   : > { %v534_v59 = vrot.slane %v533_v51, 1  ;;  %v801_v63 = vmul.f32 %v785_v48, %v2893_v53  ;;  %v673_v8 = vsel %vm672_vm5, %v2998_v14, %v669_v60  ;;  %vm680_vm6 = vweird.f32 %v2996_v13 }
 0x134   : > { %v537_v2 = vadd.f32 %v536_v11, %v470_v49  ;;  %v439_v39 = vmul.f32 %v2840_v55, %v396_v54  ;;  %v399_v4 = vrot.slane %v398_v57, 2  ;;  %v770_v1 = vmul.f32 %v673_v8, %v2833_v34 }
 0x135   : > { %v535_v7 = vadd.f32 %v534_v59, %v533_v51  ;;  %v316_v9 = vpop.f32.mrf.mxu0  ;;  %v818_v16 = vadd.f32 %v2889_v50, %v801_v63  ;;  %v676_v14 = vmul.f32 %v3030_v58, %v675_v56  ;;  %vm681_vm7 = vweird.f32 %v3030_v58 }
 0x136   : > { %v538_v46 = vrot.slane %v537_v2, 2  ;;  %v3044_v10 = vsub.f32 %v2987_v5, %v439_v39  ;;  %v400_v12 = vadd.f32 %v399_v4, %v398_v57  ;;  %v3047_v15 = vadd.f32 %v316_v9, %v2836_v36  ;;  %vm682_vm8 = vmor %vm680_vm6, %vm681_vm7 }
 0x137   : > { %v581_v53 = vmul.f32 %v535_v7, %v2840_v55  ;;  %v834_v21 = vmax.f32 %v818_v16, 0.0  ;;  %v786_v42 = vperm.slane %v770_v1, 1  ;;  %v677_v22 = vmul.f32 0.5, %v676_v14 }
 0x138   : > { %v539_v17 = vadd.f32 %v538_v46, %v537_v2  ;;  %v471_v0 = vmul.f32 %v3044_v10, %v3044_v10  ;;  %v401_v19 = vrot.slane %v400_v12, 1  ;;  %v403_v5 = vrot.slane %v3047_v15, 4  ;;  %v3056_v20 = vpop.eup %2392 }
 0x139   : > { %v3058_v23 = vadd.f32 1e-05, %v581_v53  ;;  %896 = vmatmul.f32.gmra.mxu1 %v834_v21  ;;  %v802_v35 = vmul.f32 %v786_v42, %v2913_v6  ;;  %v678_v37 = vsub.f32 1.5, %v677_v22  ;;  %v685_v24 = vmul.f32 %v3056_v20, %v3027_v52 }
 0x13a   : > { %v540_v26 = vrot.slane %v539_v17, 1  ;;  %v542_v28 = vrot.slane %v471_v0, 4  ;;  %v402_v29 = vadd.f32 %v401_v19, %v400_v12  ;;  %v404_v30 = vadd.f32 %v403_v5, %v3047_v15 }
 0x13b   : > { %v819_v3 = vadd.f32 %v2889_v50, %v802_v35  ;;  %v679_v47 = vmul.f32 %v3030_v58, %v678_v37  ;;  %v686_v49 = vmul.f32 %v3056_v20, %v685_v24  ;;  %2394 = vrsqrt.f32 %v3058_v23 }
 0x13c   : > { %v541_v38 = vadd.f32 %v540_v26, %v539_v17  ;;  %v543_v40 = vadd.f32 %v542_v28, %v471_v0  ;;  %v440_v41 = vmul.f32 %v2840_v55, %v402_v29  ;;  %v405_v27 = vrot.slane %v404_v30, 2 }
 0x13d   : > { %v319_v44 = vpop.f32.mrf.mxu0  ;;  %v835_v31 = vmax.f32 %v819_v3, 0.0  ;;  %v683_v11 = vsel %vm682_vm8, %v3030_v58, %v679_v47  ;;  %v687_v54 = vmul.f32 0.5, %v686_v49  ;;  %vm691_vm9 = vweird.f32 %v3056_v20 }
 0x13e   : > { %v582_v6 = vmul.f32 %v541_v38, %v2840_v55  ;;  %v544_v45 = vrot.slane %v543_v40, 2  ;;  %v3072_v18 = vsub.f32 %v3017_v43, %v440_v41  ;;  %v406_v33 = vadd.f32 %v405_v27, %v404_v30 }
 0x13f   : > { %v3079_v51 = vadd.f32 %v319_v44, %v2836_v36  ;;  %v771_v43 = vmul.f32 %v683_v11, %v2833_v34  ;;  %v688_v2 = vsub.f32 1.5, %v687_v54  ;;  %vm690_vm10 = vweird.f32 %v3027_v52 }
 0x140   : > { %v545_v57 = vadd.f32 %v544_v45, %v543_v40  ;;  %v472_v48 = vmul.f32 %v3072_v18, %v3072_v18  ;;  %v407_v59 = vrot.slane %v406_v33, 1  ;;  %v3087_v13 = vadd.f32 1e-05, %v582_v6  ;;  %vm692_vm11 = vmor %vm690_vm10, %vm691_vm9 }
 0x141   : > { %v409_v60 = vrot.slane %v3079_v51, 4  ;;  %v787_v7 = vperm.slane %v771_v43, 1  ;;  %v2395_v58 = vpop.eup %2394  ;;  %899 = vmatmul.f32.gmra.mxu1 %v835_v31  ;;  %v689_v8 = vmul.f32 %v3056_v20, %v688_v2  ;;  %vm700_vm12 = vweird.f32 %v3058_v23 }
 0x142   : > { %v546_v39 = vrot.slane %v545_v57, 1  ;;  %v548_v4 = vrot.slane %v472_v48, 4  ;;  %v408_v63 = vadd.f32 %v407_v59, %v406_v33  ;;  %2396 = vrsqrt.f32 %v3087_v13 }
 0x143   : > { %v410_v9 = vadd.f32 %v409_v60, %v3079_v51  ;;  %v803_v53 = vmul.f32 %v787_v7, %v2934_v61  ;;  %v693_v14 = vsel %vm692_vm11, %v3056_v20, %v689_v8  ;;  %v695_v17 = vmul.f32 %v2395_v58, %v3058_v23 }
 0x144   : > { %v547_v56 = vadd.f32 %v546_v39, %v545_v57  ;;  %v549_v46 = vadd.f32 %v548_v4, %v472_v48  ;;  %v441_v12 = vmul.f32 %v2840_v55, %v408_v63  ;;  %v772_v42 = vmul.f32 %v693_v14, %v2833_v34 }
 0x145   : > { %v411_v16 = vrot.slane %v410_v9, 2  ;;  %v322_v1 = vpop.f32.mrf.mxu0  ;;  %v820_v21 = vadd.f32 %v2889_v50, %v803_v53  ;;  %v696_v22 = vmul.f32 %v2395_v58, %v695_v17  ;;  %vm701_vm13 = vweird.f32 %v2395_v58 }
 0x146   : > { %v583_v52 = vmul.f32 %v547_v56, %v2840_v55  ;;  %v550_v0 = vrot.slane %v549_v46, 2  ;;  %v3102_v19 = vsub.f32 %v3047_v15, %v441_v12  ;;  %v3105_v5 = vadd.f32 %v322_v1, %v2836_v36  ;;  %vm702_vm14 = vmor %vm700_vm12, %vm701_vm13 }
 0x147   : > { %v412_v61 = vadd.f32 %v411_v16, %v410_v9  ;;  %v836_v35 = vmax.f32 %v820_v21, 0.0  ;;  %v788_v37 = vperm.slane %v772_v42, 1  ;;  %v697_v36 = vmul.f32 0.5, %v696_v22 }
 0x148   : > { %v551_v20 = vadd.f32 %v550_v0, %v549_v46  ;;  %v473_v26 = vmul.f32 %v3102_v19, %v3102_v19  ;;  %v415_v28 = vrot.slane %v3105_v5, 4  ;;  %v3112_v29 = vadd.f32 1e-05, %v583_v52  ;;  %v2397_v30 = vpop.eup %2396 }
 0x149   : > { %v413_v15 = vrot.slane %v412_v61, 1  ;;  %v705_v41 = vmul.f32 %v2397_v30, %v3087_v13  ;;  %902 = vmatmul.f32.gmra.mxu1 %v836_v35  ;;  %v804_v44 = vmul.f32 %v788_v37, %v2957_v32  ;;  %v698_v3 = vsub.f32 1.5, %v697_v36 }
 0x14a   : > { %v552_v24 = vrot.slane %v551_v20, 1  ;;  %v554_v38 = vrot.slane %v473_v26, 4  ;;  %v416_v40 = vadd.f32 %v415_v28, %v3105_v5  ;;  %2398 = vrsqrt.f32 %v3112_v29 }
 0x14b   : > { %v414_v27 = vadd.f32 %v413_v15, %v412_v61  ;;  %v706_v45 = vmul.f32 %v2397_v30, %v705_v41  ;;  %v821_v31 = vadd.f32 %v2889_v50, %v804_v44  ;;  %v699_v11 = vmul.f32 %v2395_v58, %v698_v3 }
 0x14c   : > { %v553_v47 = vadd.f32 %v552_v24, %v551_v20  ;;  %v555_v49 = vadd.f32 %v554_v38, %v473_v26  ;;  %v417_v6 = vrot.slane %v416_v40, 2  ;;  %vm711_vm15 = vweird.f32 %v2397_v30 }
 0x14d   : > { %v442_v33 = vmul.f32 %v2840_v55, %v414_v27  ;;  %v707_v32 = vmul.f32 0.5, %v706_v45  ;;  %v837_v43 = vmax.f32 %v821_v31, 0.0  ;;  %v703_v60 = vsel %vm702_vm14, %v2395_v58, %v699_v11 }
 0x14e   : > { %v584_v54 = vmul.f32 %v553_v47, %v2840_v55  ;;  %v556_v57 = vrot.slane %v555_v49, 2  ;;  %v418_v48 = vadd.f32 %v417_v6, %v416_v40  ;;  %v773_v4 = vmul.f32 %v703_v60, %v2833_v34 }
 0x14f   : > { %v3124_v59 = vsub.f32 %v3079_v51, %v442_v33  ;;  %v708_v63 = vsub.f32 1.5, %v707_v32  ;;  %vm710_vm0 = vweird.f32 %v3087_v13  ;;  %vm720_vm3 = vweird.f32 %v3112_v29  ;;  %v3146_v33 = vld [vmem:[#allocation7] sm:$0xff] }
 0x150   : > { %v557_v2 = vadd.f32 %v556_v57, %v555_v49  ;;  %v419_v39 = vrot.slane %v418_v48, 1  ;;  %v600_v9 = vadd.f32 1e-05, %v584_v54  ;;  %v789_v56 = vperm.slane %v773_v4, 1  ;;  %v2399_v51 = vpop.eup %2398  ;;  %vm712_vm1 = vmor %vm710_vm0, %vm711_vm15 }
 0x151   : > { %v474_v7 = vmul.f32 %v3124_v59, %v3124_v59  ;;  %v709_v46 = vmul.f32 %v2397_v30, %v708_v63  ;;  %905 = vmatmul.f32.gmra.mxu1 %v837_v43  ;;  %v715_v17 = vmul.f32 %v2399_v51, %v3112_v29  ;;  %vm721_vm2 = vweird.f32 %v2399_v51 }
 0x152   : > { %v558_v23 = vrot.slane %v557_v2, 1  ;;  %v420_v8 = vadd.f32 %v419_v39, %v418_v48  ;;  %2400 = vrsqrt.f32 %v600_v9  ;;  %v805_v16 = vmul.f32 %v789_v56, %v2990_v62  ;;  %vm722_vm4 = vmor %vm720_vm3, %vm721_vm2 }
 0x153   : > { %v560_v12 = vrot.slane %v474_v7, 4  ;;  %v713_v1 = vsel %vm712_vm1, %v2397_v30, %v709_v46  ;;  %v716_v22 = vmul.f32 %v2399_v51, %v715_v17  ;;  %vm730_vm6 = vweird.f32 %v600_v9 }
 0x154   : > { %v559_v58 = vadd.f32 %v558_v23, %v557_v2  ;;  %v443_v53 = vmul.f32 %v2840_v55, %v420_v8  ;;  %v774_v13 = vmul.f32 %v713_v1, %v2833_v34  ;;  %v822_v61 = vadd.f32 %v2889_v50, %v805_v16 }
 0x155   : > { %v561_v14 = vadd.f32 %v560_v12, %v474_v7  ;;  %v717_v15 = vmul.f32 0.5, %v716_v22 }
 0x156   : > { %v585_v52 = vmul.f32 %v559_v58, %v2840_v55  ;;  %v3137_v0 = vsub.f32 %v3105_v5, %v443_v53  ;;  %v790_v42 = vperm.slane %v774_v13, 1  ;;  %v838_v62 = vmax.f32 %v822_v61, 0.0 }
 0x157   : > { %v562_v21 = vrot.slane %v561_v14, 2  ;;  %v718_v24 = vsub.f32 1.5, %v717_v15 }
 0x158   : > { %v475_v20 = vmul.f32 %v3137_v0, %v3137_v0  ;;  %v601_v26 = vadd.f32 1e-05, %v585_v52  ;;  %v2401_v28 = vpop.eup %2400  ;;  %v806_v34 = vmul.f32 %v790_v42, %v3014_v25 }
 0x159   : > { %v563_v30 = vadd.f32 %v562_v21, %v561_v14  ;;  %v725_v37 = vmul.f32 %v2401_v28, %v600_v9  ;;  %908 = vmatmul.f32.gmra.mxu1 %v838_v62  ;;  %v719_v27 = vmul.f32 %v2399_v51, %v718_v24  ;;  %vm731_vm5 = vweird.f32 %v2401_v28 }
 0x15a   : > { %v566_v35 = vrot.slane %v475_v20, 4  ;;  %2402 = vrsqrt.f32 %v601_v26  ;;  %v823_v36 = vadd.f32 %v2889_v50, %v806_v34  ;;  %vm732_vm7 = vmor %vm730_vm6, %vm731_vm5  ;;  %vm740_vm9 = vweird.f32 %v601_v26 }
 0x15b   : > { %v564_v5 = vrot.slane %v563_v30, 1  ;;  %v726_v40 = vmul.f32 %v2401_v28, %v725_v37  ;;  %v723_v49 = vsel %vm722_vm4, %v2399_v51, %v719_v27 }
 0x15c   : > { %v567_v38 = vadd.f32 %v566_v35, %v475_v20  ;;  %v839_v47 = vmax.f32 %v823_v36, 0.0  ;;  %v775_v31 = vmul.f32 %v3146_v33, %v723_v49 }
 0x15d   : > { %v565_v41 = vadd.f32 %v564_v5, %v563_v30  ;;  %v727_v3 = vmul.f32 0.5, %v726_v40 }
 0x15e   : > { %v568_v44 = vrot.slane %v567_v38, 2  ;;  %v791_v32 = vperm.slane %v775_v31, 1 }
 0x15f   : > { %v586_v25 = vmul.f32 %v565_v41, %v2840_v55  ;;  %v728_v11 = vsub.f32 1.5, %v727_v3 }
 0x160   : > { %v2403_v6 = vpop.eup %2402  ;;  %v569_v45 = vadd.f32 %v568_v44, %v567_v38  ;;  %v807_v2 = vmul.f32 %v791_v32, %v3044_v10  ;;  %v3164_v44 = vld [vmem:[#allocation7 + $0x8] sm:$0xff] }
 0x161   : > { %v735_v54 = vmul.f32 %v2403_v6, %v601_v26  ;;  %v602_v57 = vadd.f32 1e-05, %v586_v25  ;;  %v729_v29 = vmul.f32 %v2401_v28, %v728_v11  ;;  %911 = vmatmul.f32.gmra.mxu1 %v839_v47  ;;  %vm741_vm8 = vweird.f32 %v2403_v6 }
 0x162   : > { %v570_v48 = vrot.slane %v569_v45, 1  ;;  %v824_v23 = vadd.f32 %v2889_v50, %v807_v2  ;;  %vm742_vm10 = vmor %vm740_vm9, %vm741_vm8 }
 0x163   : > { %v736_v43 = vmul.f32 %v2403_v6, %v735_v54  ;;  %2404 = vrsqrt.f32 %v602_v57  ;;  %v733_v39 = vsel %vm732_vm7, %v2401_v28, %v729_v29  ;;  %vm750_vm12 = vweird.f32 %v602_v57 }
 0x164   : > { %v571_v60 = vadd.f32 %v570_v48, %v569_v45  ;;  %v776_v4 = vmul.f32 %v3146_v33, %v733_v39  ;;  %v840_v46 = vmax.f32 %v824_v23, 0.0  ;;  %v1457_v48 = vld [vmem:[#allocation5 + $0x168] sm:$0xff]  ;;  %v1455_v39 = vld [vmem:[#allocation5 + $0x158] sm:$0xff] }
 0x165   : > { %v737_v63 = vmul.f32 0.5, %v736_v43  ;;  %v1456_v43 = vld [vmem:[#allocation5 + $0x160] sm:$0xff] }
 0x166   : > { %v587_v7 = vmul.f32 %v571_v60, %v2840_v55  ;;  %v792_v8 = vperm.slane %v776_v4, 1 }
 0x167   : > { %v738_v56 = vsub.f32 1.5, %v737_v63 }
 0x168   : > { %v603_v9 = vadd.f32 1e-05, %v587_v7  ;;  %v808_v12 = vmul.f32 %v792_v8, %v3072_v18  ;;  %v1454_v8 = vld [vmem:[#allocation5 + $0x150] sm:$0xff] }
 0x169   : > { %v2405_v51 = vpop.eup %2404  ;;  %v739_v58 = vmul.f32 %v2403_v6, %v738_v56  ;;  %914 = vmatmul.f32.gmra.mxu1 %v840_v46 }
 0x16a   : > { %v745_v10 = vmul.f32 %v2405_v51, %v602_v57  ;;  %2406 = vrsqrt.f32 %v603_v9  ;;  %v825_v53 = vadd.f32 %v2889_v50, %v808_v12  ;;  %vm751_vm11 = vweird.f32 %v2405_v51 }
 0x16b   : > { %v743_v16 = vsel %vm742_vm10, %v2403_v6, %v739_v58  ;;  %vm752_vm13 = vmor %vm750_vm12, %vm751_vm11  ;;  %vm760_vm15 = vweird.f32 %v603_v9 }
 0x16c   : > { %v777_v1 = vmul.f32 %v3146_v33, %v743_v16  ;;  %v746_v14 = vmul.f32 %v2405_v51, %v745_v10  ;;  %v841_v52 = vmax.f32 %v825_v53, 0.0  ;;  %v1452_v53 = vld [vmem:[#allocation5 + $0x140] sm:$0xff] }
 0x16e   : > { %v793_v13 = vperm.slane %v777_v1, 1  ;;  %v747_v17 = vmul.f32 0.5, %v746_v14 }
 0x170   : > { %v2407_v61 = vpop.eup %2406  ;;  %v809_v21 = vmul.f32 %v793_v13, %v3102_v19  ;;  %v748_v42 = vsub.f32 1.5, %v747_v17  ;;  %v1451_v13 = vld [vmem:[#allocation5 + $0x138] sm:$0xff] }
 0x171   : > { %v755_v18 = vmul.f32 %v2407_v61, %v603_v9  ;;  %917 = vmatmul.f32.gmra.mxu1 %v841_v52  ;;  %vm761_vm14 = vweird.f32 %v2407_v61 }
 0x172   : > { %v749_v22 = vmul.f32 %v2405_v51, %v748_v42  ;;  %v826_v20 = vadd.f32 %v2889_v50, %v809_v21  ;;  %vm762_vm0 = vmor %vm760_vm15, %vm761_vm14  ;;  %v1450_v21 = vld [vmem:[#allocation5 + $0x130] sm:$0xff] }
 0x173   : > { %v756_v62 = vmul.f32 %v2407_v61, %v755_v18 }
 0x174   : > { %v753_v26 = vsel %vm752_vm13, %v2405_v51, %v749_v22  ;;  %v842_v34 = vmax.f32 %v826_v20, 0.0  ;;  %v1453_v51 = vld [vmem:[#allocation5 + $0x148] sm:$0xff] }
 0x175   : > { %v778_v28 = vmul.f32 %v3146_v33, %v753_v26  ;;  %v757_v30 = vmul.f32 0.5, %v756_v62  ;;  %v1449_v20 = vld [vmem:[#allocation5 + $0x128] sm:$0xff] }
 0x177   : > { %v794_v15 = vperm.slane %v778_v28, 1  ;;  %v758_v35 = vsub.f32 1.5, %v757_v30 }
 0x179   : > { %v810_v19 = vmul.f32 %v794_v15, %v3124_v59  ;;  %v759_v37 = vmul.f32 %v2407_v61, %v758_v35  ;;  %920 = vmatmul.f32.gmra.mxu1 %v842_v34  ;;  %v3167_v59 = vperm.slane %v3164_v44, 0  ;;  %v1448_v15 = vld [vmem:[#allocation5 + $0x120] sm:$0xff] }
 0x17b   : > { %v827_v5 = vadd.f32 %v2889_v50, %v810_v19  ;;  %v763_v36 = vsel %vm762_vm0, %v2407_v61, %v759_v37 }
 0x17c   : > { %v779_v24 = vmul.f32 %v3146_v33, %v763_v36  ;;  %v1459_v33 = vld [vmem:[#allocation5 + $0x178] sm:$0xff] }
 0x17d   : > { %v843_v40 = vmax.f32 %v827_v5, 0.0  ;;  %1463 = vmatpush.msra.mxu2 %v1459_v33  ;;  %v1447_v36 = vld [vmem:[#allocation5 + $0x118] sm:$0xff] }
 0x17e   : > { %v795_v38 = vperm.slane %v779_v24, 1 }
 0x180   : > { %v811_v41 = vmul.f32 %v795_v38, %v3137_v0 }
 0x181   : > { %923 = vmatmul.f32.gmra.mxu1 %v843_v40 }
 0x182   : > { %v828_v27 = vadd.f32 %v2889_v50, %v811_v41  ;;  %v1458_v50 = vld [vmem:[#allocation5 + $0x170] sm:$0xff] }
 0x183   : > { %1464 = vmatpush.msra.mxu2 %v1458_v50  ;;  %v1444_v50 = vld [vmem:[#allocation5 + $0x100] sm:$0xff] }
 0x184   : > { %v844_v3 = vmax.f32 %v828_v27, 0.0  ;;  %v1446_v27 = vld [vmem:[#allocation5 + $0x110] sm:$0xff] }
 0x185   : > { %1465 = vmatpush.msra.mxu2 %v1457_v48 }
 0x187   : > { %1466 = vmatpush.msra.mxu2 %v1456_v43 }
 0x189   : > { %926 = vmatmul.f32.gmra.mxu1 %v844_v3  ;;  %1467 = vmatpush.msra.mxu2 %v1455_v39 }
 0x18b   : > { %1468 = vmatpush.msra.mxu2 %v1454_v8 }
 0x18c   : > { %v882_v25 = vpop.f32.mrf.mxu1 }
 0x18d   : > { %v883_v47 = vadd.f32 %v882_v25, %v3167_v59  ;;  %1469 = vmatpush.msra.mxu2 %v1453_v51 }
 0x18f   : > { %v930_v49 = vrot.slane %v883_v47, 4  ;;  %1470 = vmatpush.msra.mxu2 %v1452_v53 }
 0x191   : > { %v931_v6 = vadd.f32 %v930_v49, %v883_v47  ;;  %1471 = vmatpush.msra.mxu2 %v1451_v13  ;;  %v1445_v49 = vld [vmem:[#allocation5 + $0x108] sm:$0xff] }
 0x193   : > { %v932_v45 = vrot.slane %v931_v6, 2  ;;  %1472 = vmatpush.msra.mxu2 %v1450_v21 }
 0x194   : > { %v885_v31 = vpop.f32.mrf.mxu1 }
 0x195   : > { %v933_v0 = vadd.f32 %v932_v45, %v931_v6  ;;  %v886_v11 = vadd.f32 %v885_v31, %v3167_v59  ;;  %1473 = vmatpush.msra.mxu2 %v1449_v20 }
 0x197   : > { %v934_v54 = vrot.slane %v933_v0, 1  ;;  %v936_v57 = vrot.slane %v886_v11, 4  ;;  %1474 = vmatpush.msra.mxu2 %v1448_v15 }
 0x199   : > { %v935_v32 = vadd.f32 %v934_v54, %v933_v0  ;;  %v937_v29 = vadd.f32 %v936_v57, %v886_v11  ;;  %1475 = vmatpush.msra.mxu2 %v1447_v36 }
 0x19b   : > { %v1026_v60 = vmul.f32 %v935_v32, %v2840_v55  ;;  %v938_v2 = vrot.slane %v937_v29, 2  ;;  %1476 = vmatpush.msra.mxu2 %v1446_v27 }
 0x19c   : > { %v888_v4 = vpop.f32.mrf.mxu1 }
 0x19d   : > { %v3172_v63 = vsub.f32 %v883_v47, %v1026_v60  ;;  %v939_v7 = vadd.f32 %v938_v2, %v937_v29  ;;  %v889_v23 = vadd.f32 %v888_v4, %v3167_v59  ;;  %1477 = vmatpush.msra.mxu2 %v1445_v49 }
 0x19f   : > { %v1058_v56 = vmul.f32 %v3172_v63, %v3172_v63  ;;  %v940_v46 = vrot.slane %v939_v7, 1  ;;  %v942_v9 = vrot.slane %v889_v23, 4  ;;  %1478 = vmatpush.msra.mxu2 %v1444_v50 }
 0x1a1   : > { %v1074_v12 = vrot.slane %v1058_v56, 4  ;;  %v941_v58 = vadd.f32 %v940_v46, %v939_v7  ;;  %v943_v10 = vadd.f32 %v942_v9, %v889_v23 }
 0x1a3   : > { %v1075_v16 = vadd.f32 %v1074_v12, %v1058_v56  ;;  %v1027_v1 = vmul.f32 %v941_v58, %v2840_v55  ;;  %v944_v14 = vrot.slane %v943_v10, 2 }
 0x1a4   : > { %v891_v62 = vpop.f32.mrf.mxu1 }
 0x1a5   : > { %v1076_v17 = vrot.slane %v1075_v16, 2  ;;  %v3178_v52 = vsub.f32 %v886_v11, %v1027_v1  ;;  %v945_v61 = vadd.f32 %v944_v14, %v943_v10  ;;  %v892_v34 = vadd.f32 %v891_v62, %v3167_v59 }
 0x1a7   : > { %v1077_v42 = vadd.f32 %v1076_v17, %v1075_v16  ;;  %v1059_v18 = vmul.f32 %v3178_v52, %v3178_v52  ;;  %v946_v22 = vrot.slane %v945_v61, 1  ;;  %v948_v5 = vrot.slane %v892_v34, 4 }
 0x1a9   : > { %v1078_v26 = vrot.slane %v1077_v42, 1  ;;  %v1080_v28 = vrot.slane %v1059_v18, 4  ;;  %v947_v30 = vadd.f32 %v946_v22, %v945_v61  ;;  %v949_v41 = vadd.f32 %v948_v5, %v892_v34 }
 0x1ab   : > { %v1079_v35 = vadd.f32 %v1078_v26, %v1077_v42  ;;  %v1081_v19 = vadd.f32 %v1080_v28, %v1059_v18  ;;  %v1028_v37 = vmul.f32 %v947_v30, %v2840_v55  ;;  %v950_v47 = vrot.slane %v949_v41, 2 }
 0x1ad   : > { %v1170_v24 = vmul.f32 %v1079_v35, %v2840_v55  ;;  %v1082_v38 = vrot.slane %v1081_v19, 2  ;;  %v3185_v40 = vsub.f32 %v889_v23, %v1028_v37  ;;  %v951_v0 = vadd.f32 %v950_v47, %v949_v41 }
 0x1ae   : > { %v894_v45 = vpop.f32.mrf.mxu1 }
 0x1af   : > { %v1083_v3 = vadd.f32 %v1082_v38, %v1081_v19  ;;  %v1060_v25 = vmul.f32 %v3185_v40, %v3185_v40  ;;  %v1186_v6 = vadd.f32 1e-05, %v1170_v24  ;;  %v895_v11 = vadd.f32 %v894_v45, %v3167_v59 }
 0x1b0   : > { %v952_v48 = vrot.slane %v951_v0, 1 }
 0x1b1   : > { %v1084_v33 = vrot.slane %v1083_v3, 1  ;;  %v1086_v31 = vrot.slane %v1060_v25, 4  ;;  %2408 = vrsqrt.f32 %v1186_v6  ;;  %v954_v32 = vrot.slane %v895_v11, 4 }
 0x1b2   : > { %v953_v60 = vadd.f32 %v952_v48, %v951_v0  ;;  %vm1208_vm2 = vweird.f32 %v1186_v6 }
 0x1b3   : > { %v1085_v54 = vadd.f32 %v1084_v33, %v1083_v3  ;;  %v1087_v57 = vadd.f32 %v1086_v31, %v1060_v25  ;;  %v955_v2 = vadd.f32 %v954_v32, %v895_v11  ;;  %v3217_v33 = vperm.slane %v3164_v44, 2 }
 0x1b4   : > { %v1029_v4 = vmul.f32 %v953_v60, %v2840_v55 }
 0x1b5   : > { %v1171_v29 = vmul.f32 %v1085_v54, %v2840_v55  ;;  %v1088_v43 = vrot.slane %v1087_v57, 2  ;;  %v956_v7 = vrot.slane %v955_v2, 2 }
 0x1b6   : > { %v897_v56 = vpop.f32.mrf.mxu1  ;;  %v3194_v9 = vsub.f32 %v892_v34, %v1029_v4 }
 0x1b7   : > { %v1089_v39 = vadd.f32 %v1088_v43, %v1087_v57  ;;  %v3192_v23 = vadd.f32 1e-05, %v1171_v29  ;;  %v2409_v8 = vpop.eup %2408  ;;  %v957_v51 = vadd.f32 %v956_v7, %v955_v2  ;;  %v898_v12 = vadd.f32 %v897_v56, %v3167_v59 }
 0x1b8   : > { %v1203_v58 = vmul.f32 %v2409_v8, %v1186_v6  ;;  %v1061_v53 = vmul.f32 %v3194_v9, %v3194_v9  ;;  %vm1209_vm1 = vweird.f32 %v2409_v8 }
 0x1b9   : > { %v1090_v46 = vrot.slane %v1089_v39, 1  ;;  %2410 = vrsqrt.f32 %v3192_v23  ;;  %v958_v16 = vrot.slane %v957_v51, 1  ;;  %v960_v1 = vrot.slane %v898_v12, 4  ;;  %vm1210_vm3 = vmor %vm1208_vm2, %vm1209_vm1 }
 0x1ba   : > { %v1204_v14 = vmul.f32 %v2409_v8, %v1203_v58  ;;  %v1092_v17 = vrot.slane %v1061_v53, 4  ;;  %vm1218_vm4 = vweird.f32 %v3192_v23 }
 0x1bb   : > { %v1091_v10 = vadd.f32 %v1090_v46, %v1089_v39  ;;  %v959_v61 = vadd.f32 %v958_v16, %v957_v51  ;;  %v961_v21 = vadd.f32 %v960_v1, %v898_v12 }
 0x1bc   : > { %v1205_v42 = vmul.f32 0.5, %v1204_v14  ;;  %v1093_v18 = vadd.f32 %v1092_v17, %v1061_v53 }
 0x1bd   : > { %v1172_v13 = vmul.f32 %v1091_v10, %v2840_v55  ;;  %v1030_v22 = vmul.f32 %v959_v61, %v2840_v55  ;;  %v962_v20 = vrot.slane %v961_v21, 2 }
 0x1be   : > { %v900_v28 = vpop.f32.mrf.mxu1  ;;  %v1206_v30 = vsub.f32 1.5, %v1205_v42  ;;  %v1094_v34 = vrot.slane %v1093_v18, 2 }
 0x1bf   : > { %v3202_v62 = vadd.f32 1e-05, %v1172_v13  ;;  %v2411_v26 = vpop.eup %2410  ;;  %v3204_v15 = vsub.f32 %v895_v11, %v1030_v22  ;;  %v963_v35 = vadd.f32 %v962_v20, %v961_v21  ;;  %v3207_v19 = vadd.f32 %v900_v28, %v3167_v59 }
 0x1c0   : > { %v1207_v37 = vmul.f32 %v2409_v8, %v1206_v30  ;;  %v1213_v5 = vmul.f32 %v2411_v26, %v3192_v23  ;;  %v1095_v36 = vadd.f32 %v1094_v34, %v1093_v18  ;;  %vm1219_vm5 = vweird.f32 %v2411_v26 }
 0x1c1   : > { %2412 = vrsqrt.f32 %v3202_v62  ;;  %v1062_v24 = vmul.f32 %v3204_v15, %v3204_v15  ;;  %v964_v38 = vrot.slane %v963_v35, 1  ;;  %v966_v41 = vrot.slane %v3207_v19, 4  ;;  %vm1220_vm6 = vmor %vm1218_vm4, %vm1219_vm5 }
 0x1c2   : > { %v1211_v27 = vsel %vm1210_vm3, %v2409_v8, %v1207_v37  ;;  %v1214_v3 = vmul.f32 %v2411_v26, %v1213_v5  ;;  %v1096_v25 = vrot.slane %v1095_v36, 1  ;;  %vm1228_vm8 = vweird.f32 %v3202_v62 }
 0x1c3   : > { %v1098_v47 = vrot.slane %v1062_v24, 4  ;;  %v965_v49 = vadd.f32 %v964_v38, %v963_v35  ;;  %v967_v45 = vadd.f32 %v966_v41, %v3207_v19  ;;  %v1362_v6 = vmul.f32 %v1211_v27, %v3164_v44 }
 0x1c4   : > { %v1215_v31 = vmul.f32 0.5, %v1214_v3  ;;  %v1097_v0 = vadd.f32 %v1096_v25, %v1095_v36 }
 0x1c5   : > { %v1099_v11 = vadd.f32 %v1098_v47, %v1062_v24  ;;  %v1031_v50 = vmul.f32 %v965_v49, %v2840_v55  ;;  %v968_v54 = vrot.slane %v967_v45, 2  ;;  %v1378_v32 = vperm.slane %v1362_v6, 1 }
 0x1c6   : > { %v903_v48 = vpop.f32.mrf.mxu1  ;;  %v1216_v29 = vsub.f32 1.5, %v1215_v31  ;;  %v1173_v43 = vmul.f32 %v1097_v0, %v2840_v55 }
 0x1c7   : > { %v2413_v57 = vpop.eup %2412  ;;  %v1100_v60 = vrot.slane %v1099_v11, 2  ;;  %v3222_v2 = vsub.f32 %v898_v12, %v1031_v50  ;;  %v969_v39 = vadd.f32 %v968_v54, %v967_v45  ;;  %v3225_v4 = vadd.f32 %v903_v48, %v3167_v59 }
 0x1c8   : > { %v1394_v7 = vmul.f32 %v1378_v32, %v3172_v63  ;;  %v1217_v8 = vmul.f32 %v2411_v26, %v1216_v29  ;;  %v1223_v56 = vmul.f32 %v2413_v57, %v3202_v62  ;;  %v3235_v21 = vadd.f32 1e-05, %v1173_v43 }
 0x1c9   : > { %v1101_v46 = vadd.f32 %v1100_v60, %v1099_v11  ;;  %v1063_v51 = vmul.f32 %v3222_v2, %v3222_v2  ;;  %v970_v23 = vrot.slane %v969_v39, 1  ;;  %v972_v58 = vrot.slane %v3225_v4, 4 }
 0x1ca   : > { %v1411_v12 = vadd.f32 %v3217_v33, %v1394_v7  ;;  %v1221_v10 = vsel %vm1220_vm6, %v2411_v26, %v1217_v8  ;;  %v1224_v53 = vmul.f32 %v2413_v57, %v1223_v56  ;;  %vm1229_vm7 = vweird.f32 %v2413_v57 }
 0x1cb   : > { %v1102_v16 = vrot.slane %v1101_v46, 1  ;;  %v1104_v1 = vrot.slane %v1063_v51, 4  ;;  %v971_v14 = vadd.f32 %v970_v23, %v969_v39  ;;  %v1363_v63 = vmul.f32 %v1221_v10, %v3164_v44  ;;  %vm1230_vm9 = vmor %vm1228_vm8, %vm1229_vm7 }
 0x1cc   : > { %v973_v13 = vadd.f32 %v972_v58, %v3225_v4  ;;  %v1427_v17 = vmax.f32 %v1411_v12, 0.0  ;;  %v1225_v61 = vmul.f32 0.5, %v1224_v53  ;;  %2414 = vrsqrt.f32 %v3235_v21 }
 0x1cd   : > { %v1103_v42 = vadd.f32 %v1102_v16, %v1101_v46  ;;  %v1105_v18 = vadd.f32 %v1104_v1, %v1063_v51  ;;  %v1032_v22 = vmul.f32 %v971_v14, %v2840_v55  ;;  %v1379_v20 = vperm.slane %v1363_v63, 1 }
 0x1ce   : > { %v974_v28 = vrot.slane %v973_v13, 2  ;;  %v906_v30 = vpop.f32.mrf.mxu1  ;;  %1479 = vmatmul.f32.vlgmr.msra.gmra.mxu2 %v1427_v17  ;;  %v1226_v26 = vsub.f32 1.5, %v1225_v61  ;;  %vm1238_vm11 = vweird.f32 %v3235_v21 }
 0x1cf   : > { %v1174_v34 = vmul.f32 %v1103_v42, %v2840_v55  ;;  %v1106_v35 = vrot.slane %v1105_v18, 2  ;;  %v3241_v37 = vsub.f32 %v3207_v19, %v1032_v22  ;;  %v3244_v5 = vadd.f32 %v906_v30, %v3167_v59 }
 0x1d0   : > { %v975_v36 = vadd.f32 %v974_v28, %v973_v13  ;;  %v1395_v24 = vmul.f32 %v1379_v20, %v3178_v52  ;;  %v1227_v38 = vmul.f32 %v2413_v57, %v1226_v26 }
 0x1d1   : > { %v1107_v41 = vadd.f32 %v1106_v35, %v1105_v18  ;;  %v1064_v27 = vmul.f32 %v3241_v37, %v3241_v37  ;;  %v978_v3 = vrot.slane %v3244_v5, 4  ;;  %v3251_v25 = vadd.f32 1e-05, %v1174_v34 }
 0x1d2   : > { %v976_v19 = vrot.slane %v975_v36, 1  ;;  %v1412_v47 = vadd.f32 %v3217_v33, %v1395_v24  ;;  %v1231_v49 = vsel %vm1230_vm9, %v2413_v57, %v1227_v38  ;;  %v2415_v62 = vpop.eup %2414 }
 0x1d3   : > { %v1108_v45 = vrot.slane %v1107_v41, 1  ;;  %v1110_v6 = vrot.slane %v1064_v27, 4  ;;  %v979_v52 = vadd.f32 %v978_v3, %v3244_v5  ;;  %v1364_v31 = vmul.f32 %v1231_v49, %v3164_v44 }
 0x1d4   : > { %v977_v0 = vadd.f32 %v976_v19, %v975_v36  ;;  %v1428_v11 = vmax.f32 %v1412_v47, 0.0  ;;  %2416 = vrsqrt.f32 %v3251_v25  ;;  %v1233_v57 = vmul.f32 %v2415_v62, %v3235_v21 }
 0x1d5   : > { %v1109_v50 = vadd.f32 %v1108_v45, %v1107_v41  ;;  %v1111_v54 = vadd.f32 %v1110_v6, %v1064_v27  ;;  %v980_v48 = vrot.slane %v979_v52, 2  ;;  %v1380_v32 = vperm.slane %v1364_v31, 1 }
 0x1d6   : > { %v1033_v29 = vmul.f32 %v977_v0, %v2840_v55  ;;  %v909_v43 = vpop.f32.mrf.mxu1  ;;  %1482 = vmatmul.f32.gmra.mxu2 %v1428_v11  ;;  %v1234_v51 = vmul.f32 %v2415_v62, %v1233_v57  ;;  %vm1239_vm10 = vweird.f32 %v2415_v62  ;;  %vm1248_vm14 = vweird.f32 %v3251_v25 }
 0x1d7   : > { %v1175_v60 = vmul.f32 %v1109_v50, %v2840_v55  ;;  %v1112_v39 = vrot.slane %v1111_v54, 2  ;;  %v981_v7 = vadd.f32 %v980_v48, %v979_v52  ;;  %v3261_v8 = vadd.f32 %v909_v43, %v3167_v59  ;;  %vm1240_vm12 = vmor %vm1238_vm11, %vm1239_vm10 }
 0x1d8   : > { %v3264_v56 = vsub.f32 %v3225_v4, %v1033_v29  ;;  %v1396_v46 = vmul.f32 %v1380_v32, %v3185_v40  ;;  %v1235_v1 = vmul.f32 0.5, %v1234_v51 }
 0x1d9   : > { %v1113_v23 = vadd.f32 %v1112_v39, %v1111_v54  ;;  %v982_v58 = vrot.slane %v981_v7, 1  ;;  %v984_v12 = vrot.slane %v3261_v8, 4  ;;  %v3273_v14 = vadd.f32 1e-05, %v1175_v60 }
 0x1da   : > { %v3268_v10 = vpop.eup %2416  ;;  %v1065_v53 = vmul.f32 %v3264_v56, %v3264_v56  ;;  %v1413_v16 = vadd.f32 %v3217_v33, %v1396_v46  ;;  %v1236_v42 = vsub.f32 1.5, %v1235_v1 }
 0x1db   : > { %v1114_v63 = vrot.slane %v1113_v23, 1  ;;  %v983_v4 = vadd.f32 %v982_v58, %v981_v7  ;;  %v985_v13 = vadd.f32 %v984_v12, %v3261_v8  ;;  %v1243_v40 = vmul.f32 %v3268_v10, %v3251_v25 }
 0x1dc   : > { %v1116_v17 = vrot.slane %v1065_v53, 4  ;;  %v1429_v61 = vmax.f32 %v1413_v16, 0.0  ;;  %v1237_v34 = vmul.f32 %v2415_v62, %v1236_v42  ;;  %2418 = vrsqrt.f32 %v3273_v14 }
 0x1dd   : > { %v1115_v18 = vadd.f32 %v1114_v63, %v1113_v23  ;;  %v1034_v22 = vmul.f32 %v983_v4, %v2840_v55  ;;  %v986_v20 = vrot.slane %v985_v13, 2  ;;  %v1244_v28 = vmul.f32 %v3268_v10, %v1243_v40 }
 0x1de   : > { %v1117_v30 = vadd.f32 %v1116_v17, %v1065_v53  ;;  %v912_v26 = vpop.f32.mrf.mxu1  ;;  %1485 = vmatmul.f32.gmra.mxu2 %v1429_v61  ;;  %v1241_v27 = vsel %vm1240_vm12, %v2415_v62, %v1237_v34  ;;  %vm1249_vm13 = vweird.f32 %v3268_v10  ;;  %vm1258_vm0 = vweird.f32 %v3273_v14 }
 0x1df   : > { %v1176_v35 = vmul.f32 %v1115_v18, %v2840_v55  ;;  %v3284_v36 = vsub.f32 %v3244_v5, %v1034_v22  ;;  %v987_v24 = vadd.f32 %v986_v20, %v985_v13  ;;  %v3287_v38 = vadd.f32 %v912_v26, %v3167_v59  ;;  %vm1250_vm15 = vmor %vm1248_vm14, %vm1249_vm13 }
 0x1e0   : > { %v1118_v41 = vrot.slane %v1117_v30, 2  ;;  %v1245_v3 = vmul.f32 0.5, %v1244_v28  ;;  %v1365_v49 = vmul.f32 %v1241_v27, %v3164_v44 }
 0x1e1   : > { %v1066_v19 = vmul.f32 %v3284_v36, %v3284_v36  ;;  %v988_v21 = vrot.slane %v987_v24, 1  ;;  %v990_v47 = vrot.slane %v3287_v38, 4  ;;  %v3295_v6 = vadd.f32 1e-05, %v1176_v35 }
 0x1e2   : > { %v1119_v45 = vadd.f32 %v1118_v41, %v1117_v30  ;;  %v1246_v5 = vsub.f32 1.5, %v1245_v3  ;;  %v1381_v62 = vperm.slane %v1365_v49, 1  ;;  %v3298_v11 = vpop.eup %2418 }
 0x1e3   : > { %v1122_v52 = vrot.slane %v1066_v19, 4  ;;  %v989_v31 = vadd.f32 %v988_v21, %v987_v24  ;;  %v991_v0 = vadd.f32 %v990_v47, %v3287_v38  ;;  %2420 = vrsqrt.f32 %v3295_v6 }
 0x1e4   : > { %v1120_v50 = vrot.slane %v1119_v45, 1  ;;  %v1247_v54 = vmul.f32 %v3268_v10, %v1246_v5  ;;  %v1397_v43 = vmul.f32 %v1381_v62, %v3194_v9  ;;  %v1253_v7 = vmul.f32 %v3298_v11, %v3273_v14 }
 0x1e5   : > { %v1123_v48 = vadd.f32 %v1122_v52, %v1066_v19  ;;  %v1035_v32 = vmul.f32 %v989_v31, %v2840_v55  ;;  %v992_v29 = vrot.slane %v991_v0, 2  ;;  %vm1259_vm1 = vweird.f32 %v3298_v11 }
 0x1e6   : > { %v1121_v57 = vadd.f32 %v1120_v50, %v1119_v45  ;;  %v915_v60 = vpop.f32.mrf.mxu1  ;;  %v1251_v39 = vsel %vm1250_vm15, %v3268_v10, %v1247_v54  ;;  %v1414_v58 = vadd.f32 %v3217_v33, %v1397_v43  ;;  %v1254_v10 = vmul.f32 %v3298_v11, %v1253_v7  ;;  %vm1260_vm2 = vmor %vm1258_vm0, %vm1259_vm1 }
 0x1e7   : > { %v1124_v25 = vrot.slane %v1123_v48, 2  ;;  %v3312_v46 = vsub.f32 %v3261_v8, %v1035_v32  ;;  %v993_v51 = vadd.f32 %v992_v29, %v991_v0  ;;  %v3315_v23 = vadd.f32 %v915_v60, %v3167_v59 }
 0x1e8   : > { %v1177_v9 = vmul.f32 %v1121_v57, %v2840_v55  ;;  %v1366_v12 = vmul.f32 %v1251_v39, %v3164_v44  ;;  %v1430_v4 = vmax.f32 %v1414_v58, 0.0  ;;  %v1255_v40 = vmul.f32 0.5, %v1254_v10 }
 0x1e9   : > { %v1125_v53 = vadd.f32 %v1124_v25, %v1123_v48  ;;  %v1067_v16 = vmul.f32 %v3312_v46, %v3312_v46  ;;  %v994_v1 = vrot.slane %v993_v51, 1  ;;  %v996_v8 = vrot.slane %v3315_v23, 4  ;;  %v3324_v63 = vpop.eup %2420 }
 0x1ea   : > { %v1382_v13 = vperm.slane %v1366_v12, 1  ;;  %v3326_v17 = vadd.f32 1e-05, %v1177_v9  ;;  %1488 = vmatmul.f32.gmra.mxu2 %v1430_v4  ;;  %v1256_v28 = vsub.f32 1.5, %v1255_v40  ;;  %v1263_v30 = vmul.f32 %v3324_v63, %v3295_v6 }
 0x1eb   : > { %v1126_v61 = vrot.slane %v1125_v53, 1  ;;  %v1128_v42 = vrot.slane %v1067_v16, 4  ;;  %v995_v18 = vadd.f32 %v994_v1, %v993_v51  ;;  %v997_v22 = vadd.f32 %v996_v8, %v3315_v23 }
 0x1ec   : > { %v1398_v20 = vmul.f32 %v1382_v13, %v3204_v15  ;;  %v1257_v3 = vmul.f32 %v3298_v11, %v1256_v28  ;;  %v1264_v19 = vmul.f32 %v3324_v63, %v1263_v30  ;;  %2422 = vrsqrt.f32 %v3326_v17 }
 0x1ed   : > { %v1127_v26 = vadd.f32 %v1126_v61, %v1125_v53  ;;  %v1129_v34 = vadd.f32 %v1128_v42, %v1067_v16  ;;  %v1036_v35 = vmul.f32 %v995_v18, %v2840_v55  ;;  %v998_v24 = vrot.slane %v997_v22, 2 }
 0x1ee   : > { %v918_v41 = vpop.f32.mrf.mxu1  ;;  %v1415_v27 = vadd.f32 %v3217_v33, %v1398_v20  ;;  %v1261_v52 = vsel %vm1260_vm2, %v3298_v11, %v1257_v3  ;;  %v1265_v31 = vmul.f32 0.5, %v1264_v19  ;;  %vm1269_vm3 = vweird.f32 %v3324_v63 }
 0x1ef   : > { %v1178_v15 = vmul.f32 %v1127_v26, %v2840_v55  ;;  %v1130_v21 = vrot.slane %v1129_v34, 2  ;;  %v3340_v47 = vsub.f32 %v3287_v38, %v1036_v35  ;;  %v999_v49 = vadd.f32 %v998_v24, %v997_v22 }
 0x1f0   : > { %v3347_v45 = vadd.f32 %v918_v41, %v3167_v59  ;;  %v1431_v5 = vmax.f32 %v1415_v27, 0.0  ;;  %v1367_v38 = vmul.f32 %v1261_v52, %v3164_v44  ;;  %v1266_v48 = vsub.f32 1.5, %v1265_v31 }
 0x1f1   : > { %v1131_v0 = vadd.f32 %v1130_v21, %v1129_v34  ;;  %v1068_v62 = vmul.f32 %v3340_v47, %v3340_v47  ;;  %v1000_v50 = vrot.slane %v999_v49, 1  ;;  %v3355_v14 = vadd.f32 1e-05, %v1178_v15 }
 0x1f2   : > { %v1002_v54 = vrot.slane %v3347_v45, 4  ;;  %v1383_v57 = vperm.slane %v1367_v38, 1  ;;  %v3357_v11 = vpop.eup %2422  ;;  %1491 = vmatmul.f32.gmra.mxu2 %v1431_v5  ;;  %v1267_v39 = vmul.f32 %v3324_v63, %v1266_v48  ;;  %vm1268_vm4 = vweird.f32 %v3295_v6 }
 0x1f3   : > { %v1132_v32 = vrot.slane %v1131_v0, 1  ;;  %v1134_v29 = vrot.slane %v1068_v62, 4  ;;  %v1001_v43 = vadd.f32 %v1000_v50, %v999_v49  ;;  %2424 = vrsqrt.f32 %v3355_v14  ;;  %vm1270_vm5 = vmor %vm1268_vm4, %vm1269_vm3 }
 0x1f4   : > { %v1003_v60 = vadd.f32 %v1002_v54, %v3347_v45  ;;  %v1399_v9 = vmul.f32 %v1383_v57, %v3222_v2  ;;  %v1271_v10 = vsel %vm1270_vm5, %v3324_v63, %v1267_v39  ;;  %v1273_v53 = vmul.f32 %v3357_v11, %v3326_v17 }
 0x1f5   : > { %v1133_v7 = vadd.f32 %v1132_v32, %v1131_v0  ;;  %v1135_v25 = vadd.f32 %v1134_v29, %v1068_v62  ;;  %v1037_v51 = vmul.f32 %v1001_v43, %v2840_v55  ;;  %vm1278_vm6 = vweird.f32 %v3326_v17 }
 0x1f6   : > { %v1004_v58 = vrot.slane %v1003_v60, 2  ;;  %v921_v12 = vpop.f32.mrf.mxu1  ;;  %v1416_v4 = vadd.f32 %v3217_v33, %v1399_v9  ;;  %v1368_v13 = vmul.f32 %v1271_v10, %v3164_v44  ;;  %v1274_v63 = vmul.f32 %v3357_v11, %v1273_v53 }
 0x1f7   : > { %v1179_v6 = vmul.f32 %v1133_v7, %v2840_v55  ;;  %v1136_v16 = vrot.slane %v1135_v25, 2  ;;  %v3373_v1 = vsub.f32 %v3315_v23, %v1037_v51  ;;  %v3376_v2 = vadd.f32 %v921_v12, %v3167_v59 }
 0x1f8   : > { %v1005_v8 = vadd.f32 %v1004_v58, %v1003_v60  ;;  %v1432_v20 = vmax.f32 %v1416_v4, 0.0  ;;  %v1384_v28 = vperm.slane %v1368_v13, 1  ;;  %v1275_v30 = vmul.f32 0.5, %v1274_v63 }
 0x1f9   : > { %v1137_v40 = vadd.f32 %v1136_v16, %v1135_v25  ;;  %v1069_v61 = vmul.f32 %v3373_v1, %v3373_v1  ;;  %v1008_v42 = vrot.slane %v3376_v2, 4  ;;  %v3384_v18 = vadd.f32 1e-05, %v1179_v6  ;;  %v3386_v23 = vpop.eup %2424 }
 0x1fa   : > { %v1006_v22 = vrot.slane %v1005_v8, 1  ;;  %v1283_v24 = vmul.f32 %v3386_v23, %v3355_v14  ;;  %1494 = vmatmul.f32.gmra.mxu2 %v1432_v20  ;;  %v1400_v27 = vmul.f32 %v1384_v28, %v3241_v37  ;;  %v1276_v3 = vsub.f32 1.5, %v1275_v30 }
 0x1fb   : > { %v1138_v26 = vrot.slane %v1137_v40, 1  ;;  %v1140_v34 = vrot.slane %v1069_v61, 4  ;;  %v1009_v35 = vadd.f32 %v1008_v42, %v3376_v2  ;;  %vm1279_vm7 = vweird.f32 %v3357_v11 }
 0x1fc   : > { %v1007_v41 = vadd.f32 %v1006_v22, %v1005_v8  ;;  %v1284_v49 = vmul.f32 %v3386_v23, %v1283_v24  ;;  %v1417_v31 = vadd.f32 %v3217_v33, %v1400_v27  ;;  %v1277_v0 = vmul.f32 %v3357_v11, %v1276_v3  ;;  %vm1280_vm8 = vmor %vm1278_vm6, %vm1279_vm7 }
 0x1fd   : > { %v1139_v19 = vadd.f32 %v1138_v26, %v1137_v40  ;;  %v1141_v15 = vadd.f32 %v1140_v34, %v1069_v61  ;;  %v1010_v21 = vrot.slane %v1009_v35, 2  ;;  %2426 = vrsqrt.f32 %v3384_v18 }
 0x1fe   : > { %v1038_v5 = vmul.f32 %v1007_v41, %v2840_v55  ;;  %v924_v52 = vpop.f32.mrf.mxu1  ;;  %v1433_v48 = vmax.f32 %v1417_v31, 0.0  ;;  %v1281_v32 = vsel %vm1280_vm8, %v3357_v11, %v1277_v0  ;;  %v1285_v29 = vmul.f32 0.5, %v1284_v49 }
 0x1ff   : > { %v1180_v62 = vmul.f32 %v1139_v19, %v2840_v55  ;;  %v1142_v37 = vrot.slane %v1141_v15, 2  ;;  %v1011_v50 = vadd.f32 %v1010_v21, %v1009_v35  ;;  %v3400_v38 = vadd.f32 %v924_v52, %v3167_v59 }
 0x200   : > { %v3405_v54 = vsub.f32 %v3347_v45, %v1038_v5  ;;  %v1369_v39 = vmul.f32 %v1281_v32, %v3164_v44  ;;  %v1286_v25 = vsub.f32 1.5, %v1285_v29  ;;  %vm1289_vm9 = vweird.f32 %v3386_v23 }
 0x201   : > { %v1143_v43 = vadd.f32 %v1142_v37, %v1141_v15  ;;  %v1012_v57 = vrot.slane %v1011_v50, 1  ;;  %v1014_v60 = vrot.slane %v3400_v38, 4  ;;  %v3413_v17 = vadd.f32 1e-05, %v1180_v62 }
 0x202   : > { %v1070_v7 = vmul.f32 %v3405_v54, %v3405_v54  ;;  %v1385_v11 = vperm.slane %v1369_v39, 1  ;;  %1497 = vmatmul.f32.gmra.mxu2 %v1433_v48  ;;  %v1287_v10 = vmul.f32 %v3386_v23, %v1286_v25  ;;  %vm1288_vm10 = vweird.f32 %v3355_v14 }
 0x203   : > { %v1144_v45 = vrot.slane %v1143_v43, 1  ;;  %v1013_v51 = vadd.f32 %v1012_v57, %v1011_v50  ;;  %v1015_v9 = vadd.f32 %v1014_v60, %v3400_v38  ;;  %v2427_v58 = vpop.eup %2426  ;;  %2428 = vrsqrt.f32 %v3413_v17  ;;  %vm1290_vm11 = vmor %vm1288_vm10, %vm1289_vm9 }
 0x204   : > { %v1146_v12 = vrot.slane %v1070_v7, 4  ;;  %v1401_v8 = vmul.f32 %v1385_v11, %v3264_v56  ;;  %v1291_v63 = vsel %vm1290_vm11, %v3386_v23, %v1287_v10  ;;  %v1293_v40 = vmul.f32 %v2427_v58, %v3384_v18 }
 0x205   : > { %v1145_v53 = vadd.f32 %v1144_v45, %v1143_v43  ;;  %v1039_v6 = vmul.f32 %v1013_v51, %v2840_v55  ;;  %v1016_v16 = vrot.slane %v1015_v9, 2  ;;  %vm1298_vm12 = vweird.f32 %v3384_v18 }
 0x206   : > { %v1147_v4 = vadd.f32 %v1146_v12, %v1070_v7  ;;  %v927_v13 = vpop.f32.mrf.mxu1  ;;  %v1418_v20 = vadd.f32 %v3217_v33, %v1401_v8  ;;  %v1370_v28 = vmul.f32 %v1291_v63, %v3164_v44  ;;  %v1294_v30 = vmul.f32 %v2427_v58, %v1293_v40 }
 0x207   : > { %v1181_v14 = vmul.f32 %v1145_v53, %v2840_v55  ;;  %v3428_v61 = vsub.f32 %v3376_v2, %v1039_v6  ;;  %v1017_v42 = vadd.f32 %v1016_v16, %v1015_v9  ;;  %v3431_v22 = vadd.f32 %v927_v13, %v3167_v59 }
 0x208   : > { %v1148_v56 = vrot.slane %v1147_v4, 2  ;;  %v1434_v41 = vmax.f32 %v1418_v20, 0.0  ;;  %v1386_v27 = vperm.slane %v1370_v28, 1  ;;  %v1295_v59 = vmul.f32 0.5, %v1294_v30 }
 0x209   : > { %v1071_v23 = vmul.f32 %v3428_v61, %v3428_v61  ;;  %v1018_v26 = vrot.slane %v1017_v42, 1  ;;  %v1020_v34 = vrot.slane %v3431_v22, 4  ;;  %v3438_v35 = vadd.f32 1e-05, %v1181_v14  ;;  %v2429_v2 = vpop.eup %2428 }
 0x20a   : > { %v1149_v24 = vadd.f32 %v1148_v56, %v1147_v4  ;;  %v1303_v21 = vmul.f32 %v2429_v2, %v3413_v17  ;;  %1500 = vmatmul.f32.gmra.mxu2 %v1434_v41  ;;  %v1402_v5 = vmul.f32 %v1386_v27, %v3284_v36  ;;  %v1296_v52 = vsub.f32 1.5, %v1295_v59 }
 0x20b   : > { %v1152_v3 = vrot.slane %v1071_v23, 4  ;;  %v1019_v19 = vadd.f32 %v1018_v26, %v1017_v42  ;;  %v1021_v15 = vadd.f32 %v1020_v34, %v3431_v22  ;;  %vm1299_vm13 = vweird.f32 %v2427_v58 }
 0x20c   : > { %v1150_v49 = vrot.slane %v1149_v24, 1  ;;  %v1304_v37 = vmul.f32 %v2429_v2, %v1303_v21  ;;  %v1419_v48 = vadd.f32 %v3217_v33, %v1402_v5  ;;  %v1297_v32 = vmul.f32 %v2427_v58, %v1296_v52  ;;  %vm1300_vm14 = vmor %vm1298_vm12, %vm1299_vm13 }
 0x20d   : > { %v1153_v31 = vadd.f32 %v1152_v3, %v1071_v23  ;;  %v1040_v0 = vmul.f32 %v1019_v19, %v2840_v55  ;;  %v1022_v62 = vrot.slane %v1021_v15, 2  ;;  %2430 = vrsqrt.f32 %v3438_v35 }
 0x20e   : > { %v1151_v50 = vadd.f32 %v1150_v49, %v1149_v24  ;;  %v1305_v36 = vmul.f32 0.5, %v1304_v37  ;;  %v1435_v39 = vmax.f32 %v1419_v48, 0.0  ;;  %v1301_v7 = vsel %vm1300_vm14, %v2427_v58, %v1297_v32  ;;  %v3476_v37 = vld [vmem:[#allocation7 + $0x8] sm:$0xff] }
 0x20f   : > { %v1154_v29 = vrot.slane %v1153_v31, 2  ;;  %v3447_v43 = vsub.f32 %v3400_v38, %v1040_v0  ;;  %v1023_v57 = vadd.f32 %v1022_v62, %v1021_v15  ;;  %v1371_v9 = vmul.f32 %v1301_v7, %v3164_v44 }
 0x210   : > { %v1182_v60 = vmul.f32 %v1151_v50, %v2840_v55  ;;  %v1306_v11 = vsub.f32 1.5, %v1305_v36  ;;  %vm1309_vm15 = vweird.f32 %v2429_v2  ;;  %vm1308_vm0 = vweird.f32 %v3413_v17 }
 0x211   : > { %v1155_v25 = vadd.f32 %v1154_v29, %v1153_v31  ;;  %v1072_v45 = vmul.f32 %v3447_v43, %v3447_v43  ;;  %v1024_v51 = vrot.slane %v1023_v57, 1  ;;  %v1387_v53 = vperm.slane %v1371_v9, 1  ;;  %vm1310_vm1 = vmor %vm1308_vm0, %vm1309_vm15 }
 0x212   : > { %v3455_v38 = vadd.f32 1e-05, %v1182_v60  ;;  %1503 = vmatmul.f32.gmra.mxu2 %v1435_v39  ;;  %v1307_v16 = vmul.f32 %v2429_v2, %v1306_v11  ;;  %vm1318_vm3 = vweird.f32 %v3438_v35 }
 0x213   : > { %v1156_v12 = vrot.slane %v1155_v25, 1  ;;  %v1158_v10 = vrot.slane %v1072_v45, 4  ;;  %v1025_v18 = vadd.f32 %v1024_v51, %v1023_v57  ;;  %v2431_v6 = vpop.eup %2430  ;;  %v1403_v13 = vmul.f32 %v1387_v53, %v3312_v46 }
 0x214   : > { %2432 = vrsqrt.f32 %v3455_v38  ;;  %v1311_v63 = vsel %vm1310_vm1, %v2429_v2, %v1307_v16  ;;  %v1313_v40 = vmul.f32 %v2431_v6, %v3438_v35  ;;  %vm1319_vm2 = vweird.f32 %v2431_v6 }
 0x215   : > { %v1157_v58 = vadd.f32 %v1156_v12, %v1155_v25  ;;  %v1159_v8 = vadd.f32 %v1158_v10, %v1072_v45  ;;  %v1041_v4 = vmul.f32 %v1025_v18, %v2840_v55  ;;  %v1420_v17 = vadd.f32 %v3217_v33, %v1403_v13  ;;  %vm1320_vm4 = vmor %vm1318_vm3, %vm1319_vm2 }
 0x216   : > { %v1372_v20 = vmul.f32 %v1311_v63, %v3164_v44  ;;  %v1314_v28 = vmul.f32 %v2431_v6, %v1313_v40  ;;  %vm1328_vm6 = vweird.f32 %v3455_v38 }
 0x217   : > { %v1183_v14 = vmul.f32 %v1157_v58, %v2840_v55  ;;  %v1160_v42 = vrot.slane %v1159_v8, 2  ;;  %v3465_v56 = vsub.f32 %v3431_v22, %v1041_v4  ;;  %v1436_v23 = vmax.f32 %v1420_v17, 0.0 }
 0x218   : > { %v1388_v2 = vperm.slane %v1372_v20, 1  ;;  %v1315_v24 = vmul.f32 0.5, %v1314_v28 }
 0x219   : > { %v1161_v30 = vadd.f32 %v1160_v42, %v1159_v8  ;;  %v1073_v46 = vmul.f32 %v3465_v56, %v3465_v56  ;;  %v1199_v26 = vadd.f32 1e-05, %v1183_v14 }
 0x21a   : > { %v2433_v34 = vpop.eup %2432  ;;  %1506 = vmatmul.f32.gmra.mxu2 %v1436_v23  ;;  %v1404_v22 = vmul.f32 %v1388_v2, %v3340_v47  ;;  %v1316_v3 = vsub.f32 1.5, %v1315_v24 }
 0x21b   : > { %v1162_v41 = vrot.slane %v1161_v30, 1  ;;  %v1164_v27 = vrot.slane %v1073_v46, 4  ;;  %v1323_v59 = vmul.f32 %v2433_v34, %v3455_v38  ;;  %2434 = vrsqrt.f32 %v1199_v26 }
 0x21c   : > { %v1421_v21 = vadd.f32 %v3217_v33, %v1404_v22  ;;  %v1317_v49 = vmul.f32 %v2431_v6, %v1316_v3  ;;  %vm1329_vm5 = vweird.f32 %v2433_v34  ;;  %vm1338_vm9 = vweird.f32 %v1199_v26 }
 0x21d   : > { %v1163_v44 = vadd.f32 %v1162_v41, %v1161_v30  ;;  %v1165_v19 = vadd.f32 %v1164_v27, %v1073_v46  ;;  %v1324_v15 = vmul.f32 %v2433_v34, %v1323_v59  ;;  %vm1330_vm7 = vmor %vm1328_vm6, %vm1329_vm5 }
 0x21e   : > { %v1437_v0 = vmax.f32 %v1421_v21, 0.0  ;;  %v1321_v62 = vsel %vm1320_vm4, %v2431_v6, %v1317_v49 }
 0x21f   : > { %v1184_v5 = vmul.f32 %v1163_v44, %v2840_v55  ;;  %v1166_v52 = vrot.slane %v1165_v19, 2  ;;  %v1325_v31 = vmul.f32 0.5, %v1324_v15  ;;  %v1373_v50 = vmul.f32 %v3476_v37, %v1321_v62 }
 0x221   : > { %v1167_v47 = vadd.f32 %v1166_v52, %v1165_v19  ;;  %v1326_v48 = vsub.f32 1.5, %v1325_v31  ;;  %v1200_v32 = vadd.f32 1e-05, %v1184_v5  ;;  %v2435_v29 = vpop.eup %2434  ;;  %v1389_v35 = vperm.slane %v1373_v50, 1  ;;  %v3495_v52 = vld [vmem:[#allocation7 + $0x10] sm:$0xff] }
 0x222   : > { %v1333_v60 = vmul.f32 %v2435_v29, %v1199_v26  ;;  %1509 = vmatmul.f32.gmra.mxu2 %v1437_v0  ;;  %vm1339_vm8 = vweird.f32 %v2435_v29 }
 0x223   : > { %v1168_v57 = vrot.slane %v1167_v47, 1  ;;  %v1327_v36 = vmul.f32 %v2433_v34, %v1326_v48  ;;  %2436 = vrsqrt.f32 %v1200_v32  ;;  %v1405_v7 = vmul.f32 %v1389_v35, %v3373_v1  ;;  %vm1340_vm10 = vmor %vm1338_vm9, %vm1339_vm8 }
 0x224   : > { %v1334_v45 = vmul.f32 %v2435_v29, %v1333_v60  ;;  %vm1348_vm12 = vweird.f32 %v1200_v32  ;;  %v2055_v60 = vld [vmem:[#allocation5 + $0x1e8] sm:$0xff] }
 0x225   : > { %v1169_v39 = vadd.f32 %v1168_v57, %v1167_v47  ;;  %v1331_v25 = vsel %vm1330_vm7, %v2433_v34, %v1327_v36  ;;  %v1422_v11 = vadd.f32 %v3217_v33, %v1405_v7  ;;  %v2056_v57 = vld [vmem:[#allocation5 + $0x1f0] sm:$0xff] }
 0x226   : > { %v1374_v51 = vmul.f32 %v3476_v37, %v1331_v25  ;;  %v1335_v12 = vmul.f32 0.5, %v1334_v45  ;;  %v2054_v25 = vld [vmem:[#allocation5 + $0x1e0] sm:$0xff] }
 0x227   : > { %v1185_v9 = vmul.f32 %v1169_v39, %v2840_v55  ;;  %v1438_v10 = vmax.f32 %v1422_v11, 0.0 }
 0x228   : > { %v1390_v38 = vperm.slane %v1374_v51, 1  ;;  %v1336_v18 = vsub.f32 1.5, %v1335_v12  ;;  %v2053_v12 = vld [vmem:[#allocation5 + $0x1d8] sm:$0xff] }
 0x229   : > { %v1201_v53 = vadd.f32 1e-05, %v1185_v9  ;;  %v2437_v6 = vpop.eup %2436 }
 0x22a   : > { %v1406_v16 = vmul.f32 %v1390_v38, %v3405_v54  ;;  %v1337_v58 = vmul.f32 %v2435_v29, %v1336_v18  ;;  %v1343_v1 = vmul.f32 %v2437_v6, %v1200_v32  ;;  %1512 = vmatmul.f32.gmra.mxu2 %v1438_v10  ;;  %vm1349_vm11 = vweird.f32 %v2437_v6  ;;  %v2057_v32 = vld [vmem:[#allocation5 + $0x1f8] sm:$0xff] }
 0x22b   : > { %2438 = vrsqrt.f32 %v1201_v53  ;;  %vm1350_vm13 = vmor %vm1348_vm12, %vm1349_vm11  ;;  %vm1358_vm15 = vweird.f32 %v1201_v53  ;;  %2061 = vmatpush.msra.mxu3 %v2057_v32 }
 0x22c   : > { %v1423_v8 = vadd.f32 %v3217_v33, %v1406_v16  ;;  %v1341_v4 = vsel %vm1340_vm10, %v2435_v29, %v1337_v58  ;;  %v1344_v13 = vmul.f32 %v2437_v6, %v1343_v1  ;;  %v2051_v1 = vld [vmem:[#allocation5 + $0x1c8] sm:$0xff] }
 0x22d   : > { %v1375_v63 = vmul.f32 %v3476_v37, %v1341_v4  ;;  %2062 = vmatpush.msra.mxu3 %v2056_v57  ;;  %v2042_v57 = vld [vmem:[#allocation5 + $0x180] sm:$0xff] }
 0x22e   : > { %v1345_v40 = vmul.f32 0.5, %v1344_v13  ;;  %v1439_v14 = vmax.f32 %v1423_v8, 0.0 }
 0x22f   : > { %v1391_v42 = vperm.slane %v1375_v63, 1  ;;  %2063 = vmatpush.msra.mxu3 %v2055_v60  ;;  %v2050_v63 = vld [vmem:[#allocation5 + $0x1c0] sm:$0xff] }
 0x230   : > { %v1346_v20 = vsub.f32 1.5, %v1345_v40 }
 0x231   : > { %v2439_v17 = vpop.eup %2438  ;;  %v1407_v54 = vmul.f32 %v1391_v42, %v3428_v61  ;;  %2064 = vmatpush.msra.mxu3 %v2054_v25 }
 0x232   : > { %v1353_v28 = vmul.f32 %v2439_v17, %v1201_v53  ;;  %v1347_v30 = vmul.f32 %v2437_v6, %v1346_v20  ;;  %1515 = vmatmul.f32.gmra.mxu2 %v1439_v14  ;;  %vm1359_vm14 = vweird.f32 %v2439_v17  ;;  %v2052_v53 = vld [vmem:[#allocation5 + $0x1d0] sm:$0xff] }
 0x233   : > { %v1424_v46 = vadd.f32 %v3217_v33, %v1407_v54  ;;  %vm1360_vm0 = vmor %vm1358_vm15, %vm1359_vm14  ;;  %2065 = vmatpush.msra.mxu3 %v2053_v12 }
 0x234   : > { %v1354_v23 = vmul.f32 %v2439_v17, %v1353_v28  ;;  %v1351_v26 = vsel %vm1350_vm13, %v2437_v6, %v1347_v30  ;;  %v2048_v30 = vld [vmem:[#allocation5 + $0x1b0] sm:$0xff] }
 0x235   : > { %v1376_v34 = vmul.f32 %v3476_v37, %v1351_v26  ;;  %v1440_v24 = vmax.f32 %v1424_v46, 0.0  ;;  %2066 = vmatpush.msra.mxu3 %v2052_v53 }
 0x236   : > { %v1355_v2 = vmul.f32 0.5, %v1354_v23 }
 0x237   : > { %v1392_v41 = vperm.slane %v1376_v34, 1  ;;  %2067 = vmatpush.msra.mxu3 %v2051_v1  ;;  %v2047_v34 = vld [vmem:[#allocation5 + $0x1a8] sm:$0xff] }
 0x238   : > { %v1356_v27 = vsub.f32 1.5, %v1355_v2 }
 0x239   : > { %v1408_v59 = vmul.f32 %v1392_v41, %v3447_v43  ;;  %v3498_v43 = vperm.slane %v3495_v52, 0  ;;  %2068 = vmatpush.msra.mxu3 %v2050_v63 }
 0x23a   : > { %v1357_v22 = vmul.f32 %v2439_v17, %v1356_v27  ;;  %1518 = vmatmul.f32.gmra.mxu2 %v1440_v24 }
 0x23b   : > { %v1425_v61 = vadd.f32 %v3217_v33, %v1408_v59 }
 0x23c   : > { %v1361_v3 = vsel %vm1360_vm0, %v2439_v17, %v1357_v22  ;;  %v2049_v17 = vld [vmem:[#allocation5 + $0x1b8] sm:$0xff]  ;;  %v2046_v22 = vld [vmem:[#allocation5 + $0x1a0] sm:$0xff] }
 0x23d   : > { %v1377_v44 = vmul.f32 %v3476_v37, %v1361_v3  ;;  %v1441_v15 = vmax.f32 %v1425_v61, 0.0  ;;  %2069 = vmatpush.msra.mxu3 %v2049_v17 }
 0x23f   : > { %v1393_v19 = vperm.slane %v1377_v44, 1  ;;  %2070 = vmatpush.msra.mxu3 %v2048_v30 }
 0x241   : > { %v1409_v21 = vmul.f32 %v1393_v19, %v3465_v56  ;;  %2071 = vmatpush.msra.mxu3 %v2047_v34 }
 0x242   : > { %1521 = vmatmul.f32.gmra.mxu2 %v1441_v15  ;;  %v2045_v15 = vld [vmem:[#allocation5 + $0x198] sm:$0xff] }
 0x243   : > { %v1426_v49 = vadd.f32 %v3217_v33, %v1409_v21  ;;  %2072 = vmatpush.msra.mxu3 %v2046_v22 }
 0x245   : > { %v1442_v5 = vmax.f32 %v1426_v49, 0.0  ;;  %2073 = vmatpush.msra.mxu3 %v2045_v15 }
 0x24a   : > { %1524 = vmatmul.f32.gmra.mxu2 %v1442_v5 }
 0x251   : > { %v1480_v31 = vpop.f32.mrf.mxu2 }
 0x252   : > { %v1481_v0 = vadd.f32 %v1480_v31, %v3498_v43  ;;  %v2044_v31 = vld [vmem:[#allocation5 + $0x190] sm:$0xff] }
 0x253   : > { %2074 = vmatpush.msra.mxu3 %v2044_v31 }
 0x254   : > { %v1528_v62 = vrot.slane %v1481_v0, 4 }
 0x256   : > { %v1529_v47 = vadd.f32 %v1528_v62, %v1481_v0 }
 0x258   : > { %v1530_v37 = vrot.slane %v1529_v47, 2 }
 0x259   : > { %v1483_v50 = vpop.f32.mrf.mxu2 }
 0x25a   : > { %v1531_v48 = vadd.f32 %v1530_v37, %v1529_v47  ;;  %v1484_v56 = vadd.f32 %v1483_v50, %v3498_v43  ;;  %v2043_v50 = vld [vmem:[#allocation5 + $0x188] sm:$0xff] }
 0x25b   : > { %2075 = vmatpush.msra.mxu3 %v2043_v50 }
 0x25c   : > { %v1532_v33 = vrot.slane %v1531_v48, 1  ;;  %v1534_v29 = vrot.slane %v1484_v56, 4 }
 0x25d   : > { %2076 = vmatpush.msra.mxu3 %v2042_v57 }
 0x25e   : > { %v1533_v35 = vadd.f32 %v1532_v33, %v1531_v48  ;;  %v1535_v36 = vadd.f32 %v1534_v29, %v1484_v56 }
 0x260   : > { %v1624_v39 = vmul.f32 %v1533_v35, %v2840_v55  ;;  %v1536_v7 = vrot.slane %v1535_v36, 2 }
 0x261   : > { %v1486_v45 = vpop.f32.mrf.mxu2 }
 0x262   : > { %v3503_v51 = vsub.f32 %v1481_v0, %v1624_v39  ;;  %v1537_v9 = vadd.f32 %v1536_v7, %v1535_v36  ;;  %v1487_v11 = vadd.f32 %v1486_v45, %v3498_v43 }
 0x264   : > { %v1656_v38 = vmul.f32 %v3503_v51, %v3503_v51  ;;  %v1538_v10 = vrot.slane %v1537_v9, 1  ;;  %v1540_v18 = vrot.slane %v1487_v11, 4 }
 0x266   : > { %v1672_v6 = vrot.slane %v1656_v38, 4  ;;  %v1539_v16 = vadd.f32 %v1538_v10, %v1537_v9  ;;  %v1541_v58 = vadd.f32 %v1540_v18, %v1487_v11 }
 0x268   : > { %v1673_v8 = vadd.f32 %v1672_v6, %v1656_v38  ;;  %v1625_v4 = vmul.f32 %v1539_v16, %v2840_v55  ;;  %v1542_v13 = vrot.slane %v1541_v58, 2 }
 0x26a   : > { %v1674_v40 = vrot.slane %v1673_v8, 2  ;;  %v3509_v14 = vsub.f32 %v1484_v56, %v1625_v4  ;;  %v1543_v42 = vadd.f32 %v1542_v13, %v1541_v58 }
 0x26c   : > { %v1675_v20 = vadd.f32 %v1674_v40, %v1673_v8  ;;  %v1657_v54 = vmul.f32 %v3509_v14, %v3509_v14  ;;  %v1544_v28 = vrot.slane %v1543_v42, 1 }
 0x26d   : > { %v1489_v2 = vpop.f32.mrf.mxu2 }
 0x26e   : > { %v1676_v46 = vrot.slane %v1675_v20, 1  ;;  %v1678_v23 = vrot.slane %v1657_v54, 4  ;;  %v1545_v26 = vadd.f32 %v1544_v28, %v1543_v42  ;;  %v1490_v59 = vadd.f32 %v1489_v2, %v3498_v43 }
 0x270   : > { %v1677_v24 = vadd.f32 %v1676_v46, %v1675_v20  ;;  %v1679_v41 = vadd.f32 %v1678_v23, %v1657_v54  ;;  %v1626_v27 = vmul.f32 %v1545_v26, %v2840_v55  ;;  %v1546_v19 = vrot.slane %v1490_v59, 4 }
 0x272   : > { %v1768_v61 = vmul.f32 %v1677_v24, %v2840_v55  ;;  %v1680_v3 = vrot.slane %v1679_v41, 2  ;;  %v3516_v44 = vsub.f32 %v1487_v11, %v1626_v27  ;;  %v1547_v5 = vadd.f32 %v1546_v19, %v1490_v59 }
 0x274   : > { %v1681_v21 = vadd.f32 %v1680_v3, %v1679_v41  ;;  %v1658_v49 = vmul.f32 %v3516_v44, %v3516_v44  ;;  %v1784_v0 = vadd.f32 1e-05, %v1768_v61  ;;  %v1548_v37 = vrot.slane %v1547_v5, 2 }
 0x275   : > { %v1492_v48 = vpop.f32.mrf.mxu2 }
 0x276   : > { %v1682_v62 = vrot.slane %v1681_v21, 1  ;;  %v1684_v47 = vrot.slane %v1658_v49, 4  ;;  %2440 = vrsqrt.f32 %v1784_v0  ;;  %v1549_v33 = vadd.f32 %v1548_v37, %v1547_v5 }
 0x277   : > { %v1493_v29 = vadd.f32 %v1492_v48, %v3498_v43  ;;  %vm1806_vm2 = vweird.f32 %v1784_v0 }
 0x278   : > { %v1683_v56 = vadd.f32 %v1682_v62, %v1681_v21  ;;  %v1685_v32 = vadd.f32 %v1684_v47, %v1658_v49  ;;  %v1550_v60 = vrot.slane %v1549_v33, 1  ;;  %v3543_v47 = vperm.slane %v3495_v52, 2 }
 0x279   : > { %v1552_v39 = vrot.slane %v1493_v29, 4 }
 0x27a   : > { %v1769_v35 = vmul.f32 %v1683_v56, %v2840_v55  ;;  %v1686_v36 = vrot.slane %v1685_v32, 2  ;;  %v1551_v45 = vadd.f32 %v1550_v60, %v1549_v33 }
 0x27b   : > { %v1553_v9 = vadd.f32 %v1552_v39, %v1493_v29 }
 0x27c   : > { %v2441_v7 = vpop.eup %2440  ;;  %v1687_v25 = vadd.f32 %v1686_v36, %v1685_v32  ;;  %v1785_v11 = vadd.f32 1e-05, %v1769_v35  ;;  %v1627_v10 = vmul.f32 %v1551_v45, %v2840_v55 }
 0x27d   : > { %v1801_v12 = vmul.f32 %v2441_v7, %v1784_v0  ;;  %v1554_v18 = vrot.slane %v1553_v9, 2  ;;  %v1495_v53 = vpop.f32.mrf.mxu2  ;;  %vm1807_vm1 = vweird.f32 %v2441_v7 }
 0x27e   : > { %v1688_v38 = vrot.slane %v1687_v25, 1  ;;  %2442 = vrsqrt.f32 %v1785_v11  ;;  %v3523_v58 = vsub.f32 %v1490_v59, %v1627_v10  ;;  %v1496_v8 = vadd.f32 %v1495_v53, %v3498_v43  ;;  %vm1808_vm3 = vmor %vm1806_vm2, %vm1807_vm1 }
 0x27f   : > { %v1802_v6 = vmul.f32 %v2441_v7, %v1801_v12  ;;  %v1555_v1 = vadd.f32 %v1554_v18, %v1553_v9  ;;  %vm1816_vm5 = vweird.f32 %v1785_v11 }
 0x280   : > { %v1689_v16 = vadd.f32 %v1688_v38, %v1687_v25  ;;  %v1659_v63 = vmul.f32 %v3523_v58, %v3523_v58  ;;  %v1558_v42 = vrot.slane %v1496_v8, 4 }
 0x281   : > { %v1803_v4 = vmul.f32 0.5, %v1802_v6  ;;  %v1556_v40 = vrot.slane %v1555_v1, 1 }
 0x282   : > { %v1770_v13 = vmul.f32 %v1689_v16, %v2840_v55  ;;  %v1690_v54 = vrot.slane %v1659_v63, 4  ;;  %v1559_v30 = vadd.f32 %v1558_v42, %v1496_v8 }
 0x283   : > { %v1804_v17 = vsub.f32 1.5, %v1803_v4  ;;  %v1557_v28 = vadd.f32 %v1556_v40, %v1555_v1 }
 0x284   : > { %v2443_v20 = vpop.eup %2442  ;;  %v3529_v46 = vadd.f32 1e-05, %v1770_v13  ;;  %v1691_v34 = vadd.f32 %v1690_v54, %v1659_v63  ;;  %v1560_v24 = vrot.slane %v1559_v30, 2 }
 0x285   : > { %v1805_v23 = vmul.f32 %v2441_v7, %v1804_v17  ;;  %v1811_v26 = vmul.f32 %v2443_v20, %v1785_v11  ;;  %v1628_v2 = vmul.f32 %v1557_v28, %v2840_v55  ;;  %v1498_v41 = vpop.f32.mrf.mxu2  ;;  %vm1817_vm4 = vweird.f32 %v2443_v20 }
 0x286   : > { %2444 = vrsqrt.f32 %v3529_v46  ;;  %v1692_v22 = vrot.slane %v1691_v34, 2  ;;  %v1561_v3 = vadd.f32 %v1560_v24, %v1559_v30  ;;  %v3536_v19 = vadd.f32 %v1498_v41, %v3498_v43  ;;  %vm1818_vm6 = vmor %vm1816_vm5, %vm1817_vm4 }
 0x287   : > { %v1809_v27 = vsel %vm1808_vm3, %v2441_v7, %v1805_v23  ;;  %v1812_v59 = vmul.f32 %v2443_v20, %v1811_v26  ;;  %v3533_v61 = vsub.f32 %v1493_v29, %v1628_v2  ;;  %vm1826_vm8 = vweird.f32 %v3529_v46 }
 0x288   : > { %v1960_v15 = vmul.f32 %v1809_v27, %v3495_v52  ;;  %v1693_v49 = vadd.f32 %v1692_v22, %v1691_v34  ;;  %v1562_v31 = vrot.slane %v1561_v3, 1  ;;  %v1564_v0 = vrot.slane %v3536_v19, 4 }
 0x289   : > { %v1813_v21 = vmul.f32 0.5, %v1812_v59  ;;  %v1660_v5 = vmul.f32 %v3533_v61, %v3533_v61 }
 0x28a   : > { %v1976_v62 = vperm.slane %v1960_v15, 1  ;;  %v1694_v48 = vrot.slane %v1693_v49, 1  ;;  %v1563_v32 = vadd.f32 %v1562_v31, %v1561_v3  ;;  %v1565_v33 = vadd.f32 %v1564_v0, %v3536_v19 }
 0x28b   : > { %v1814_v37 = vsub.f32 1.5, %v1813_v21  ;;  %v1696_v56 = vrot.slane %v1660_v5, 4 }
 0x28c   : > { %v2445_v50 = vpop.eup %2444  ;;  %v1992_v29 = vmul.f32 %v1976_v62, %v3503_v51  ;;  %v1695_v36 = vadd.f32 %v1694_v48, %v1693_v49  ;;  %v1629_v39 = vmul.f32 %v1563_v32, %v2840_v55  ;;  %v1566_v7 = vrot.slane %v1565_v33, 2 }
 0x28d   : > { %v1815_v57 = vmul.f32 %v2443_v20, %v1814_v37  ;;  %v1821_v35 = vmul.f32 %v2445_v50, %v3529_v46  ;;  %v1697_v60 = vadd.f32 %v1696_v56, %v1660_v5  ;;  %v1501_v25 = vpop.f32.mrf.mxu2  ;;  %vm1827_vm7 = vweird.f32 %v2445_v50 }
 0x28e   : > { %v2009_v45 = vadd.f32 %v3543_v47, %v1992_v29  ;;  %v1771_v38 = vmul.f32 %v1695_v36, %v2840_v55  ;;  %v3551_v18 = vsub.f32 %v1496_v8, %v1629_v39  ;;  %v1567_v51 = vadd.f32 %v1566_v7, %v1565_v33  ;;  %vm1828_vm9 = vmor %vm1826_vm8, %vm1827_vm7 }
 0x28f   : > { %v1819_v9 = vsel %vm1818_vm6, %v2443_v20, %v1815_v57  ;;  %v1822_v12 = vmul.f32 %v2445_v50, %v1821_v35  ;;  %v1698_v10 = vrot.slane %v1697_v60, 2  ;;  %v3554_v11 = vadd.f32 %v1501_v25, %v3498_v43 }
 0x290   : > { %v2025_v53 = vmax.f32 %v2009_v45, 0.0  ;;  %v1961_v6 = vmul.f32 %v1819_v9, %v3495_v52  ;;  %v1661_v4 = vmul.f32 %v3551_v18, %v3551_v18  ;;  %v1568_v13 = vrot.slane %v1567_v51, 1 }
 0x291   : > { %v1823_v16 = vmul.f32 0.5, %v1822_v12  ;;  %v1699_v1 = vadd.f32 %v1698_v10, %v1697_v60  ;;  %v3559_v63 = vadd.f32 1e-05, %v1771_v38  ;;  %v1570_v40 = vrot.slane %v3554_v11, 4 }
 0x292   : > { %2077 = vmatmul.f32.vlgmr.msra.gmra.mxu3 %v2025_v53  ;;  %v1977_v8 = vperm.slane %v1961_v6, 1  ;;  %v1702_v20 = vrot.slane %v1661_v4, 4  ;;  %v1569_v54 = vadd.f32 %v1568_v13, %v1567_v51 }
 0x293   : > { %v1824_v42 = vsub.f32 1.5, %v1823_v16  ;;  %v1700_v17 = vrot.slane %v1699_v1, 1  ;;  %2446 = vrsqrt.f32 %v3559_v63  ;;  %v1571_v28 = vadd.f32 %v1570_v40, %v3554_v11 }
 0x294   : > { %v1993_v30 = vmul.f32 %v1977_v8, %v3509_v14  ;;  %v1703_v34 = vadd.f32 %v1702_v20, %v1661_v4  ;;  %v1630_v2 = vmul.f32 %v1569_v54, %v2840_v55  ;;  %vm1836_vm11 = vweird.f32 %v3559_v63 }
 0x295   : > { %v1825_v23 = vmul.f32 %v2445_v50, %v1824_v42  ;;  %v1701_v26 = vadd.f32 %v1700_v17, %v1699_v1  ;;  %v1572_v24 = vrot.slane %v1571_v28, 2  ;;  %v1504_v41 = vpop.f32.mrf.mxu2 }
 0x296   : > { %v2010_v27 = vadd.f32 %v3543_v47, %v1993_v30  ;;  %v1704_v3 = vrot.slane %v1703_v34, 2  ;;  %v3570_v15 = vsub.f32 %v3536_v19, %v1630_v2  ;;  %v1505_v14 = vadd.f32 %v1504_v41, %v3498_v43 }
 0x297   : > { %v1829_v59 = vsel %vm1828_vm9, %v2445_v50, %v1825_v23  ;;  %v1772_v22 = vmul.f32 %v1701_v26, %v2840_v55  ;;  %v1573_v21 = vadd.f32 %v1572_v24, %v1571_v28 }
 0x298   : > { %v2026_v46 = vmax.f32 %v2010_v27, 0.0  ;;  %v1962_v49 = vmul.f32 %v1829_v59, %v3495_v52  ;;  %v1705_v31 = vadd.f32 %v1704_v3, %v1703_v34  ;;  %v1662_v0 = vmul.f32 %v3570_v15, %v3570_v15 }
 0x299   : > { %v2447_v5 = vpop.eup %2446  ;;  %v1576_v62 = vrot.slane %v1505_v14, 4  ;;  %v3576_v37 = vadd.f32 1e-05, %v1772_v22  ;;  %v1574_v50 = vrot.slane %v1573_v21, 1 }
 0x29a   : > { %2080 = vmatmul.f32.gmra.mxu3 %v2026_v46  ;;  %v1978_v48 = vperm.slane %v1962_v49, 1  ;;  %v1831_v19 = vmul.f32 %v2447_v5, %v3559_v63  ;;  %v1706_v56 = vrot.slane %v1705_v31, 1  ;;  %v1708_v32 = vrot.slane %v1662_v0, 4 }
 0x29b   : > { %v1577_v33 = vadd.f32 %v1576_v62, %v1505_v14  ;;  %2448 = vrsqrt.f32 %v3576_v37  ;;  %v1575_v29 = vadd.f32 %v1574_v50, %v1573_v21  ;;  %vm1837_vm10 = vweird.f32 %v2447_v5 }
 0x29c   : > { %v1994_v57 = vmul.f32 %v1978_v48, %v3516_v44  ;;  %v1832_v35 = vmul.f32 %v2447_v5, %v1831_v19  ;;  %v1707_v36 = vadd.f32 %v1706_v56, %v1705_v31  ;;  %v1709_v60 = vadd.f32 %v1708_v32, %v1662_v0  ;;  %vm1838_vm12 = vmor %vm1836_vm11, %vm1837_vm10 }
 0x29d   : > { %v1578_v39 = vrot.slane %v1577_v33, 2  ;;  %v1631_v7 = vmul.f32 %v1575_v29, %v2840_v55  ;;  %v1507_v25 = vpop.f32.mrf.mxu2  ;;  %vm1846_vm13 = vweird.f32 %v3576_v37 }
 0x29e   : > { %v2011_v45 = vadd.f32 %v3543_v47, %v1994_v57  ;;  %v1833_v9 = vmul.f32 0.5, %v1832_v35  ;;  %v1773_v12 = vmul.f32 %v1707_v36, %v2840_v55  ;;  %v1710_v38 = vrot.slane %v1709_v60, 2 }
 0x29f   : > { %v1579_v10 = vadd.f32 %v1578_v39, %v1577_v33  ;;  %v3585_v51 = vadd.f32 %v1507_v25, %v3498_v43  ;;  %v3588_v53 = vsub.f32 %v3554_v11, %v1631_v7 }
 0x2a0   : > { %v2027_v44 = vmax.f32 %v2011_v45, 0.0  ;;  %v1834_v6 = vsub.f32 1.5, %v1833_v9  ;;  %v1711_v1 = vadd.f32 %v1710_v38, %v1709_v60  ;;  %v3591_v40 = vadd.f32 1e-05, %v1773_v12 }
 0x2a1   : > { %v2449_v16 = vpop.eup %2448  ;;  %v1580_v4 = vrot.slane %v1579_v10, 1  ;;  %v1582_v13 = vrot.slane %v3585_v51, 4  ;;  %v1663_v8 = vmul.f32 %v3588_v53, %v3588_v53 }
 0x2a2   : > { %2083 = vmatmul.f32.gmra.mxu3 %v2027_v44  ;;  %v1835_v42 = vmul.f32 %v2447_v5, %v1834_v6  ;;  %v1841_v11 = vmul.f32 %v2449_v16, %v3576_v37  ;;  %v1712_v17 = vrot.slane %v1711_v1, 1  ;;  %2450 = vrsqrt.f32 %v3591_v40 }
 0x2a3   : > { %v1581_v20 = vadd.f32 %v1580_v4, %v1579_v10  ;;  %v1583_v54 = vadd.f32 %v1582_v13, %v3585_v51  ;;  %v1714_v28 = vrot.slane %v1663_v8, 4  ;;  %vm1847_vm14 = vweird.f32 %v2449_v16 }
 0x2a4   : > { %v1839_v30 = vsel %vm1838_vm12, %v2447_v5, %v1835_v42  ;;  %v1842_v23 = vmul.f32 %v2449_v16, %v1841_v11  ;;  %v1713_v26 = vadd.f32 %v1712_v17, %v1711_v1  ;;  %vm1848_vm15 = vmor %vm1846_vm13, %vm1847_vm14  ;;  %vm1856_vm1 = vweird.f32 %v3591_v40 }
 0x2a5   : > { %v1632_v34 = vmul.f32 %v1581_v20, %v2840_v55  ;;  %v1584_v2 = vrot.slane %v1583_v54, 2  ;;  %v1963_v24 = vmul.f32 %v1839_v30, %v3495_v52  ;;  %v1715_v41 = vadd.f32 %v1714_v28, %v1663_v8  ;;  %v1510_v63 = vpop.f32.mrf.mxu2 }
 0x2a6   : > { %v1843_v27 = vmul.f32 0.5, %v1842_v23  ;;  %v1774_v59 = vmul.f32 %v1713_v26, %v2840_v55  ;;  %v3606_v21 = vadd.f32 %v1510_v63, %v3498_v43 }
 0x2a7   : > { %v3603_v22 = vsub.f32 %v1505_v14, %v1632_v34  ;;  %v1585_v3 = vadd.f32 %v1584_v2, %v1583_v54  ;;  %v1716_v46 = vrot.slane %v1715_v41, 2  ;;  %v1979_v49 = vperm.slane %v1963_v24, 1 }
 0x2a8   : > { %v1844_v5 = vsub.f32 1.5, %v1843_v27  ;;  %v2451_v31 = vpop.eup %2450  ;;  %v1588_v50 = vrot.slane %v3606_v21, 4  ;;  %v3611_v48 = vadd.f32 1e-05, %v1774_v59 }
 0x2a9   : > { %v1664_v0 = vmul.f32 %v3603_v22, %v3603_v22  ;;  %v1586_v62 = vrot.slane %v1585_v3, 1  ;;  %v1717_v19 = vadd.f32 %v1716_v46, %v1715_v41  ;;  %v1995_v14 = vmul.f32 %v1979_v49, %v3523_v58 }
 0x2aa   : > { %v1845_v56 = vmul.f32 %v2449_v16, %v1844_v5  ;;  %v1851_v32 = vmul.f32 %v2451_v31, %v3591_v40  ;;  %v1589_v57 = vadd.f32 %v1588_v50, %v3606_v21  ;;  %2452 = vrsqrt.f32 %v3611_v48 }
 0x2ab   : > { %v1720_v33 = vrot.slane %v1664_v0, 4  ;;  %v1587_v29 = vadd.f32 %v1586_v62, %v1585_v3  ;;  %v1718_v35 = vrot.slane %v1717_v19, 1  ;;  %v2012_v36 = vadd.f32 %v3543_v47, %v1995_v14 }
 0x2ac   : > { %v1849_v60 = vsel %vm1848_vm15, %v2449_v16, %v1845_v56  ;;  %v1852_v39 = vmul.f32 %v2451_v31, %v1851_v32  ;;  %v1590_v45 = vrot.slane %v1589_v57, 2  ;;  %vm1857_vm0 = vweird.f32 %v2451_v31 }
 0x2ad   : > { %v1721_v7 = vadd.f32 %v1720_v33, %v1664_v0  ;;  %v1633_v25 = vmul.f32 %v1587_v29, %v2840_v55  ;;  %v1964_v58 = vmul.f32 %v1849_v60, %v3495_v52  ;;  %v1719_v9 = vadd.f32 %v1718_v35, %v1717_v19  ;;  %v1513_v12 = vpop.f32.mrf.mxu2  ;;  %vm1858_vm2 = vmor %vm1856_vm1, %vm1857_vm0 }
 0x2ae   : > { %v2028_v38 = vmax.f32 %v2012_v36, 0.0  ;;  %v1853_v10 = vmul.f32 0.5, %v1852_v39  ;;  %v1591_v6 = vadd.f32 %v1590_v45, %v1589_v57  ;;  %v3626_v16 = vadd.f32 %v1513_v12, %v3498_v43 }
 0x2af   : > { %v1722_v44 = vrot.slane %v1721_v7, 2  ;;  %v3623_v37 = vsub.f32 %v3585_v51, %v1633_v25  ;;  %v1775_v1 = vmul.f32 %v1719_v9, %v2840_v55  ;;  %v1980_v4 = vperm.slane %v1964_v58, 1 }
 0x2b0   : > { %2086 = vmatmul.f32.gmra.mxu3 %v2028_v38  ;;  %v1854_v13 = vsub.f32 1.5, %v1853_v10  ;;  %v1592_v11 = vrot.slane %v1591_v6, 1  ;;  %v1594_v17 = vrot.slane %v3626_v16, 4  ;;  %v2453_v34 = vpop.eup %2452  ;;  %vm1866_vm3 = vweird.f32 %v3611_v48 }
 0x2b1   : > { %v1723_v8 = vadd.f32 %v1722_v44, %v1721_v7  ;;  %v1665_v42 = vmul.f32 %v3623_v37, %v3623_v37  ;;  %v1996_v51 = vmul.f32 %v1980_v4, %v3533_v61  ;;  %v3634_v54 = vadd.f32 1e-05, %v1775_v1 }
 0x2b2   : > { %v1855_v20 = vmul.f32 %v2451_v31, %v1854_v13  ;;  %v1593_v23 = vadd.f32 %v1592_v11, %v1591_v6  ;;  %v1595_v26 = vadd.f32 %v1594_v17, %v3626_v16  ;;  %v1861_v46 = vmul.f32 %v2453_v34, %v3611_v48 }
 0x2b3   : > { %v1724_v28 = vrot.slane %v1723_v8, 1  ;;  %v1726_v30 = vrot.slane %v1665_v42, 4  ;;  %v2013_v2 = vadd.f32 %v3543_v47, %v1996_v51  ;;  %2454 = vrsqrt.f32 %v3634_v54 }
 0x2b4   : > { %v1859_v24 = vsel %vm1858_vm2, %v2451_v31, %v1855_v20  ;;  %v1634_v61 = vmul.f32 %v1593_v23, %v2840_v55  ;;  %v1596_v27 = vrot.slane %v1595_v26, 2  ;;  %v1862_v19 = vmul.f32 %v2453_v34, %v1861_v46 }
 0x2b5   : > { %v1725_v41 = vadd.f32 %v1724_v28, %v1723_v8  ;;  %v1727_v63 = vadd.f32 %v1726_v30, %v1665_v42  ;;  %v1516_v40 = vpop.f32.mrf.mxu2  ;;  %v2029_v59 = vmax.f32 %v2013_v2, 0.0  ;;  %v1965_v3 = vmul.f32 %v1859_v24, %v3495_v52 }
 0x2b6   : > { %v3644_v0 = vsub.f32 %v3606_v21, %v1634_v61  ;;  %v1597_v31 = vadd.f32 %v1596_v27, %v1595_v26  ;;  %v3647_v62 = vadd.f32 %v1516_v40, %v3498_v43  ;;  %v1863_v57 = vmul.f32 0.5, %v1862_v19 }
 0x2b7   : > { %v1776_v49 = vmul.f32 %v1725_v41, %v2840_v55  ;;  %v1728_v5 = vrot.slane %v1727_v63, 2  ;;  %v1981_v50 = vperm.slane %v1965_v3, 1  ;;  %vm1867_vm4 = vweird.f32 %v2453_v34 }
 0x2b8   : > { %2089 = vmatmul.f32.gmra.mxu3 %v2029_v59  ;;  %v1666_v56 = vmul.f32 %v3644_v0, %v3644_v0  ;;  %v1598_v32 = vrot.slane %v1597_v31, 1  ;;  %v1600_v29 = vrot.slane %v3647_v62, 4  ;;  %v1864_v58 = vsub.f32 1.5, %v1863_v57  ;;  %vm1868_vm5 = vmor %vm1866_vm3, %vm1867_vm4 }
 0x2b9   : > { %v1729_v14 = vadd.f32 %v1728_v5, %v1727_v63  ;;  %v3652_v33 = vpop.eup %2454  ;;  %v1997_v21 = vmul.f32 %v1981_v50, %v3551_v18  ;;  %v3656_v35 = vadd.f32 1e-05, %v1776_v49  ;;  %vm1876_vm7 = vweird.f32 %v3634_v54 }
 0x2ba   : > { %v1732_v60 = vrot.slane %v1666_v56, 4  ;;  %v1599_v39 = vadd.f32 %v1598_v32, %v1597_v31  ;;  %v1871_v7 = vmul.f32 %v3652_v33, %v3634_v54  ;;  %v1601_v25 = vadd.f32 %v1600_v29, %v3647_v62 }
 0x2bb   : > { %v1730_v36 = vrot.slane %v1729_v14, 1  ;;  %v2014_v45 = vadd.f32 %v3543_v47, %v1997_v21  ;;  %v1865_v1 = vmul.f32 %v2453_v34, %v1864_v58  ;;  %2456 = vrsqrt.f32 %v3656_v35 }
 0x2bc   : > { %v1733_v12 = vadd.f32 %v1732_v60, %v1666_v56  ;;  %v1635_v38 = vmul.f32 %v1599_v39, %v2840_v55  ;;  %v1872_v18 = vmul.f32 %v3652_v33, %v1871_v7  ;;  %v1602_v10 = vrot.slane %v1601_v25, 2 }
 0x2bd   : > { %v1731_v9 = vadd.f32 %v1730_v36, %v1729_v14  ;;  %v1519_v44 = vpop.f32.mrf.mxu2  ;;  %v2030_v6 = vmax.f32 %v2014_v45, 0.0  ;;  %v1869_v17 = vsel %vm1868_vm5, %v2453_v34, %v1865_v1  ;;  %vm1877_vm6 = vweird.f32 %v3652_v33 }
 0x2be   : > { %v1734_v13 = vrot.slane %v1733_v12, 2  ;;  %v3667_v8 = vsub.f32 %v3626_v16, %v1635_v38  ;;  %v3670_v42 = vadd.f32 %v1519_v44, %v3498_v43  ;;  %v1603_v11 = vadd.f32 %v1602_v10, %v1601_v25  ;;  %vm1878_vm8 = vmor %vm1876_vm7, %vm1877_vm6 }
 0x2bf   : > { %v1777_v4 = vmul.f32 %v1731_v9, %v2840_v55  ;;  %v1873_v51 = vmul.f32 0.5, %v1872_v18  ;;  %v1966_v23 = vmul.f32 %v1869_v17, %v3495_v52  ;;  %vm1886_vm9 = vweird.f32 %v3656_v35 }
 0x2c0   : > { %2092 = vmatmul.f32.gmra.mxu3 %v2030_v6  ;;  %v1735_v20 = vadd.f32 %v1734_v13, %v1733_v12  ;;  %v1667_v28 = vmul.f32 %v3667_v8, %v3667_v8  ;;  %v1606_v30 = vrot.slane %v3670_v42, 4  ;;  %v1604_v16 = vrot.slane %v1603_v11, 1 }
 0x2c1   : > { %v1874_v26 = vsub.f32 1.5, %v1873_v51  ;;  %v3679_v2 = vadd.f32 1e-05, %v1777_v4  ;;  %v1982_v34 = vperm.slane %v1966_v23, 1  ;;  %v3682_v63 = vpop.eup %2456 }
 0x2c2   : > { %v1736_v48 = vrot.slane %v1735_v20, 1  ;;  %v1738_v24 = vrot.slane %v1667_v28, 4  ;;  %v1607_v41 = vadd.f32 %v1606_v30, %v3670_v42  ;;  %v1605_v61 = vadd.f32 %v1604_v16, %v1603_v11 }
 0x2c3   : > { %v1875_v27 = vmul.f32 %v3652_v33, %v1874_v26  ;;  %2458 = vrsqrt.f32 %v3679_v2  ;;  %v1998_v46 = vmul.f32 %v1982_v34, %v3570_v15  ;;  %v1881_v50 = vmul.f32 %v3682_v63, %v3656_v35 }
 0x2c4   : > { %v1737_v40 = vadd.f32 %v1736_v48, %v1735_v20  ;;  %v1739_v59 = vadd.f32 %v1738_v24, %v1667_v28  ;;  %v1608_v3 = vrot.slane %v1607_v41, 2  ;;  %v1636_v49 = vmul.f32 %v1605_v61, %v2840_v55 }
 0x2c5   : > { %v1522_v5 = vpop.f32.mrf.mxu2  ;;  %v1879_v31 = vsel %vm1878_vm8, %v3652_v33, %v1875_v27  ;;  %v2015_v32 = vadd.f32 %v3543_v47, %v1998_v46  ;;  %v1882_v33 = vmul.f32 %v3682_v63, %v1881_v50  ;;  %vm1887_vm10 = vweird.f32 %v3682_v63 }
 0x2c6   : > { %v1778_v54 = vmul.f32 %v1737_v40, %v2840_v55  ;;  %v1740_v19 = vrot.slane %v1739_v59, 2  ;;  %v1609_v14 = vadd.f32 %v1608_v3, %v1607_v41  ;;  %v3697_v56 = vadd.f32 %v1522_v5, %v3498_v43  ;;  %vm1888_vm11 = vmor %vm1886_vm9, %vm1887_vm10 }
 0x2c7   : > { %v3700_v15 = vsub.f32 %v3647_v62, %v1636_v49  ;;  %v1967_v29 = vmul.f32 %v1879_v31, %v3495_v52  ;;  %v2031_v25 = vmax.f32 %v2015_v32, 0.0  ;;  %v1883_v45 = vmul.f32 0.5, %v1882_v33 }
 0x2c8   : > { %v1741_v21 = vadd.f32 %v1740_v19, %v1739_v59  ;;  %v1610_v57 = vrot.slane %v1609_v14, 1  ;;  %v1612_v36 = vrot.slane %v3697_v56, 4  ;;  %v3706_v60 = vadd.f32 1e-05, %v1778_v54 }
 0x2c9   : > { %v3708_v39 = vpop.eup %2458  ;;  %v1668_v7 = vmul.f32 %v3700_v15, %v3700_v15  ;;  %v1983_v62 = vperm.slane %v1967_v29, 1  ;;  %2095 = vmatmul.f32.gmra.mxu3 %v2031_v25  ;;  %v1884_v44 = vsub.f32 1.5, %v1883_v45  ;;  %vm1896_vm13 = vweird.f32 %v3679_v2 }
 0x2ca   : > { %v1742_v58 = vrot.slane %v1741_v21, 1  ;;  %v1611_v9 = vadd.f32 %v1610_v57, %v1609_v14  ;;  %v1613_v12 = vadd.f32 %v1612_v36, %v3697_v56  ;;  %v1891_v38 = vmul.f32 %v3708_v39, %v3679_v2 }
 0x2cb   : > { %v1744_v18 = vrot.slane %v1668_v7, 4  ;;  %v1999_v10 = vmul.f32 %v1983_v62, %v3588_v53  ;;  %v1885_v20 = vmul.f32 %v3682_v63, %v1884_v44  ;;  %2460 = vrsqrt.f32 %v3706_v60 }
 0x2cc   : > { %v1743_v6 = vadd.f32 %v1742_v58, %v1741_v21  ;;  %v1637_v1 = vmul.f32 %v1611_v9, %v2840_v55  ;;  %v1614_v4 = vrot.slane %v1613_v12, 2  ;;  %v1892_v13 = vmul.f32 %v3708_v39, %v1891_v38 }
 0x2cd   : > { %v1745_v11 = vadd.f32 %v1744_v18, %v1668_v7  ;;  %v1525_v17 = vpop.f32.mrf.mxu2  ;;  %v2016_v51 = vadd.f32 %v3543_v47, %v1999_v10  ;;  %v1889_v48 = vsel %vm1888_vm11, %v3682_v63, %v1885_v20  ;;  %vm1897_vm12 = vweird.f32 %v3708_v39 }
 0x2ce   : > { %v1779_v28 = vmul.f32 %v1743_v6, %v2840_v55  ;;  %v3724_v53 = vsub.f32 %v3670_v42, %v1637_v1  ;;  %v1615_v30 = vadd.f32 %v1614_v4, %v1613_v12  ;;  %v3727_v23 = vadd.f32 %v1525_v17, %v3498_v43  ;;  %vm1898_vm14 = vmor %vm1896_vm13, %vm1897_vm12 }
 0x2cf   : > { %v1746_v16 = vrot.slane %v1745_v11, 2  ;;  %v2032_v26 = vmax.f32 %v2016_v51, 0.0  ;;  %v1893_v24 = vmul.f32 0.5, %v1892_v13  ;;  %v1968_v42 = vmul.f32 %v1889_v48, %v3495_v52 }
 0x2d0   : > { %v1669_v41 = vmul.f32 %v3724_v53, %v3724_v53  ;;  %v1616_v34 = vrot.slane %v1615_v30, 1  ;;  %v1618_v61 = vrot.slane %v3727_v23, 4  ;;  %v3737_v43 = vadd.f32 1e-05, %v1779_v28 }
 0x2d1   : > { %v1747_v27 = vadd.f32 %v1746_v16, %v1745_v11  ;;  %v1894_v40 = vsub.f32 1.5, %v1893_v24  ;;  %v1984_v63 = vperm.slane %v1968_v42, 1  ;;  %v2461_v46 = vpop.eup %2460  ;;  %2098 = vmatmul.f32.gmra.mxu3 %v2032_v26  ;;  %vm1906_vm0 = vweird.f32 %v3706_v60 }
 0x2d2   : > { %v1750_v35 = vrot.slane %v1669_v41, 4  ;;  %v1617_v59 = vadd.f32 %v1616_v34, %v1615_v30  ;;  %v1619_v3 = vadd.f32 %v1618_v61, %v3727_v23  ;;  %2462 = vrsqrt.f32 %v3737_v43 }
 0x2d3   : > { %v1748_v49 = vrot.slane %v1747_v27, 1  ;;  %v1895_v5 = vmul.f32 %v3708_v39, %v1894_v40  ;;  %v2000_v19 = vmul.f32 %v1984_v63, %v3603_v22  ;;  %v1901_v29 = vmul.f32 %v2461_v46, %v3706_v60 }
 0x2d4   : > { %v1751_v31 = vadd.f32 %v1750_v35, %v1669_v41  ;;  %v1638_v50 = vmul.f32 %v1617_v59, %v2840_v55  ;;  %v1620_v54 = vrot.slane %v1619_v3, 2  ;;  %vm1907_vm15 = vweird.f32 %v2461_v46  ;;  %v3771_v41 = vld [vmem:[#allocation7 + $0x10] sm:$0xff] }
 0x2d5   : > { %v1749_v14 = vadd.f32 %v1748_v49, %v1747_v27  ;;  %v1899_v32 = vsel %vm1898_vm14, %v3708_v39, %v1895_v5  ;;  %v2017_v57 = vadd.f32 %v3543_v47, %v2000_v19  ;;  %v1902_v22 = vmul.f32 %v2461_v46, %v1901_v29  ;;  %vm1908_vm1 = vmor %vm1906_vm0, %vm1907_vm15 }
 0x2d6   : > { %v1752_v33 = vrot.slane %v1751_v31, 2  ;;  %v3750_v21 = vsub.f32 %v3697_v56, %v1638_v50  ;;  %v1621_v2 = vadd.f32 %v1620_v54, %v1619_v3  ;;  %v1969_v7 = vmul.f32 %v1899_v32, %v3495_v52 }
 0x2d7   : > { %v1780_v36 = vmul.f32 %v1749_v14, %v2840_v55  ;;  %v2033_v39 = vmax.f32 %v2017_v57, 0.0  ;;  %v1903_v12 = vmul.f32 0.5, %v1902_v22  ;;  %vm1916_vm3 = vweird.f32 %v3737_v43 }
 0x2d8   : > { %v1753_v25 = vadd.f32 %v1752_v33, %v1751_v31  ;;  %v1670_v62 = vmul.f32 %v3750_v21, %v3750_v21  ;;  %v1622_v45 = vrot.slane %v1621_v2, 1  ;;  %v2463_v58 = vpop.eup %2462  ;;  %v1985_v9 = vperm.slane %v1969_v7, 1 }
 0x2d9   : > { %v3757_v38 = vadd.f32 1e-05, %v1780_v36  ;;  %v1911_v44 = vmul.f32 %v2463_v58, %v3737_v43  ;;  %2101 = vmatmul.f32.gmra.mxu3 %v2033_v39  ;;  %v1904_v6 = vsub.f32 1.5, %v1903_v12  ;;  %vm1917_vm2 = vweird.f32 %v2463_v58 }
 0x2da   : > { %v1754_v56 = vrot.slane %v1753_v25, 1  ;;  %v1756_v18 = vrot.slane %v1670_v62, 4  ;;  %v1623_v10 = vadd.f32 %v1622_v45, %v1621_v2  ;;  %v2001_v52 = vmul.f32 %v1985_v9, %v3623_v37  ;;  %vm1918_vm4 = vmor %vm1916_vm3, %vm1917_vm2 }
 0x2db   : > { %2464 = vrsqrt.f32 %v3757_v38  ;;  %v1912_v11 = vmul.f32 %v2463_v58, %v1911_v44  ;;  %v1905_v51 = vmul.f32 %v2461_v46, %v1904_v6  ;;  %vm1926_vm6 = vweird.f32 %v3757_v38 }
 0x2dc   : > { %v1755_v1 = vadd.f32 %v1754_v56, %v1753_v25  ;;  %v1757_v4 = vadd.f32 %v1756_v18, %v1670_v62  ;;  %v1639_v13 = vmul.f32 %v1623_v10, %v2840_v55  ;;  %v2018_v17 = vadd.f32 %v3543_v47, %v2001_v52 }
 0x2dd   : > { %v1913_v37 = vmul.f32 0.5, %v1912_v11  ;;  %v1909_v26 = vsel %vm1908_vm1, %v2461_v46, %v1905_v51 }
 0x2de   : > { %v1781_v20 = vmul.f32 %v1755_v1, %v2840_v55  ;;  %v1758_v28 = vrot.slane %v1757_v4, 2  ;;  %v3767_v30 = vsub.f32 %v3727_v23, %v1639_v13  ;;  %v2034_v16 = vmax.f32 %v2018_v17, 0.0 }
 0x2df   : > { %v1970_v34 = vmul.f32 %v3771_v41, %v1909_v26  ;;  %v1914_v60 = vsub.f32 1.5, %v1913_v37 }
 0x2e0   : > { %v1759_v48 = vadd.f32 %v1758_v28, %v1757_v4  ;;  %v1671_v24 = vmul.f32 %v3767_v30, %v3767_v30  ;;  %v1797_v42 = vadd.f32 1e-05, %v1781_v20 }
 0x2e1   : > { %v2465_v61 = vpop.eup %2464  ;;  %v1986_v40 = vperm.slane %v1970_v34, 1  ;;  %v1915_v35 = vmul.f32 %v2463_v58, %v1914_v60  ;;  %2104 = vmatmul.f32.gmra.mxu3 %v2034_v16 }
 0x2e2   : > { %v1760_v23 = vrot.slane %v1759_v48, 1  ;;  %v1762_v27 = vrot.slane %v1671_v24, 4  ;;  %v1921_v59 = vmul.f32 %v2465_v61, %v3757_v38  ;;  %2466 = vrsqrt.f32 %v1797_v42 }
 0x2e3   : > { %v2002_v46 = vmul.f32 %v1986_v40, %v3644_v0  ;;  %v1919_v49 = vsel %vm1918_vm4, %v2463_v58, %v1915_v35  ;;  %vm1927_vm5 = vweird.f32 %v2465_v61  ;;  %vm1936_vm9 = vweird.f32 %v1797_v42 }
 0x2e4   : > { %v1761_v3 = vadd.f32 %v1760_v23, %v1759_v48  ;;  %v1763_v63 = vadd.f32 %v1762_v27, %v1671_v24  ;;  %v1971_v5 = vmul.f32 %v3771_v41, %v1919_v49  ;;  %v1922_v31 = vmul.f32 %v2465_v61, %v1921_v59  ;;  %vm1928_vm7 = vmor %vm1926_vm6, %vm1927_vm5 }
 0x2e5   : > { %v2019_v54 = vadd.f32 %v3543_v47, %v2002_v46 }
 0x2e6   : > { %v1782_v43 = vmul.f32 %v1761_v3, %v2840_v55  ;;  %v1764_v50 = vrot.slane %v1763_v63, 2  ;;  %v1987_v19 = vperm.slane %v1971_v5, 1  ;;  %v1923_v14 = vmul.f32 0.5, %v1922_v31  ;;  %v2059_v5 = vld [vmem:[#allocation7 + $0x18] sm:$0xff] }
 0x2e7   : > { %v2035_v29 = vmax.f32 %v2019_v54, 0.0 }
 0x2e8   : > { %v1765_v32 = vadd.f32 %v1764_v50, %v1763_v63  ;;  %v1798_v33 = vadd.f32 1e-05, %v1782_v43  ;;  %v2467_v2 = vpop.eup %2466  ;;  %v2003_v57 = vmul.f32 %v1987_v19, %v3667_v8  ;;  %v1924_v36 = vsub.f32 1.5, %v1923_v14 }
 0x2e9   : > { %v1931_v7 = vmul.f32 %v2467_v2, %v1797_v42  ;;  %2107 = vmatmul.f32.gmra.mxu3 %v2035_v29  ;;  %vm1937_vm8 = vweird.f32 %v2467_v2 }
 0x2ea   : > { %v1766_v0 = vrot.slane %v1765_v32, 1  ;;  %2468 = vrsqrt.f32 %v1798_v33  ;;  %v2020_v22 = vadd.f32 %v3543_v47, %v2003_v57  ;;  %v1925_v25 = vmul.f32 %v2465_v61, %v1924_v36  ;;  %vm1938_vm10 = vmor %vm1936_vm9, %vm1937_vm8 }
 0x2eb   : > { %v1932_v45 = vmul.f32 %v2467_v2, %v1931_v7  ;;  %vm1946_vm12 = vweird.f32 %v1798_v33 }
 0x2ec   : > { %v1767_v62 = vadd.f32 %v1766_v0, %v1765_v32  ;;  %v1929_v39 = vsel %vm1928_vm7, %v2465_v61, %v1925_v25  ;;  %v2036_v12 = vmax.f32 %v2020_v22, 0.0 }
 0x2ed   : > { %v1972_v9 = vmul.f32 %v3771_v41, %v1929_v39  ;;  %v1933_v8 = vmul.f32 0.5, %v1932_v45 }
 0x2ee   : > { %v1783_v58 = vmul.f32 %v1767_v62, %v2840_v55 }
 0x2ef   : > { %v1988_v18 = vperm.slane %v1972_v9, 1  ;;  %v1934_v10 = vsub.f32 1.5, %v1933_v8 }
 0x2f0   : > { %v2469_v56 = vpop.eup %2468  ;;  %v1799_v44 = vadd.f32 1e-05, %v1783_v58 }
 0x2f1   : > { %v1941_v52 = vmul.f32 %v2469_v56, %v1798_v33  ;;  %v2004_v6 = vmul.f32 %v1988_v18, %v3700_v15  ;;  %v1935_v1 = vmul.f32 %v2467_v2, %v1934_v10  ;;  %2110 = vmatmul.f32.gmra.mxu3 %v2036_v12  ;;  %vm1947_vm11 = vweird.f32 %v2469_v56 }
 0x2f2   : > { %2470 = vrsqrt.f32 %v1799_v44  ;;  %vm1948_vm13 = vmor %vm1946_vm12, %vm1947_vm11  ;;  %vm1956_vm15 = vweird.f32 %v1799_v44 }
 0x2f3   : > { %v1942_v38 = vmul.f32 %v2469_v56, %v1941_v52  ;;  %v2021_v55 = vadd.f32 %v3543_v47, %v2004_v6  ;;  %v1939_v4 = vsel %vm1938_vm10, %v2467_v2, %v1935_v1 }
 0x2f4   : > { %v1973_v13 = vmul.f32 %v3771_v41, %v1939_v4 }
 0x2f5   : > { %v1943_v11 = vmul.f32 0.5, %v1942_v38  ;;  %v2037_v17 = vmax.f32 %v2021_v55, 0.0 }
 0x2f6   : > { %v1989_v51 = vperm.slane %v1973_v13, 1 }
 0x2f7   : > { %v1944_v20 = vsub.f32 1.5, %v1943_v11 }
 0x2f8   : > { %v2471_v28 = vpop.eup %2470  ;;  %v2005_v37 = vmul.f32 %v1989_v51, %v3724_v53 }
 0x2f9   : > { %v1945_v15 = vmul.f32 %v2469_v56, %v1944_v20  ;;  %v1951_v16 = vmul.f32 %v2471_v28, %v1799_v44  ;;  %2113 = vmatmul.f32.gmra.mxu3 %v2037_v17  ;;  %vm1957_vm14 = vweird.f32 %v2471_v28 }
 0x2fa   : > { %v2022_v26 = vadd.f32 %v3543_v47, %v2005_v37  ;;  %vm1958_vm0 = vmor %vm1956_vm15, %vm1957_vm14 }
 0x2fb   : > { %v1949_v48 = vsel %vm1948_vm13, %v2469_v56, %v1945_v15  ;;  %v1952_v24 = vmul.f32 %v2471_v28, %v1951_v16 }
 0x2fc   : > { %v1974_v34 = vmul.f32 %v3771_v41, %v1949_v48  ;;  %v2038_v42 = vmax.f32 %v2022_v26, 0.0 }
 0x2fd   : > { %v1953_v60 = vmul.f32 0.5, %v1952_v24 }
 0x2fe   : > { %v1990_v61 = vperm.slane %v1974_v34, 1 }
 0x2ff   : > { %v1954_v23 = vsub.f32 1.5, %v1953_v60 }
 0x300   : > { %v2006_v27 = vmul.f32 %v1990_v61, %v3750_v21  ;;  %v3796_v21 = vperm.slane %v2059_v5, 0 }
 0x301   : > { %v1955_v40 = vmul.f32 %v2471_v28, %v1954_v23  ;;  %2116 = vmatmul.f32.gmra.mxu3 %v2038_v42 }
 0x302   : > { %v2023_v53 = vadd.f32 %v3543_v47, %v2006_v27 }
 0x303   : > { %v1959_v35 = vsel %vm1958_vm0, %v2471_v28, %v1955_v40 }
 0x304   : > { %v1975_v59 = vmul.f32 %v3771_v41, %v1959_v35  ;;  %v2039_v63 = vmax.f32 %v2023_v53, 0.0 }
 0x306   : > { %v1991_v3 = vperm.slane %v1975_v59, 1 }
 0x308   : > { %v2007_v46 = vmul.f32 %v1991_v3, %v3767_v30 }
 0x309   : > { %2119 = vmatmul.f32.gmra.mxu3 %v2039_v63 }
 0x30a   : > { %v2024_v49 = vadd.f32 %v3543_v47, %v2007_v46 }
 0x30c   : > { %v2040_v31 = vmax.f32 %v2024_v49, 0.0 }
 0x311   : > { %2122 = vmatmul.f32.gmra.mxu3 %v2040_v31 }
 0x315   : > { %v2078_v43 = vpop.f32.mrf.mxu3 }
 0x316   : > { %v2079_v50 = vadd.f32 %v2078_v43, %v3796_v21 }
 0x318   : > { %2472 = vtanh.f32 %v2079_v50 }
 0x31d   : > { %v2081_v54 = vpop.f32.mrf.mxu3 }
 0x31e   : > { %v2473_v19 = vpop.eup %2472  ;;  %v2082_v41 = vadd.f32 %v2081_v54, %v3796_v21 }
 0x31f   : > { %v2142_v14 = vmul.f32 2.0, %v2473_v19 }
 0x320   : > { %2474 = vtanh.f32 %v2082_v41 }
 0x321   : > { %2158 = vst [vmem:[%s3802_s18] sm:$0xff] %v2142_v14 }
 0x325   : > { %v2084_v47 = vpop.f32.mrf.mxu3 }
 0x326   : > { %v2475_v30 = vpop.eup %2474  ;;  %v2085_v32 = vadd.f32 %v2084_v47, %v3796_v21 }
 0x327   : > { %v2143_v29 = vmul.f32 2.0, %v2475_v30 }
 0x328   : > { %2476 = vtanh.f32 %v2085_v32 }
 0x329   : > { %2159 = vst [vmem:[%s3802_s18 + $0x8] sm:$0xff] %v2143_v29 }
 0x32e   : > { %v2477_v33 = vpop.eup %2476 }
 0x32f   : > { %v2144_v2 = vmul.f32 2.0, %v2477_v33 }
 0x331   : > { %2160 = vst [vmem:[%s3802_s18 + $0x10] sm:$0xff] %v2144_v2 }
 0x333   : > { %v2087_v57 = vpop.f32.mrf.mxu3 }
 0x334   : > { %v2088_v36 = vadd.f32 %v2087_v57, %v3796_v21 }
 0x336   : > { %2478 = vtanh.f32 %v2088_v36 }
 0x33b   : > { %v2090_v0 = vpop.f32.mrf.mxu3 }
 0x33c   : > { %v2479_v7 = vpop.eup %2478  ;;  %v2091_v22 = vadd.f32 %v2090_v0, %v3796_v21 }
 0x33d   : > { %v2145_v25 = vmul.f32 2.0, %v2479_v7 }
 0x33e   : > { %2480 = vtanh.f32 %v2091_v22 }
 0x33f   : > { %2161 = vst [vmem:[%s3802_s18 + $0x18] sm:$0xff] %v2145_v25 }
 0x343   : > { %v2093_v62 = vpop.f32.mrf.mxu3 }
 0x344   : > { %v2481_v45 = vpop.eup %2480  ;;  %v2094_v39 = vadd.f32 %v2093_v62, %v3796_v21 }
 0x345   : > { %v2146_v58 = vmul.f32 2.0, %v2481_v45 }
 0x346   : > { %2482 = vtanh.f32 %v2094_v39 }
 0x347   : > { %2162 = vst [vmem:[%s3802_s18 + $0x20] sm:$0xff] %v2146_v58 }
 0x34c   : > { %v2483_v9 = vpop.eup %2482  ;;  %v2096_v12 = vpop.f32.mrf.mxu3 }
 0x34d   : > { %v2147_v8 = vmul.f32 2.0, %v2483_v9  ;;  %v2097_v56 = vadd.f32 %v2096_v12, %v3796_v21 }
 0x34f   : > { %2163 = vst [vmem:[%s3802_s18 + $0x28] sm:$0xff] %v2147_v8  ;;  %2484 = vtanh.f32 %v2097_v56 }
 0x354   : > { %v2099_v18 = vpop.f32.mrf.mxu3 }
 0x355   : > { %v2485_v10 = vpop.eup %2484  ;;  %v2100_v44 = vadd.f32 %v2099_v18, %v3796_v21 }
 0x356   : > { %v2148_v52 = vmul.f32 2.0, %v2485_v10 }
 0x357   : > { %2486 = vtanh.f32 %v2100_v44 }
 0x358   : > { %2164 = vst [vmem:[%s3802_s18 + $0x30] sm:$0xff] %v2148_v52 }
 0x35c   : > { %v2102_v6 = vpop.f32.mrf.mxu3 }
 0x35d   : > { %v2487_v1 = vpop.eup %2486  ;;  %v2103_v38 = vadd.f32 %v2102_v6, %v3796_v21 }
 0x35e   : > { %v2149_v55 = vmul.f32 2.0, %v2487_v1 }
 0x35f   : > { %2488 = vtanh.f32 %v2103_v38 }
 0x360   : > { %2165 = vst [vmem:[%s3802_s18 + $0x38] sm:$0xff] %v2149_v55 }
 0x364   : > { %v2105_v4 = vpop.f32.mrf.mxu3 }
 0x365   : > { %v2489_v13 = vpop.eup %2488  ;;  %v2106_v11 = vadd.f32 %v2105_v4, %v3796_v21 }
 0x366   : > { %v2150_v17 = vmul.f32 2.0, %v2489_v13 }
 0x367   : > { %2490 = vtanh.f32 %v2106_v11 }
 0x368   : > { %2166 = vst [vmem:[%s3802_s18 + $0x40] sm:$0xff] %v2150_v17 }
 0x36c   : > { %v2108_v51 = vpop.f32.mrf.mxu3 }
 0x36d   : > { %v2491_v20 = vpop.eup %2490  ;;  %v2109_v28 = vadd.f32 %v2108_v51, %v3796_v21 }
 0x36e   : > { %v2151_v37 = vmul.f32 2.0, %v2491_v20 }
 0x36f   : > { %2492 = vtanh.f32 %v2109_v28 }
 0x370   : > { %2167 = vst [vmem:[%s3802_s18 + $0x48] sm:$0xff] %v2151_v37 }
 0x374   : > { %v2111_v15 = vpop.f32.mrf.mxu3 }
 0x375   : > { %v2493_v16 = vpop.eup %2492  ;;  %v2112_v26 = vadd.f32 %v2111_v15, %v3796_v21 }
 0x376   : > { %v2152_v48 = vmul.f32 2.0, %v2493_v16 }
 0x377   : > { %2494 = vtanh.f32 %v2112_v26 }
 0x378   : > { %2168 = vst [vmem:[%s3802_s18 + $0x50] sm:$0xff] %v2152_v48 }
 0x37c   : > { %v2114_v24 = vpop.f32.mrf.mxu3 }
 0x37d   : > { %v2495_v34 = vpop.eup %2494  ;;  %v2115_v60 = vadd.f32 %v2114_v24, %v3796_v21 }
 0x37e   : > { %v2153_v61 = vmul.f32 2.0, %v2495_v34 }
 0x37f   : > { %2496 = vtanh.f32 %v2115_v60 }
 0x380   : > { %2169 = vst [vmem:[%s3802_s18 + $0x58] sm:$0xff] %v2153_v61 }
 0x384   : > { %v2117_v42 = vpop.f32.mrf.mxu3 }
 0x385   : > { %v2497_v23 = vpop.eup %2496  ;;  %v2118_v27 = vadd.f32 %v2117_v42, %v3796_v21 }
 0x386   : > { %v2154_v40 = vmul.f32 2.0, %v2497_v23 }
 0x387   : > { %2498 = vtanh.f32 %v2118_v27 }
 0x388   : > { %2170 = vst [vmem:[%s3802_s18 + $0x60] sm:$0xff] %v2154_v40 }
 0x38c   : > { %v2120_v53 = vpop.f32.mrf.mxu3 }
 0x38d   : > { %v2499_v35 = vpop.eup %2498  ;;  %v2121_v59 = vadd.f32 %v2120_v53, %v3796_v21 }
 0x38e   : > { %v2155_v3 = vmul.f32 2.0, %v2499_v35 }
 0x38f   : > { %2500 = vtanh.f32 %v2121_v59 }
 0x390   : > { %2171 = vst [vmem:[%s3802_s18 + $0x68] sm:$0xff] %v2155_v3 }
 0x394   : > { %v2123_v63 = vpop.f32.mrf.mxu3 }
 0x395   : > { %v2501_v46 = vpop.eup %2500  ;;  %v2124_v49 = vadd.f32 %v2123_v63, %v3796_v21 }
 0x396   : > { %v2156_v5 = vmul.f32 2.0, %v2501_v46 }
 0x397   : > { %2502 = vtanh.f32 %v2124_v49 }
 0x398   : > { %2172 = vst [vmem:[%s3802_s18 + $0x70] sm:$0xff] %v2156_v5 }
 0x39d   : > { %v2503_v31 = vpop.eup %2502 }
 0x39e   : > { %v2157_v43 = vmul.f32 2.0, %v2503_v31 }
 0x3a0   : > { %2173 = vst [vmem:[%s3802_s18 + $0x78] sm:$0xff] %v2157_v43 }
 0x3a1   : > { %2624 = shalt.err (!%p2621_p10)
}
 0x3a2   : > { %s2674_s11 = smov 128   ;;  %s2675_s24 = smov 8  }
 0x3a3   : > { %2312 = dma.vmem_to_hbm [thread:$0]  (%p2768_p3), %s2188_s27, 2048, %s2190_s28, %s2175_s4, %s2674_s11, %s2674_s11, %s2675_s24  }
 0x3a4 PF: > { %s2204_s25 = sand.u32 1, %s2655_s12   ;;  %p3877_p12 = scmp.ge.s32.totalorder %s2667_s15, 2 }
 0x3a5   : > { %s2205_s5 = scalar_lea.sflag [#allocation4], %s2204_s25 }
 0x3a6   : > { %p2326_p13 = pnand %p3877_p12, %p2731_p6 }
 0x3a8   : > { %p2327_p0 = pneg %p2326_p13 }
 0x3aa   : > { %2650 = dma.done.wait (%p2327_p0), %s2205_s5, 2048  }
 0x3ab   : > { %2652 = vsyncadd (%p2327_p0), %s2205_s5, 4294965248  ;;  %p17_p5 = scmp.ge.s32.totalorder %s2758_s6, 4   ;;  %s3878_s12 = smov %s2659_s13 }
 0x3ac   : > { %s3879_s13 = smov %s2663_s14  ;;  %s3880_s14 = smov %s2774_s10 }
 0x3ad   : > { %s3881_s15 = smov %s2758_s6  ;;  %19 = sbr.rel (!%p17_p5) target bundleno = 6 (0x6), region = 91 }
 0x3b2   :  { %2211 = vsyncpa [#allocation3], 1 }
 0x3b3   :  { %2213 = vsyncpa [#allocation3 + $0x1], 1 }
 0x3b4   :  { %2214 = vsyncpa [#allocation6], 1 }
 0x3b5   :  { %2215 = vsyncpa [#allocation4], 1 }
 0x3b6   :  { %2217 = vsyncpa [#allocation4 + $0x1], 1 }

</bundles_post_ra>
